<compile_context>
chip_gen: v7x
topology: tpu7x:2x2x1
jax: 0.10.0
libtpu: 0.0.40
codegen_flags: <defaults>
</compile_context>

<pallas_src>
import jax
import jax.numpy as jnp
from jax.experimental import pallas as pl
from jax.experimental.pallas import tpu as pltpu

N_INPUTS = 2
HIDDEN_LAYERS = 2
HIDDEN_SIZE = 512
N_OUTPUTS = 1


def _pick_tile_b(batch):
    """Largest tile in {512, 256, 128} that still yields >= 2 grid steps
    (feeds both v7x TensorCores / enables DMA-compute pipelining)."""
    for t in (512, 256, 128):
        if batch >= 2 * t:
            return t
    return 128


def _mlp_kernel(x_ref, w_in_ref, b_in_ref, w_h_ref, b_h_ref,
                w_out_ref, b_out_ref, o_ref):
    x = x_ref[...]                                        # (TB, N_INPUTS) f32

    # ---- input layer (K = N_INPUTS = 2): VPU outer product, skip the MXU ----
    h = x[:, 0:1] * w_in_ref[0:1, :]                      # (TB, H) f32
    for j in range(1, N_INPUTS):
        h = h + x[:, j:j + 1] * w_in_ref[j:j + 1, :]
    h = h + b_in_ref[...]                                 # f32, no activation

    # ---- hidden layers: bf16 MXU matmul, f32 accumulate/bias/tanh,
    #      activations kept in bf16 between layers ----
    for i in range(HIDDEN_LAYERS):
        acc = jnp.dot(h.astype(jnp.bfloat16), w_h_ref[i],
                      preferred_element_type=jnp.float32) + b_h_ref[i]
        h = jnp.tanh(acc).astype(jnp.bfloat16)            # (TB, H) bf16

    # ---- output layer (N = 1): VPU multiply + lane reduction, skip the MXU.
    #      Emit the tile result as a lane-dense (1, 1, TB) row.
    hf = h.astype(jnp.float32)
    y = jnp.sum(hf * w_out_ref[...], axis=-1, keepdims=True)      # (TB, 1) f32
    o_ref[...] = (y.reshape(1, 1, -1)
                  + b_out_ref[...].reshape(1, 1, -1)).astype(o_ref.dtype)


def mlp_forward(x, w_in, b_in, w_h, b_h, w_out, b_out, *, tile_b=None):
    """x: (B, N_INPUTS) f32.  Returns (B, N_OUTPUTS) f32.

    Weight layout:
      w_in : (N_INPUTS, H)      f32   (torch weight transposed)
      b_in : (1, H)             f32
      w_h  : (L, H, H)          bf16  (torch weights transposed, stacked)
      b_h  : (L, 1, H)          f32
      w_out: (1, H)             f32   (torch (n_out, in) layout, used as row)
      b_out: (1, N_OUTPUTS)     f32
    """
    B = x.shape[0]
    if tile_b is None:
        tile_b = _pick_tile_b(B)
    n_tiles = pl.cdiv(B, tile_b)
    Bp = n_tiles * tile_b
    if Bp != B:
        x = jnp.pad(x, ((0, Bp - B), (0, 0)))

    out = pl.pallas_call(
        _mlp_kernel,
        # Lane-dense output: one (1, tile_b) row per grid step.
        out_shape=jax.ShapeDtypeStruct((n_tiles, 1, tile_b), jnp.float32),
        grid_spec=pltpu.PrefetchScalarGridSpec(
            num_scalar_prefetch=0,
            grid=(n_tiles,),
            in_specs=[
                # batch-tiled activations
                pl.BlockSpec((tile_b, N_INPUTS), lambda i: (i, 0)),
                # weights: constant index_map -> DMA'd once, VMEM-resident
                pl.BlockSpec((N_INPUTS, HIDDEN_SIZE), lambda i: (0, 0)),
                pl.BlockSpec((1, HIDDEN_SIZE), lambda i: (0, 0)),
                pl.BlockSpec((HIDDEN_LAYERS, HIDDEN_SIZE, HIDDEN_SIZE),
                             lambda i: (0, 0, 0)),
                pl.BlockSpec((HIDDEN_LAYERS, 1, HIDDEN_SIZE),
                             lambda i: (0, 0, 0)),
                pl.BlockSpec((1, HIDDEN_SIZE), lambda i: (0, 0)),
                pl.BlockSpec((1, N_OUTPUTS), lambda i: (0, 0)),
            ],
            out_specs=pl.BlockSpec((1, 1, tile_b), lambda i: (i, 0, 0)),
        ),
        compiler_params=pltpu.CompilerParams(
            dimension_semantics=("parallel",)),
    )(x, w_in, b_in, w_h, b_h, w_out, b_out)

    # (n_tiles, 1, tile_b) -> (Bp, 1) -> (B, 1)
    return out.reshape(Bp, N_OUTPUTS)[:B]


def init_params(key):
    """Mimics torch.nn.Linear default init (U(-1/sqrt(fan_in), 1/sqrt(fan_in)))
    for input/hidden layers; out_layer is zero-filled as in the module."""
    ks = jax.random.split(key, 1 + HIDDEN_LAYERS)

    def linear(k, fan_in, fan_out):
        kw, kb = jax.random.split(k)
        bound = 1.0 / jnp.sqrt(float(fan_in))
        w = jax.random.uniform(kw, (fan_in, fan_out), jnp.float32, -bound, bound)
        b = jax.random.uniform(kb, (1, fan_out), jnp.float32, -bound, bound)
        return w, b

    w_in, b_in = linear(ks[0], N_INPUTS, HIDDEN_SIZE)

    w_h_list, b_h_list = [], []
    for i in range(HIDDEN_LAYERS):
        w, b = linear(ks[1 + i], HIDDEN_SIZE, HIDDEN_SIZE)
        w_h_list.append(w.astype(jnp.bfloat16))            # bf16 hidden weights
        b_h_list.append(b)
    w_h = jnp.stack(w_h_list, axis=0)                       # (L, H, H) bf16
    b_h = jnp.stack(b_h_list, axis=0)                       # (L, 1, H) f32

    # out_layer is explicitly zero-filled in the torch module's __init__
    w_out = jnp.zeros((1, HIDDEN_SIZE), jnp.float32)        # torch (n_out, in)
    b_out = jnp.zeros((1, N_OUTPUTS), jnp.float32)
    return w_in, b_in, w_h, b_h, w_out, b_out


def mlp_reference(x, w_in, b_in, w_h, b_h, w_out, b_out):
    """Pure-JAX reference using the same numerics (bf16 hidden weights and
    bf16 inter-layer activations, f32 accumulation / bias / tanh) as the
    kernel."""
    h = x[:, 0:1] * w_in[0:1, :]
    for j in range(1, N_INPUTS):
        h = h + x[:, j:j + 1] * w_in[j:j + 1, :]
    h = h + b_in
    for i in range(HIDDEN_LAYERS):
        acc = jnp.dot(h.astype(jnp.bfloat16), w_h[i],
                      preferred_element_type=jnp.float32) + b_h[i]
        h = jnp.tanh(acc).astype(jnp.bfloat16)
    return jnp.sum(h.astype(jnp.float32) * w_out, axis=-1, keepdims=True) + b_out


if __name__ == "__main__":
    key = jax.random.PRNGKey(0)
    kx, kp, ko = jax.random.split(key, 3)

    B = 512                                   # -> tile_b=256, 2 parallel tiles
    x = jax.random.normal(kx, (B, N_INPUTS), jnp.float32)
    params = init_params(kp)

    # 1) Faithful module params: zero-init out layer -> output must be zeros.
    y = jax.block_until_ready(mlp_forward(x, *params))
    assert y.shape == (B, N_OUTPUTS)
    assert jnp.allclose(y, 0.0)

    # 2) Exercise the full numeric path with a non-zero output layer.
    w_in, b_in, w_h, b_h, _, _ = params
    kw, kb = jax.random.split(ko)
    bound = 1.0 / jnp.sqrt(float(HIDDEN_SIZE))
    w_out = jax.random.uniform(kw, (1, HIDDEN_SIZE), jnp.float32, -bound, bound)
    b_out = jax.random.uniform(kb, (1, N_OUTPUTS), jnp.float32, -bound, bound)

    y2 = jax.block_until_ready(
        mlp_forward(x, w_in, b_in, w_h, b_h, w_out, b_out))
    y2_ref = mlp_reference(x, w_in, b_in, w_h, b_h, w_out, b_out)
    assert jnp.allclose(y2, y2_ref, atol=1e-2, rtol=1e-2), \
        float(jnp.max(jnp.abs(y2 - y2_ref)))

    # 3) Also exercise a non-multiple / single-tile batch (padding path).
    xs = x[:100]
    y3 = jax.block_until_ready(
        mlp_forward(xs, w_in, b_in, w_h, b_h, w_out, b_out))
    y3_ref = mlp_reference(xs, w_in, b_in, w_h, b_h, w_out, b_out)
    assert y3.shape == (100, N_OUTPUTS)
    assert jnp.allclose(y3, y3_ref, atol=1e-2, rtol=1e-2), \
        float(jnp.max(jnp.abs(y3 - y3_ref)))

    print("KERNEL_OK")
</pallas_src>

<mosaic_0001>
module attributes {stable_mosaic.version = 11 : i64} {
  func.func @_mlp_kernel(%arg0: i32, %arg1: memref<256x2xf32, #tpu.memory_space<vmem>>, %arg2: memref<2x512xf32, #tpu.memory_space<vmem>>, %arg3: memref<1x512xf32, #tpu.memory_space<vmem>>, %arg4: memref<2x512x512xbf16, #tpu.memory_space<vmem>>, %arg5: memref<2x1x512xf32, #tpu.memory_space<vmem>>, %arg6: memref<1x512xf32, #tpu.memory_space<vmem>>, %arg7: memref<1x1xf32, #tpu.memory_space<vmem>>, %arg8: memref<1x1x256xf32, #tpu.memory_space<vmem>>) attributes {dimension_semantics = [#tpu.dimension_semantics<parallel>], iteration_bounds = array<i64: 2>, scalar_prefetch = 0 : i64, scratch_operands = 0 : i64, tpu.core_type = #tpu.core_type<tc>, window_params = [{transform_indices = @transform_0, window_bounds = array<i64: 256, 2>}, {pipeline_mode = #tpu.pipeline_mode<synchronous>, transform_indices = @transform_1, window_bounds = array<i64: 2, 512>}, {pipeline_mode = #tpu.pipeline_mode<synchronous>, transform_indices = @transform_2, window_bounds = array<i64: 1, 512>}, {pipeline_mode = #tpu.pipeline_mode<synchronous>, transform_indices = @transform_3, window_bounds = array<i64: 2, 512, 512>}, {pipeline_mode = #tpu.pipeline_mode<synchronous>, transform_indices = @transform_4, window_bounds = array<i64: 2, 1, 512>}, {pipeline_mode = #tpu.pipeline_mode<synchronous>, transform_indices = @transform_5, window_bounds = array<i64: 1, 512>}, {pipeline_mode = #tpu.pipeline_mode<synchronous>, transform_indices = @transform_6, window_bounds = array<i64: 1, 1>}, {transform_indices = @transform_7, window_bounds = array<i64: 1, 1, 256>}]} {
    %c0 = arith.constant 0 : index
    %c0_0 = arith.constant 0 : index
    %0 = vector.load %arg1[%c0, %c0_0] : memref<256x2xf32, #tpu.memory_space<vmem>>, vector<256x2xf32>
    %1 = vector.extract_strided_slice %0 {offsets = [0, 0], sizes = [256, 1], strides = [1, 1]} : vector<256x2xf32> to vector<256x1xf32>
    %c0_1 = arith.constant 0 : index
    %c0_2 = arith.constant 0 : index
    %2 = vector.load %arg2[%c0_1, %c0_2] : memref<2x512xf32, #tpu.memory_space<vmem>>, vector<1x512xf32>
    %3 = vector.broadcast %1 : vector<256x1xf32> to vector<256x512xf32>
    %4 = vector.broadcast %2 : vector<1x512xf32> to vector<256x512xf32>
    %5 = arith.mulf %3, %4 : vector<256x512xf32>
    %6 = vector.extract_strided_slice %0 {offsets = [0, 1], sizes = [256, 1], strides = [1, 1]} : vector<256x2xf32> to vector<256x1xf32>
    %c1 = arith.constant 1 : index
    %c0_3 = arith.constant 0 : index
    %7 = vector.load %arg2[%c1, %c0_3] : memref<2x512xf32, #tpu.memory_space<vmem>>, vector<1x512xf32>
    %8 = vector.broadcast %6 : vector<256x1xf32> to vector<256x512xf32>
    %9 = vector.broadcast %7 : vector<1x512xf32> to vector<256x512xf32>
    %10 = arith.mulf %8, %9 : vector<256x512xf32>
    %11 = arith.addf %5, %10 : vector<256x512xf32>
    %c0_4 = arith.constant 0 : index
    %c0_5 = arith.constant 0 : index
    %12 = vector.load %arg3[%c0_4, %c0_5] : memref<1x512xf32, #tpu.memory_space<vmem>>, vector<1x512xf32>
    %13 = vector.broadcast %12 : vector<1x512xf32> to vector<256x512xf32>
    %14 = arith.addf %11, %13 : vector<256x512xf32>
    %15 = arith.truncf %14 : vector<256x512xf32> to vector<256x512xbf16>
    %c0_6 = arith.constant 0 : index
    %c0_7 = arith.constant 0 : index
    %c0_8 = arith.constant 0 : index
    %16 = vector.load %arg4[%c0_6, %c0_7, %c0_8] : memref<2x512x512xbf16, #tpu.memory_space<vmem>>, vector<1x512x512xbf16>
    %17 = vector.shape_cast %16 : vector<1x512x512xbf16> to vector<512x512xbf16>
    %cst = arith.constant dense<0.000000e+00> : vector<256x512xf32>
    %18 = tpu.matmul %15, %17, %cst {dimension_numbers = #tpu.dot_dimension_numbers<[1], [0], [0], [1], [0, 0, 1, 1], [], []>} : vector<256x512xbf16>, vector<512x512xbf16>, vector<256x512xf32> -> vector<256x512xf32>
    %c0_9 = arith.constant 0 : index
    %c0_10 = arith.constant 0 : index
    %c0_11 = arith.constant 0 : index
    %19 = vector.load %arg5[%c0_9, %c0_10, %c0_11] : memref<2x1x512xf32, #tpu.memory_space<vmem>>, vector<1x1x512xf32>
    %20 = vector.shape_cast %19 : vector<1x1x512xf32> to vector<1x512xf32>
    %21 = vector.broadcast %20 : vector<1x512xf32> to vector<256x512xf32>
    %22 = arith.addf %18, %21 : vector<256x512xf32>
    %23 = math.tanh %22 : vector<256x512xf32>
    %24 = arith.truncf %23 : vector<256x512xf32> to vector<256x512xbf16>
    %c1_12 = arith.constant 1 : index
    %c0_13 = arith.constant 0 : index
    %c0_14 = arith.constant 0 : index
    %25 = vector.load %arg4[%c1_12, %c0_13, %c0_14] : memref<2x512x512xbf16, #tpu.memory_space<vmem>>, vector<1x512x512xbf16>
    %26 = vector.shape_cast %25 : vector<1x512x512xbf16> to vector<512x512xbf16>
    %cst_15 = arith.constant dense<0.000000e+00> : vector<256x512xf32>
    %27 = tpu.matmul %24, %26, %cst_15 {dimension_numbers = #tpu.dot_dimension_numbers<[1], [0], [0], [1], [0, 0, 1, 1], [], []>} : vector<256x512xbf16>, vector<512x512xbf16>, vector<256x512xf32> -> vector<256x512xf32>
    %c1_16 = arith.constant 1 : index
    %c0_17 = arith.constant 0 : index
    %c0_18 = arith.constant 0 : index
    %28 = vector.load %arg5[%c1_16, %c0_17, %c0_18] : memref<2x1x512xf32, #tpu.memory_space<vmem>>, vector<1x1x512xf32>
    %29 = vector.shape_cast %28 : vector<1x1x512xf32> to vector<1x512xf32>
    %30 = vector.broadcast %29 : vector<1x512xf32> to vector<256x512xf32>
    %31 = arith.addf %27, %30 : vector<256x512xf32>
    %32 = math.tanh %31 : vector<256x512xf32>
    %33 = arith.truncf %32 : vector<256x512xf32> to vector<256x512xbf16>
    %34 = arith.extf %33 : vector<256x512xbf16> to vector<256x512xf32>
    %c0_19 = arith.constant 0 : index
    %c0_20 = arith.constant 0 : index
    %35 = vector.load %arg6[%c0_19, %c0_20] : memref<1x512xf32, #tpu.memory_space<vmem>>, vector<1x512xf32>
    %36 = vector.broadcast %35 : vector<1x512xf32> to vector<256x512xf32>
    %37 = arith.mulf %34, %36 : vector<256x512xf32>
    %cst_21 = arith.constant dense<0.000000e+00> : vector<256xf32>
    %38 = vector.multi_reduction <add>, %37, %cst_21 [1] : vector<256x512xf32> to vector<256xf32>
    %39 = vector.shape_cast %38 : vector<256xf32> to vector<256x1xf32>
    %40 = vector.shape_cast %39 : vector<256x1xf32> to vector<1x1x256xf32>
    %c0_22 = arith.constant 0 : index
    %c0_23 = arith.constant 0 : index
    %41 = vector.load %arg7[%c0_22, %c0_23] : memref<1x1xf32, #tpu.memory_space<vmem>>, vector<1x1xf32>
    %42 = vector.shape_cast %41 : vector<1x1xf32> to vector<1x1x1xf32>
    %43 = vector.broadcast %42 : vector<1x1x1xf32> to vector<1x1x256xf32>
    %44 = arith.addf %40, %43 : vector<1x1x256xf32>
    %c0_24 = arith.constant 0 : index
    %c0_25 = arith.constant 0 : index
    %c0_26 = arith.constant 0 : index
    %45 = vector.load %arg8[%c0_24, %c0_25, %c0_26] : memref<1x1x256xf32, #tpu.memory_space<vmem>>, vector<1x1x256xf32>
    tpu.vector_store %arg8[%c0_24, %c0_25, %c0_26], %44 {strides = array<i32>} : memref<1x1x256xf32, #tpu.memory_space<vmem>>, vector<1x1x256xf32>,
    return
  }
  func.func @transform_0(%arg0: i32) -> (i32, i32) {
    %c0_i32 = arith.constant 0 : i32
    %c0_i32_0 = arith.constant 0 : i32
    return %arg0, %c0_i32 : i32, i32
  }
  func.func @transform_1(%arg0: i32) -> (i32, i32) {
    %c0_i32 = arith.constant 0 : i32
    %c0_i32_0 = arith.constant 0 : i32
    %c0_i32_1 = arith.constant 0 : i32
    return %c0_i32, %c0_i32_0 : i32, i32
  }
  func.func @transform_2(%arg0: i32) -> (i32, i32) {
    %c0_i32 = arith.constant 0 : i32
    %c0_i32_0 = arith.constant 0 : i32
    %c0_i32_1 = arith.constant 0 : i32
    return %c0_i32, %c0_i32_0 : i32, i32
  }
  func.func @transform_3(%arg0: i32) -> (i32, i32, i32) {
    %c0_i32 = arith.constant 0 : i32
    %c0_i32_0 = arith.constant 0 : i32
    %c0_i32_1 = arith.constant 0 : i32
    %c0_i32_2 = arith.constant 0 : i32
    return %c0_i32, %c0_i32_0, %c0_i32_1 : i32, i32, i32
  }
  func.func @transform_4(%arg0: i32) -> (i32, i32, i32) {
    %c0_i32 = arith.constant 0 : i32
    %c0_i32_0 = arith.constant 0 : i32
    %c0_i32_1 = arith.constant 0 : i32
    %c0_i32_2 = arith.constant 0 : i32
    return %c0_i32, %c0_i32_0, %c0_i32_1 : i32, i32, i32
  }
  func.func @transform_5(%arg0: i32) -> (i32, i32) {
    %c0_i32 = arith.constant 0 : i32
    %c0_i32_0 = arith.constant 0 : i32
    %c0_i32_1 = arith.constant 0 : i32
    return %c0_i32, %c0_i32_0 : i32, i32
  }
  func.func @transform_6(%arg0: i32) -> (i32, i32) {
    %c0_i32 = arith.constant 0 : i32
    %c0_i32_0 = arith.constant 0 : i32
    %c0_i32_1 = arith.constant 0 : i32
    return %c0_i32, %c0_i32_0 : i32, i32
  }
  func.func @transform_7(%arg0: i32) -> (i32, i32, i32) {
    %c0_i32 = arith.constant 0 : i32
    %c0_i32_0 = arith.constant 0 : i32
    %c0_i32_1 = arith.constant 0 : i32
    return %arg0, %c0_i32, %c0_i32_0 : i32, i32, i32
  }
}

</mosaic_0001>

<bundles_post_ra>
// kernel: tpu_custom_call.1
= control target key start
LH: loop header
LB: loop body
LE: loop exit
PB: predicated region body
PF: predicated region fallthrough
CT: control target
= control target key end

     0   :  { %s13004_s0 = inlined_call_operand.vmem [shape: f32[512,2], index: 0, kind: input, shape index: {}]   ;;  %s13005_s1 = inlined_call_operand.vmem [shape: f32[2,512], index: 1, kind: input, shape index: {}]   ;;  %s13006_s2 = inlined_call_operand.vmem [shape: f32[1,512], index: 2, kind: input, shape index: {}]   ;;  %s13007_s3 = inlined_call_operand.hbm [shape: bf16[2,512,512], index: 3, kind: input, shape index: {}]   ;;  %s13008_s4 = inlined_call_operand.vmem [shape: f32[2,1,512], index: 4, kind: input, shape index: {}]   ;;  %s13009_s5 = inlined_call_operand.vmem [shape: f32[1,512], index: 5, kind: input, shape index: {}]   ;;  %s13010_s6 = inlined_call_operand.<no memory space> [shape: f32[1,1], index: 6, kind: input, shape index: {}]   ;;  %s13011_s7 = inlined_call_operand.hbm [shape: f32[2,1,256], index: 7, kind: output, shape index: {}]  }
   0x1   :  { %v12_v0 = vstv %s13010_s6 }
   0x2   :  { %13 = vst [vmem:[#allocation2] sm:$0x1] %v12_v0 }
   0x3   :  { %14 = vsyncpa [#allocation4], 0 }
   0x4   :  { %15 = vsyncpa [#allocation5], 0 }
   0x5   :  { %17 = vsyncpa [#allocation5 + $0x1], 0  ;;  %s10191_s26 = smov 0   ;;  %s10193_s27 = smov 0  }
   0x6   :  { %s10195_s28 = smov 0   ;;  %s10197_s29 = smov 0  }
   0x7 LB: > { %s10212_s6 = sadd.s32 4294967295, %s10139_s29   ;;  %s8266_s30 = sadd.s32 4294967294, %s10139_s29   ;;  %s10139_s29 = sphi %s10197_s29, %s13173_s29   ;;  %s10135_s28 = sphi %s10195_s28, %s13172_s28   ;;  %s10131_s27 = sphi %s10193_s27, %s13171_s27   ;;  %s10127_s26 = sphi %s10191_s26, %s13170_s26  }
   0x8   : > { %s10216_s8 = sadd.s32 1, %s10139_s29   ;;  %s182_s9 = sadd.s32 1, %s10135_s28 }
   0x9   : > { %s179_s10 = ssub.s32 %s10139_s29, %s10216_s8  ;;  %p192_p0 = scmp.ne.s32.totalorder %s10135_s28, %s10131_s27 }
   0xa   : > { %p180_p1 = scmp.eq.s32.totalorder %s179_s10, 0  ;;  %p193_p2 = scmp.eq.s32.totalorder %s10212_s6, 1 }
   0xb   : > { %p198_p3 = scmp.ne.s32.totalorder %s10131_s27, %s10127_s26  ;;  %p199_p4 = scmp.eq.s32.totalorder %s8266_s30, 1 }
   0xc   : > { %s10227_s11 = scalar_select %p180_p1, %s10135_s28, %s182_s9  }
   0xd   : > { %p10229_p5 = por %p193_p2, %p192_p0  ;;  %p10233_p6 = por %p199_p4, %p198_p3 }
   0xe   : > { %p8267_p7 = scmp.ge.s32.totalorder %s10139_s29, 1  ;;  %p206_p8 = scmp.lt.s32.totalorder %s10139_s29, 3 }
   0xf   : > { %s13083_s12 = scalar_select %p10229_p5, 1, 0 }
  0x10   : > { %s13084_s13 = scalar_select %p10233_p6, 1, 0 }
  0x11   : > { %p13012_p9 = scmp.eq.s32.totalorder %s10212_s6, 0  ;;  %p10240_p10 = pnand %p8267_p7, %p206_p8 }
  0x12   : > { %s10141_s15 = smov [#allocation3]   ;;  %s10045_s20 = scalar_lea.hbm %s13007_s3, 32768 }
  0x13   : > { %s13085_s14 = scalar_select %p10240_p10, 1, 0 }
  0x14   : > { %s224_s16 = sshll.u32 %s10141_s15, 4  ;;  %p9057_p11 = pneg %p10240_p10  ;;  %s225_s16 = int_to_ptr.vmem [resolvable:$true] %s224_s16 }
  0x15   : > { %p10046_p13 = scmp.ne.s32.totalorder %s13007_s3, %s10045_s20  ;;  %p10052_p3 = scmp.lt.u32.totalorder %s10045_s20, %s13007_s3 }
  0x16   : > { %p10248_p12 = pnand %p13012_p9, %p9057_p11 }
  0x18   : > { %p10047_p0 = pneg %p10248_p12 }
  0x1a   : > { %p10048_p1 = pnand %p10047_p0, %p10046_p13 }
  0x1c   : > { %p10049_p2 = pneg %p10048_p1 }
  0x1e   : > { %p10054_p4 = pnand %p10052_p3, %p10049_p2 }
  0x20   : > { %10057 = shalt.err (!%p10054_p4)
}
  0x21   : > { %s10058_s25 = scalar_lea.vmem %s225_s16, 32768  ;;  %p10066_p9 = scmp.lt.s32.totalorder %s225_s16, %s225_s16 }
  0x22   : > { %p10059_p7 = scmp.ne.s32.totalorder %s225_s16, %s10058_s25  ;;  %p10067_p6 = scmp.lt.s32.totalorder %s10058_s25, %s10058_s25 }
  0x24   : > { %p10061_p8 = pnand %p10059_p7, %p10047_p0  ;;  %p10068_p5 = por %p10067_p6, %p10066_p9 }
  0x26   : > { %p10062_p11 = pneg %p10061_p8 }
  0x28   : > { %p10069_p10 = pnand %p10068_p5, %p10062_p11 }
  0x2a   : > { %10072 = shalt.err (!%p10069_p10)
}
  0x2b   : > { %s10142_s30 = smov 256   ;;  %s10143_s9 = smov 16  }
  0x2c   : > { %9060 = dma.hbm_to_vmem [thread:$0]  (!%p10248_p12), %s13007_s3, 32768, %s225_s16, [#allocation4], %s10142_s30, %s10142_s30, %s10143_s9  }
  0x2d   : > { %p13087_p13 = scmp.ne.s32.totalorder %s13085_s14, 0 }
  0x2f   : > { %258 = sbr.rel (%p13087_p13) target bundleno = 1484 (0x5cc), region = 48 }
  0x36   : > { %p13088_p1 = scmp.eq.s32.totalorder %s10212_s6, 0 }
  0x38   : > { %10118 = dma.done.wait (%p13088_p1), [#allocation4], 32768   ;;  %p13089_p0 = pmov %p13088_p1 }
  0x39   : > { %s10275_s18 = sshll.u32 %s10212_s6, 5  ;;  %v10144_v1 = vmov 1   ;;  %v13017_v2 = vmov 0   ;;  %v9149_v7 = vld [vmem:[#allocation3 + $0x4] ss:$16 sps:$4 sm:$0xff]   ;;  %vm7980_vm0 = vcmask 130112  }
  0x3a   : > { %10120 = vsyncadd (%p13089_p0), [#allocation4], 4294934528  ;;  %9107 = vset.pattern.permute.xlu1 %v10144_v1  ;;  %9106 = vset.pattern.permute.xlu0 %v13017_v2  ;;  %p291_p5 = scmp.lt.s32.totalorder %s10275_s18, 63  ;;  %v9151_v8 = vld [vmem:[#allocation3 + $0xc] ss:$16 sps:$4 sm:$0xff]   ;;  %vm7987_vm1 = vcmask 195712   ;;  %s12960_s23 = scalar_lea.hbm %s13011_s7, %s10275_s18 }
  0x3b   : > { %2049 = vmatprep.subr.bf16.mxu0 %v9149_v7  ;;  %v9153_v9 = vld [vmem:[#allocation3] ss:$16 sps:$4 sm:$0xff]   ;;  %v9154_v10 = vld [vmem:[#allocation3 + $0x8] ss:$16 sps:$4 sm:$0xff]   ;;  %2435 = vmatprep.subr.bf16.mxu1 %v9151_v8  ;;  %v9155_v11 = vld [vmem:[#allocation3 + $0x24] ss:$16 sps:$4 sm:$0xff]  }
  0x3c   : > { %s292_s14 = scalar_select %p291_p5, %s10275_s18, 63  ;;  %v9157_v12 = vld [vmem:[#allocation3 + $0x2c] ss:$16 sps:$4 sm:$0xff]   ;;  %2050 = vmatpush1.bf16.msra.mxu0 %v9153_v9  ;;  %2436 = vmatpush1.bf16.msra.mxu1 %v9154_v10  ;;  %v9159_v13 = vld [vmem:[#allocation3 + $0x20] ss:$16 sps:$4 sm:$0xff]   ;;  %vm7994_vm2 = vcmask 261312  }
  0x3d   : > { %2051 = vmatprep.subr.bf16.mxu0 %v9155_v11  ;;  %2437 = vmatprep.subr.bf16.mxu1 %v9157_v12  ;;  %v9160_v14 = vld [vmem:[#allocation3 + $0x28] ss:$16 sps:$4 sm:$0xff]   ;;  %v9161_v15 = vld [vmem:[#allocation3 + $0x44] ss:$16 sps:$4 sm:$0xff]   ;;  %v9163_v16 = vld [vmem:[#allocation3 + $0x4c] ss:$16 sps:$4 sm:$0xff]  }
  0x3e   : > { %s8274_s16 = sshll.u32 %s292_s14, 3  ;;  %v9165_v19 = vld [vmem:[#allocation3 + $0x40] ss:$16 sps:$4 sm:$0xff]   ;;  %v9166_v20 = vld [vmem:[#allocation3 + $0x48] ss:$16 sps:$4 sm:$0xff]   ;;  %vm8001_vm3 = vcmask 326912  }
  0x3f   : > { %s10284_s20 = scalar_lea.vmem %s13004_s0, %s8274_s16  ;;  %v9167_v21 = vld [vmem:[#allocation3 + $0x64] ss:$16 sps:$4 sm:$0xff]   ;;  %v9169_v22 = vld [vmem:[#allocation3 + $0x6c] ss:$16 sps:$4 sm:$0xff]   ;;  %v9171_v24 = vld [vmem:[#allocation3 + $0x60] ss:$16 sps:$4 sm:$0xff]  }
  0x40   : > { %v296_v3 = vld [vmem:[%s10284_s20] sm:$0xff]  ;;  %v297_v4 = vld [vmem:[%s10284_s20 + $0x8] sm:$0xff]  ;;  %v298_v5 = vld [vmem:[%s10284_s20 + $0x10] sm:$0xff]  ;;  %2052 = vmatpush1.bf16.msra.mxu0 %v9159_v13  ;;  %2438 = vmatpush1.bf16.msra.mxu1 %v9160_v14  ;;  %vm8008_vm4 = vcmask 392512   ;;  %vm8015_vm5 = vcmask 458112   ;;  %vm8022_vm6 = vcmask 523712  }
  0x41   : > { %641 = vperm.xlu1 %9107, %v296_v3   ;;  %331 = vperm.xlu0 %9106, %v296_v3   ;;  %v299_v6 = vld [vmem:[%s10284_s20 + $0x18] sm:$0xff]  ;;  %v300_v17 = vld [vmem:[%s10284_s20 + $0x20] sm:$0xff]  ;;  %v302_v18 = vld [vmem:[%s10284_s20 + $0x30] sm:$0xff]  ;;  %vm8029_vm7 = vcmask 589312   ;;  %vm8036_vm8 = vcmask 654912   ;;  %vm8043_vm9 = vcmask 720512  }
  0x42   : > { %2053 = vmatprep.subr.bf16.mxu0 %v9161_v15  ;;  %2439 = vmatprep.subr.bf16.mxu1 %v9163_v16  ;;  %v301_v23 = vld [vmem:[%s10284_s20 + $0x28] sm:$0xff]  ;;  %v9177_v28 = vld [vmem:[#allocation3 + $0x80] ss:$16 sps:$4 sm:$0xff]   ;;  %v303_v37 = vld [vmem:[%s10284_s20 + $0x38] sm:$0xff]  ;;  %vm8050_vm10 = vcmask 786112   ;;  %vm8057_vm11 = vcmask 851712  }
  0x43   : > { %v9172_v25 = vld [vmem:[#allocation3 + $0x68] ss:$16 sps:$4 sm:$0xff]   ;;  %v9173_v26 = vld [vmem:[#allocation3 + $0x84] ss:$16 sps:$4 sm:$0xff]   ;;  %v9175_v27 = vld [vmem:[#allocation3 + $0x8c] ss:$16 sps:$4 sm:$0xff]  }
  0x44   : > { %2054 = vmatpush1.bf16.msra.mxu0 %v9165_v19  ;;  %2440 = vmatpush1.bf16.msra.mxu1 %v9166_v20  ;;  %v9178_v29 = vld [vmem:[#allocation3 + $0x88] ss:$16 sps:$4 sm:$0xff]   ;;  %v9179_v30 = vld [vmem:[#allocation3 + $0xa4] ss:$16 sps:$4 sm:$0xff]   ;;  %v9181_v31 = vld [vmem:[#allocation3 + $0xac] ss:$16 sps:$4 sm:$0xff]  }
  0x45   : > { %645 = vperm.xlu1 %9107, %v297_v4   ;;  %336 = vperm.xlu0 %9106, %v297_v4   ;;  %v10300_v32 = vld [vmem:[%s10284_s20 + $0x48] sm:$0xff]  ;;  %v9183_v33 = vld [vmem:[#allocation3 + $0xa0] ss:$16 sps:$4 sm:$0xff]   ;;  %v307_v63 = vld [vmem:[%s10284_s20 + $0x58] sm:$0xff]  ;;  %vm8064_vm12 = vcmask 917312   ;;  %s287_s17 = sand.u32 1, %s10131_s27  }
  0x46   : > { %2055 = vmatprep.subr.bf16.mxu0 %v9167_v21  ;;  %2441 = vmatprep.subr.bf16.mxu1 %v9169_v22  ;;  %v9184_v34 = vld [vmem:[#allocation3 + $0xa8] ss:$16 sps:$4 sm:$0xff]   ;;  %v9185_v35 = vld [vmem:[#allocation3 + $0xc4] ss:$16 sps:$4 sm:$0xff]   ;;  %v9187_v36 = vld [vmem:[#allocation3 + $0xcc] ss:$16 sps:$4 sm:$0xff]  }
  0x47   : > { %v306_v38 = vld [vmem:[%s10284_s20 + $0x50] sm:$0xff]  ;;  %v9190_v40 = vld [vmem:[#allocation3 + $0xc8] ss:$16 sps:$4 sm:$0xff]   ;;  %v304_v47 = vld [vmem:[%s10284_s20 + $0x40] sm:$0xff]  ;;  %vm8071_vm13 = vcmask 982912   ;;  %s8272_s19 = sshll.u32 %s287_s17, 1 }
  0x48   : > { %2056 = vmatpush1.bf16.msra.mxu0 %v9171_v24  ;;  %2442 = vmatpush1.bf16.msra.mxu1 %v9172_v25  ;;  %v9189_v39 = vld [vmem:[#allocation3 + $0xc0] ss:$16 sps:$4 sm:$0xff]   ;;  %v9191_v41 = vld [vmem:[#allocation3 + $0xe4] ss:$16 sps:$4 sm:$0xff]   ;;  %v9193_v42 = vld [vmem:[#allocation3 + $0xec] ss:$16 sps:$4 sm:$0xff]  }
  0x49   : > { %9108 = vset.pattern.permute.xlu1 %v13017_v2  ;;  %341 = vperm.xlu0 %9106, %v298_v5   ;;  %v9195_v43 = vld [vmem:[#allocation3 + $0xe0] ss:$16 sps:$4 sm:$0xff]   ;;  %v9196_v44 = vld [vmem:[#allocation3 + $0xe8] ss:$16 sps:$4 sm:$0xff]   ;;  %v9197_v45 = vld [vmem:[#allocation3 + $0x104] ss:$16 sps:$4 sm:$0xff]  }
  0x4a   : > { %346 = vperm.xlu1 %9108, %v299_v6   ;;  %2057 = vmatprep.subr.bf16.mxu0 %v9173_v26  ;;  %v9199_v46 = vld [vmem:[#allocation3 + $0x10c] ss:$16 sps:$4 sm:$0xff]   ;;  %v9201_v49 = vld [vmem:[#allocation3 + $0x100] ss:$16 sps:$4 sm:$0xff]   ;;  %v9202_v50 = vld [vmem:[#allocation3 + $0x108] ss:$16 sps:$4 sm:$0xff]  }
  0x4b   : > { %2443 = vmatprep.subr.bf16.mxu1 %v9175_v27  ;;  %v310_v48 = vld [vmem:[%s10284_s20 + $0x70] sm:$0xff]  ;;  %v10312_v53 = vld [vmem:[%s10284_s20 + $0x68] sm:$0xff]  ;;  %v308_v14 = vld [vmem:[%s10284_s20 + $0x60] sm:$0xff]  ;;  %vm8078_vm14 = vcmask 1048512   ;;  %s8181_s24 = scalar_lea.sflag [#allocation5], %s287_s17  ;;  %p13168_p9 = scmp.ne.s32.totalorder %s13083_s12, 0 }
  0x4c   : > { %2058 = vmatpush1.bf16.msra.mxu0 %v9177_v28  ;;  %2444 = vmatpush1.bf16.msra.mxu1 %v9178_v29  ;;  %v9203_v51 = vld [vmem:[#allocation3 + $0x124] ss:$16 sps:$4 sm:$0xff]   ;;  %v9205_v52 = vld [vmem:[#allocation3 + $0x12c] ss:$16 sps:$4 sm:$0xff]   ;;  %v9207_v54 = vld [vmem:[#allocation3 + $0x120] ss:$16 sps:$4 sm:$0xff]  }
  0x4d   : > { %9109 = vset.pattern.permute.xlu0 %v10144_v1  ;;  %2059 = vmatprep.subr.bf16.mxu0 %v9179_v30  ;;  %v9208_v55 = vld [vmem:[#allocation3 + $0x128] ss:$16 sps:$4 sm:$0xff]   ;;  %v9209_v56 = vld [vmem:[#allocation3 + $0x144] ss:$16 sps:$4 sm:$0xff]   ;;  %v9211_v57 = vld [vmem:[#allocation3 + $0x14c] ss:$16 sps:$4 sm:$0xff]  }
  0x4e   : > { %9110 = vset.pattern.permute.xlu1 %v10144_v1  ;;  %649 = vperm.xlu0 %9109, %v298_v5   ;;  %v9213_v58 = vld [vmem:[#allocation3 + $0x140] ss:$16 sps:$4 sm:$0xff]   ;;  %v9214_v59 = vld [vmem:[#allocation3 + $0x148] ss:$16 sps:$4 sm:$0xff]   ;;  %v9215_v60 = vld [vmem:[#allocation3 + $0x164] ss:$16 sps:$4 sm:$0xff]  }
  0x4f   : > { %653 = vperm.xlu1 %9110, %v299_v6   ;;  %2445 = vmatprep.subr.bf16.mxu1 %v9181_v31  ;;  %v9217_v61 = vld [vmem:[#allocation3 + $0x16c] ss:$16 sps:$4 sm:$0xff]   ;;  %v9219_v0 = vld [vmem:[#allocation3 + $0x160] ss:$16 sps:$4 sm:$0xff]   ;;  %v9220_v3 = vld [vmem:[#allocation3 + $0x168] ss:$16 sps:$4 sm:$0xff]  }
  0x50   : > { %2060 = vmatpush1.bf16.msra.mxu0 %v9183_v33  ;;  %2446 = vmatpush1.bf16.msra.mxu1 %v9184_v34  ;;  %v10318_v62 = vld [vmem:[%s10284_s20 + $0x88] sm:$0xff]  ;;  %v314_v6 = vld [vmem:[%s10284_s20 + $0x90] sm:$0xff]  ;;  %v311_v25 = vld [vmem:[%s10284_s20 + $0x78] sm:$0xff]  ;;  %v13015_v33 = vlaneseq  ;;  %s10147_s30 = smov [#allocation6]  }
  0x51   : > { %2061 = vmatprep.subr.bf16.mxu0 %v9185_v35  ;;  %2447 = vmatprep.subr.bf16.mxu1 %v9187_v36  ;;  %v9221_v4 = vld [vmem:[#allocation3 + $0x184] ss:$16 sps:$4 sm:$0xff]   ;;  %v9223_v5 = vld [vmem:[#allocation3 + $0x18c] ss:$16 sps:$4 sm:$0xff]   ;;  %v9225_v7 = vld [vmem:[#allocation3 + $0x180] ss:$16 sps:$4 sm:$0xff]  }
  0x52   : > { %665 = vperm.xlu0 %9109, %v302_v18   ;;  %v9226_v8 = vld [vmem:[#allocation3 + $0x188] ss:$16 sps:$4 sm:$0xff]   ;;  %v9227_v9 = vld [vmem:[#allocation3 + $0x1a4] ss:$16 sps:$4 sm:$0xff]   ;;  %v9229_v10 = vld [vmem:[#allocation3 + $0x1ac] ss:$16 sps:$4 sm:$0xff]  }
  0x53   : > { %9111 = vset.pattern.permute.xlu1 %v13017_v2  ;;  %v9231_v11 = vld [vmem:[#allocation3 + $0x1a0] ss:$16 sps:$4 sm:$0xff]   ;;  %v9232_v12 = vld [vmem:[#allocation3 + $0x1a8] ss:$16 sps:$4 sm:$0xff]   ;;  %v9233_v13 = vld [vmem:[#allocation3 + $0x1c4] ss:$16 sps:$4 sm:$0xff]  }
  0x54   : > { %351 = vperm.xlu1 %9111, %v300_v17   ;;  %2062 = vmatpush1.bf16.msra.mxu0 %v9189_v39  ;;  %v9235_v15 = vld [vmem:[#allocation3 + $0x1cc] ss:$16 sps:$4 sm:$0xff]   ;;  %v9237_v16 = vld [vmem:[#allocation3 + $0x1c0] ss:$16 sps:$4 sm:$0xff]   ;;  %v9239_v19 = vld [vmem:[#allocation3 + $0x1e4] ss:$16 sps:$4 sm:$0xff]  }
  0x55   : > { %2448 = vmatpush1.bf16.msra.mxu1 %v9190_v40  ;;  %2063 = vmatprep.subr.bf16.mxu0 %v9191_v41  ;;  %v9241_v20 = vld [vmem:[#allocation3 + $0x1ec] ss:$16 sps:$4 sm:$0xff]   ;;  %v9243_v21 = vld [vmem:[#allocation3 + $0x1e0] ss:$16 sps:$4 sm:$0xff]   ;;  %v9247_v24 = vld [vmem:[#allocation3 + $0x204] ss:$16 sps:$4 sm:$0xff]  }
  0x56   : > { %9114 = vset.pattern.permute.xlu0 %v13017_v2  ;;  %2449 = vmatprep.subr.bf16.mxu1 %v9193_v42  ;;  %v317_v22 = vld [vmem:[%s10284_s20 + $0xa8] sm:$0xff]  ;;  %v322_v27 = vld [vmem:[%s10284_s20 + $0xd0] sm:$0xff]  ;;  %v312_v28 = vld [vmem:[%s10284_s20 + $0x80] sm:$0xff]  ;;  %v10362_v34 = vshrl.u32 %v13015_v33, 7  ;;  %s10077_s9 = sshll.u32 %s10147_s30, 4  ;;  %s10078_s9 = int_to_ptr.vmem [resolvable:$false] %s10077_s9 }
  0x57   : > { %356 = vperm.xlu0 %9114, %v301_v23   ;;  %v10336_v26 = vld [vmem:[%s10284_s20 + $0xc8] sm:$0xff]  ;;  %v326_v30 = vld [vmem:[%s10284_s20 + $0xf0] sm:$0xff]  ;;  %v315_v31 = vld [vmem:[%s10284_s20 + $0x98] sm:$0xff]  ;;  %s10079_s10 = scalar_lea.vmem %s10078_s9, 64 }
  0x58   : > { %9112 = vset.pattern.permute.xlu1 %v10144_v1  ;;  %2064 = vmatpush1.bf16.msra.mxu0 %v9195_v43  ;;  %v10347_v29 = vld [vmem:[%s10284_s20 + $0xe8] sm:$0xff]  ;;  %13090 = vst [vmem:[#allocation9_spill] sm:$0xff] %v10362_v34  ;;  %v10365_v35 = vsub.s32 0, %v10362_v34  ;;  %v10368_v36 = vsub.s32 1, %v10362_v34  ;;  %v319_v39 = vld [vmem:[%s10284_s20 + $0xb8] sm:$0xff] }
  0x59   : > { %657 = vperm.xlu1 %9112, %v300_v17   ;;  %2450 = vmatpush1.bf16.msra.mxu1 %v9196_v44  ;;  %v318_v17 = vld [vmem:[%s10284_s20 + $0xb0] sm:$0xff] }
  0x5a   : > { %2065 = vmatprep.subr.bf16.mxu0 %v9197_v45  ;;  %2451 = vmatprep.subr.bf16.mxu1 %v9199_v46  ;;  %13091 = vst [vmem:[#allocation10_spill] sm:$0xff] %v10365_v35  ;;  %13092 = vst [vmem:[#allocation11_spill] sm:$0xff] %v10368_v36 }
  0x5b   : > { %361 = vperm.xlu0 %9114, %v302_v18   ;;  %v9238_v18 = vld [vmem:[#allocation3 + $0x1c8] ss:$16 sps:$4 sm:$0xff]  }
  0x5c   : > { %2066 = vmatpush1.bf16.msra.mxu0 %v9201_v49 }
  0x5d   : > { %661 = vperm.xlu1 %9112, %v301_v23   ;;  %2452 = vmatpush1.bf16.msra.mxu1 %v9202_v50  ;;  %v9244_v23 = vld [vmem:[#allocation3 + $0x1e8] ss:$16 sps:$4 sm:$0xff]   ;;  %v10413_v50 = vld [vmem:[%s13006_s2] sm:$0xf] }
  0x5e   : > { %2067 = vmatprep.subr.bf16.mxu0 %v9203_v51  ;;  %2453 = vmatprep.subr.bf16.mxu1 %v9205_v52 }
  0x5f   : > { %376 = vperm.xlu0 %9114, %v10300_v32  }
  0x60   : > { %2068 = vmatpush1.bf16.msra.mxu0 %v9207_v54 }
  0x61   : > { %9113 = vset.pattern.permute.xlu1 %v13017_v2  ;;  %2454 = vmatpush1.bf16.msra.mxu1 %v9208_v55 }
  0x62   : > { %366 = vperm.xlu1 %9113, %v303_v37   ;;  %2069 = vmatprep.subr.bf16.mxu0 %v9209_v56 }
  0x63   : > { %381 = vperm.xlu0 %9114, %v306_v38   ;;  %2455 = vmatprep.subr.bf16.mxu1 %v9211_v57 }
  0x64   : > { %2070 = vmatpush1.bf16.msra.mxu0 %v9213_v58 }
  0x65   : > { %2456 = vmatpush1.bf16.msra.mxu1 %v9214_v59  ;;  %2071 = vmatprep.subr.bf16.mxu0 %v9215_v60  ;;  %v10432_v60 = vrot.slane %v10413_v50, %v10365_v35 }
  0x66   : > { %9115 = vset.pattern.permute.xlu1 %v10144_v1  ;;  %2457 = vmatprep.subr.bf16.mxu1 %v9217_v61 }
  0x67   : > { %669 = vperm.xlu1 %9115, %v303_v37   ;;  %9119 = vset.pattern.permute.xlu0 %v10144_v1  ;;  %v10373_v37 = vld [vmem:[%s13005_s1 + $0x1] ss:$2 sm:$0xf] }
  0x68   : > { %681 = vperm.xlu0 %9119, %v306_v38   ;;  %2072 = vmatpush1.bf16.msra.mxu0 %v9219_v0  ;;  %v10378_v38 = vld [vmem:[%s13005_s1] ss:$2 sm:$0xf]  ;;  %v10383_v40 = vrot.slane %v10373_v37, %v10365_v35  ;;  %v10400_v45 = vrot.slane %v10373_v37, %v10368_v36  ;;  %v10439_v0 = vrot.slane %v10413_v50, %v10368_v36 }
  0x69   : > { %2458 = vmatpush1.bf16.msra.mxu1 %v9220_v3  ;;  %2073 = vmatprep.subr.bf16.mxu0 %v9221_v4  ;;  %v10389_v42 = vrot.slane %v10378_v38, %v10365_v35  ;;  %v10396_v44 = vrot.slane %v10378_v38, %v10368_v36  ;;  %v9274_v3 = vld [vmem:[#allocation3 + $0x20c] ss:$16 sps:$4 sm:$0xff]   ;;  %v9296_v36 = vld [vmem:[#allocation3 + $0x360] ss:$16 sps:$4 sm:$0xff]  }
  0x6a   : > { %2459 = vmatprep.subr.bf16.mxu1 %v9223_v5 }
  0x6b   : > { %9116 = vset.pattern.permute.xlu1 %v13017_v2 }
  0x6c   : > { %371 = vperm.xlu1 %9116, %v304_v47   ;;  %697 = vperm.xlu0 %9119, %v310_v48  }
  0x6d   : > { %2074 = vmatpush1.bf16.msra.mxu0 %v9225_v7  ;;  %2460 = vmatpush1.bf16.msra.mxu1 %v9226_v8 }
  0x6e   : > { %2075 = vmatprep.subr.bf16.mxu0 %v9227_v9  ;;  %2461 = vmatprep.subr.bf16.mxu1 %v9229_v10 }
  0x70   : > { %9117 = vset.pattern.permute.xlu1 %v10144_v1  ;;  %9124 = vset.pattern.permute.xlu0 %v13017_v2 }
  0x71   : > { %673 = vperm.xlu1 %9117, %v304_v47   ;;  %396 = vperm.xlu0 %9124, %v10312_v53  }
  0x72   : > { %2076 = vmatpush1.bf16.msra.mxu0 %v9231_v11  ;;  %2462 = vmatpush1.bf16.msra.mxu1 %v9232_v12 }
  0x73   : > { %2077 = vmatprep.subr.bf16.mxu0 %v9233_v13  ;;  %2463 = vmatprep.subr.bf16.mxu1 %v9235_v15 }
  0x75   : > { %677 = vperm.xlu1 %9117, %v10300_v32   ;;  %401 = vperm.xlu0 %9124, %v310_v48   ;;  %v316_v32 = vld [vmem:[%s10284_s20 + $0xa0] sm:$0xff] }
  0x76   : > { %2078 = vmatpush1.bf16.msra.mxu0 %v9237_v16  ;;  %2464 = vmatpush1.bf16.msra.mxu1 %v9238_v18 }
  0x77   : > { %2079 = vmatprep.subr.bf16.mxu0 %v9239_v19  ;;  %2465 = vmatprep.subr.bf16.mxu1 %v9241_v20 }
  0x79   : > { %9118 = vset.pattern.permute.xlu1 %v13017_v2  ;;  %416 = vperm.xlu0 %9124, %v10318_v62  }
  0x7a   : > { %386 = vperm.xlu1 %9118, %v307_v63   ;;  %2080 = vmatpush1.bf16.msra.mxu0 %v9243_v21 }
  0x7b   : > { %2466 = vmatpush1.bf16.msra.mxu1 %v9244_v23  ;;  %2242 = vmatprep.subr.bf16.mxu0 %v9247_v24  ;;  %v9245_v23 = vld [vmem:[#allocation3 + $0x200] ss:$16 sps:$4 sm:$0xff]  }
  0x7c   : > { %2628 = vmatprep.subr.bf16.mxu1 %v9274_v3  ;;  %v323_v3 = vld [vmem:[%s10284_s20 + $0xd8] sm:$0xff] }
  0x7d   : > { %421 = vperm.xlu0 %9124, %v314_v6  }
  0x7e   : > { %9120 = vset.pattern.permute.xlu1 %v10144_v1 }
  0x7f   : > { %685 = vperm.xlu1 %9120, %v307_v63  }
  0x81   : > { %9129 = vset.pattern.permute.xlu0 %v10144_v1 }
  0x82   : > { %713 = vperm.xlu0 %9129, %v314_v6  }
  0x83   : > { %9121 = vset.pattern.permute.xlu1 %v13017_v2 }
  0x84   : > { %391 = vperm.xlu1 %9121, %v308_v14  }
  0x86   : > { %729 = vperm.xlu0 %9129, %v318_v17  }
  0x88   : > { %9122 = vset.pattern.permute.xlu1 %v10144_v1 }
  0x89   : > { %689 = vperm.xlu1 %9122, %v308_v14  }
  0x8a   : > { %9134 = vset.pattern.permute.xlu0 %v13017_v2 }
  0x8b   : > { %436 = vperm.xlu0 %9134, %v317_v22  }
  0x8d   : > { %693 = vperm.xlu1 %9122, %v10312_v53  }
  0x8f   : > { %441 = vperm.xlu0 %9134, %v318_v17  }
  0x91   : > { %9123 = vset.pattern.permute.xlu1 %v13017_v2 }
  0x92   : > { %406 = vperm.xlu1 %9123, %v311_v25  }
  0x93   : > { %456 = vperm.xlu0 %9134, %v10336_v26  }
  0x96   : > { %9125 = vset.pattern.permute.xlu1 %v10144_v1 }
  0x97   : > { %701 = vperm.xlu1 %9125, %v311_v25   ;;  %9139 = vset.pattern.permute.xlu0 %v10144_v1 }
  0x98   : > { %745 = vperm.xlu0 %9139, %v322_v27  }
  0x9b   : > { %9126 = vset.pattern.permute.xlu1 %v13017_v2 }
  0x9c   : > { %411 = vperm.xlu1 %9126, %v312_v28   ;;  %9140 = vset.pattern.permute.xlu0 %v13017_v2 }
  0x9d   : > { %461 = vperm.xlu0 %9140, %v322_v27  }
  0xa0   : > { %9127 = vset.pattern.permute.xlu1 %v10144_v1 }
  0xa1   : > { %705 = vperm.xlu1 %9127, %v312_v28   ;;  %476 = vperm.xlu0 %9140, %v10347_v29   ;;  %v9250_v28 = vld [vmem:[#allocation3 + $0x224] ss:$16 sps:$4 sm:$0xff]  }
  0xa5   : > { %709 = vperm.xlu1 %9127, %v10318_v62   ;;  %481 = vperm.xlu0 %9140, %v326_v30   ;;  %v320_v62 = vld [vmem:[%s10284_s20 + $0xc0] sm:$0xff] }
  0xa9   : > { %9128 = vset.pattern.permute.xlu1 %v13017_v2  ;;  %9145 = vset.pattern.permute.xlu0 %v10144_v1 }
  0xaa   : > { %426 = vperm.xlu1 %9128, %v315_v31   ;;  %761 = vperm.xlu0 %9145, %v326_v30   ;;  %v9272_v30 = vld [vmem:[#allocation3 + $0x208] ss:$16 sps:$4 sm:$0xff]  }
  0xae   : > { %9130 = vset.pattern.permute.xlu1 %v10144_v1  ;;  %9148 = vset.pattern.permute.xlu0 %v13017_v2 }
  0xaf   : > { %717 = vperm.xlu1 %9130, %v315_v31  }
  0xb3   : > { %9131 = vset.pattern.permute.xlu1 %v13017_v2 }
  0xb4   : > { %431 = vperm.xlu1 %9131, %v316_v32  }
  0xb8   : > { %9132 = vset.pattern.permute.xlu1 %v10144_v1 }
  0xb9   : > { %721 = vperm.xlu1 %9132, %v316_v32  }
  0xbd   : > { %725 = vperm.xlu1 %9132, %v317_v22  }
  0xc0   : > { %v10385_v41 = vpop.permute.xlu1 %641  ;;  %v10391_v43 = vpop.permute.xlu0 %331 }
  0xc1   : > { %9133 = vset.pattern.permute.xlu1 %v13017_v2  ;;  %v789_v46 = vmul.f32 %v10383_v40, %v10385_v41  ;;  %v510_v47 = vmul.f32 %v10389_v42, %v10391_v43  ;;  %v511_v53 = vmul.f32 %v10396_v44, %v10391_v43  ;;  %v790_v54 = vmul.f32 %v10400_v45, %v10385_v41 }
  0xc2   : > { %446 = vperm.xlu1 %9133, %v319_v39  }
  0xc3   : > { %v917_v59 = vadd.f32 %v789_v46, %v510_v47  ;;  %v918_v63 = vadd.f32 %v790_v54, %v511_v53  ;;  %v9253_v54 = vld [vmem:[#allocation3 + $0x244] ss:$16 sps:$4 sm:$0xff]  }
  0xc4   : > { %v10406_v48 = vpop.permute.xlu1 %645  ;;  %v10408_v49 = vpop.permute.xlu0 %336 }
  0xc5   : > { %v793_v51 = vmul.f32 %v10383_v40, %v10406_v48  ;;  %v514_v52 = vmul.f32 %v10389_v42, %v10408_v49  ;;  %v515_v55 = vmul.f32 %v10396_v44, %v10408_v49  ;;  %v794_v56 = vmul.f32 %v10400_v45, %v10406_v48 }
  0xc6   : > { %9135 = vset.pattern.permute.xlu1 %v10144_v1  ;;  %v1067_v8 = vadd.f32 %v10432_v60, %v917_v59  ;;  %v1068_v9 = vadd.f32 %v10439_v0, %v918_v63  ;;  %v9251_v59 = vld [vmem:[#allocation3 + $0x240] ss:$16 sps:$4 sm:$0xff]  }
  0xc7   : > { %733 = vperm.xlu1 %9135, %v319_v39   ;;  %v921_v57 = vadd.f32 %v793_v51, %v514_v52  ;;  %v922_v4 = vadd.f32 %v794_v56, %v515_v55  ;;  %v9277_v39 = vld [vmem:[#allocation3 + $0x22c] ss:$16 sps:$4 sm:$0xff]   ;;  %v9248_v52 = vld [vmem:[#allocation3 + $0x220] ss:$16 sps:$4 sm:$0xff]  }
  0xc8   : > { %v10428_v58 = vpop.permute.xlu0 %341 }
  0xc9   : > { %v10434_v61 = vpop.permute.xlu1 %346  ;;  %v1071_v5 = vadd.f32 %v10432_v60, %v921_v57  ;;  %v518_v6 = vmul.f32 %v10389_v42, %v10428_v58  ;;  %v519_v7 = vmul.f32 %v10396_v44, %v10428_v58  ;;  %v1072_v10 = vadd.f32 %v10439_v0, %v922_v4  ;;  %v9256_v4 = vld [vmem:[#allocation3 + $0x264] ss:$16 sps:$4 sm:$0xff]  }
  0xca   : > { %v522_v12 = vmul.f32 %v10389_v42, %v10434_v61  ;;  %v523_v17 = vmul.f32 %v10396_v44, %v10434_v61 }
  0xcb   : > { %9136 = vset.pattern.permute.xlu1 %v13017_v2  ;;  %v1195_v14 = vpack.c.bf16 %v1071_v5, %v1067_v8  ;;  %v1196_v18 = vpack.c.bf16 %v1072_v10, %v1068_v9  ;;  %v9283_v10 = vld [vmem:[#allocation3 + $0x24c] ss:$16 sps:$4 sm:$0xff]  }
  0xcc   : > { %451 = vperm.xlu1 %9136, %v320_v62  }
  0xcd   : > { %v10450_v11 = vpop.permute.xlu0 %649  ;;  %2081 = vmatprep.mubr.bf16.mxu0 %v1196_v18  ;;  %2467 = vmatprep.mubr.bf16.mxu1 %v1196_v18  ;;  %v9254_v18 = vld [vmem:[#allocation3 + $0x260] ss:$16 sps:$4 sm:$0xff]  }
  0xce   : > { %v10454_v13 = vpop.permute.xlu1 %653  ;;  %v797_v15 = vmul.f32 %v10383_v40, %v10450_v11  ;;  %v798_v16 = vmul.f32 %v10400_v45, %v10450_v11  ;;  %2082 = vmatmul.mubr.bf16.vlgmr.msra.gmra.mrb[0].mxu0 %v1195_v14  ;;  %2468 = vmatmul.mubr.bf16.vlgmr.msra.gmra.mrb[0].mxu1 %v1195_v14 }
  0xcf   : > { %v801_v19 = vmul.f32 %v10383_v40, %v10454_v13  ;;  %v802_v20 = vmul.f32 %v10400_v45, %v10454_v13  ;;  %2243 = vmatpush1.bf16.msra.mxu0 %v9245_v23  ;;  %2629 = vmatpush1.bf16.msra.mxu1 %v9272_v30 }
  0xd0   : > { %9137 = vset.pattern.permute.xlu1 %v10144_v1  ;;  %v926_v21 = vadd.f32 %v798_v16, %v519_v7  ;;  %v925_v22 = vadd.f32 %v797_v15, %v518_v6  ;;  %2244 = vmatprep.subr.bf16.mxu0 %v9250_v28  ;;  %v9275_v6 = vld [vmem:[#allocation3 + $0x228] ss:$16 sps:$4 sm:$0xff]  }
  0xd1   : > { %v930_v24 = vadd.f32 %v802_v20, %v523_v17  ;;  %v929_v25 = vadd.f32 %v801_v19, %v522_v12  ;;  %v10467_v27 = vpop.permute.xlu0 %665  ;;  %737 = vperm.xlu1 %9137, %v320_v62   ;;  %2630 = vmatprep.subr.bf16.mxu1 %v9277_v39  ;;  %v9259_v20 = vld [vmem:[#allocation3 + $0x284] ss:$16 sps:$4 sm:$0xff]  }
  0xd2   : > { %13093 = vst [vmem:[#allocation12_spill] sm:$0xff] %v10467_v27  ;;  %v1076_v31 = vadd.f32 %v10439_v0, %v926_v21  ;;  %v1075_v32 = vadd.f32 %v10432_v60, %v925_v22  ;;  %v813_v21 = vmul.f32 %v10383_v40, %v10467_v27 }
  0xd3   : > { %v10471_v46 = vpop.permute.xlu1 %351  ;;  %v1080_v47 = vadd.f32 %v10439_v0, %v930_v24  ;;  %v1079_v51 = vadd.f32 %v10432_v60, %v929_v25  ;;  %2245 = vmatpush1.bf16.msra.mxu0 %v9248_v52  ;;  %2631 = vmatpush1.bf16.msra.mxu1 %v9275_v6  ;;  %v9281_v24 = vld [vmem:[#allocation3 + $0x248] ss:$16 sps:$4 sm:$0xff]   ;;  %v814_v25 = vmul.f32 %v10400_v45, %v10467_v27  ;;  %v9262_v6 = vld [vmem:[#allocation3 + $0x2a4] ss:$16 sps:$4 sm:$0xff]  }
  0xd4   : > { %13094 = vst [vmem:[#allocation13_spill] sm:$0xff] %v10471_v46  ;;  %2246 = vmatprep.subr.bf16.mxu0 %v9253_v54  ;;  %v527_v5 = vmul.f32 %v10396_v44, %v10471_v46  ;;  %v526_v7 = vmul.f32 %v10389_v42, %v10471_v46  ;;  %2632 = vmatprep.subr.bf16.mxu1 %v9283_v10  ;;  %v324_v54 = vld [vmem:[%s10284_s20 + $0xe0] sm:$0xff] }
  0xd5   : > { %v1200_v53 = vpack.c.bf16 %v1080_v47, %v1076_v31  ;;  %v1199_v55 = vpack.c.bf16 %v1079_v51, %v1075_v32  ;;  %741 = vperm.xlu1 %9137, %v10336_v26   ;;  %v9286_v32 = vld [vmem:[#allocation3 + $0x26c] ss:$16 sps:$4 sm:$0xff]  }
  0xd6   : > { %v10475_v56 = vpop.permute.xlu0 %356 }
  0xd7   : > { %2091 = vmatprep.mubr.bf16.mxu0 %v1200_v53  ;;  %2477 = vmatprep.mubr.bf16.mxu1 %v1200_v53  ;;  %v530_v8 = vmul.f32 %v10389_v42, %v10475_v56  ;;  %v531_v9 = vmul.f32 %v10396_v44, %v10475_v56 }
  0xd8   : > { %v10478_v57 = vpop.permute.xlu1 %657  ;;  %2092 = vmatmul.mubr.bf16.gmra.mrb[4].mxu0 %v1199_v55  ;;  %2478 = vmatmul.mubr.bf16.gmra.mrb[4].mxu1 %v1199_v55 }
  0xd9   : > { %13095 = vst [vmem:[#allocation14_spill] sm:$0xff] %v10478_v57  ;;  %v805_v62 = vmul.f32 %v10383_v40, %v10478_v57  ;;  %v806_v63 = vmul.f32 %v10400_v45, %v10478_v57  ;;  %9138 = vset.pattern.permute.xlu1 %v13017_v2  ;;  %2247 = vmatpush1.bf16.msra.mxu0 %v9251_v59 }
  0xda   : > { %v10487_v26 = vpop.permute.xlu0 %361  ;;  %466 = vperm.xlu1 %9138, %v323_v3   ;;  %2248 = vmatprep.subr.bf16.mxu0 %v9256_v4  ;;  %v9284_v4 = vld [vmem:[#allocation3 + $0x268] ss:$16 sps:$4 sm:$0xff]  }
  0xdb   : > { %13096 = vst [vmem:[#allocation15_spill] sm:$0xff] %v10487_v26  ;;  %v934_v14 = vadd.f32 %v806_v63, %v527_v5  ;;  %v933_v17 = vadd.f32 %v805_v62, %v526_v7  ;;  %v534_v30 = vmul.f32 %v10389_v42, %v10487_v26  ;;  %v535_v31 = vmul.f32 %v10396_v44, %v10487_v26  ;;  %v9338_v26 = vld [vmem:[#allocation3 + $0x3e8] ss:$16 sps:$4 sm:$0xff]  }
  0xdc   : > { %v10496_v12 = vpop.permute.xlu1 %661  ;;  %2633 = vmatpush1.bf16.msra.mxu1 %v9281_v24 }
  0xdd   : > { %v809_v15 = vmul.f32 %v10383_v40, %v10496_v12  ;;  %v810_v16 = vmul.f32 %v10400_v45, %v10496_v12  ;;  %v1084_v28 = vadd.f32 %v10439_v0, %v934_v14  ;;  %v1083_v51 = vadd.f32 %v10432_v60, %v933_v17  ;;  %2249 = vmatpush1.bf16.msra.mxu0 %v9254_v18 }
  0xde   : > { %v10502_v19 = vpop.permute.xlu0 %376  ;;  %9141 = vset.pattern.permute.xlu1 %v10144_v1  ;;  %2250 = vmatprep.subr.bf16.mxu0 %v9259_v20  ;;  %v942_v62 = vadd.f32 %v814_v25, %v535_v31  ;;  %v941_v63 = vadd.f32 %v813_v21, %v534_v30  ;;  %v9260_v21 = vld [vmem:[#allocation3 + $0x2a0] ss:$16 sps:$4 sm:$0xff]  }
  0xdf   : > { %13097 = vst [vmem:[#allocation16_spill] sm:$0xff] %v10502_v19  ;;  %v938_v22 = vadd.f32 %v810_v16, %v531_v9  ;;  %v937_v23 = vadd.f32 %v809_v15, %v530_v8  ;;  %749 = vperm.xlu1 %9141, %v323_v3   ;;  %2634 = vmatprep.subr.bf16.mxu1 %v9286_v32  ;;  %v9257_v3 = vld [vmem:[#allocation3 + $0x280] ss:$16 sps:$4 sm:$0xff]   ;;  %v9292_v15 = vld [vmem:[#allocation3 + $0x28c] ss:$16 sps:$4 sm:$0xff]  }
  0xe0   : > { %v1092_v16 = vadd.f32 %v10439_v0, %v942_v62  ;;  %v1091_v20 = vadd.f32 %v10432_v60, %v941_v63  ;;  %2635 = vmatpush1.bf16.msra.mxu1 %v9284_v4  ;;  %v9263_v32 = vld [vmem:[#allocation3 + $0x2c0] ss:$16 sps:$4 sm:$0xff]   ;;  %v327_v62 = vld [vmem:[%s10284_s20 + $0xf8] sm:$0xff]  ;;  %s289_s20 = scalar_lea.vmem [#allocation6], %s8272_s19 }
  0xe1   : > { %v10514_v39 = vpop.permute.xlu1 %366  ;;  %v1088_v47 = vadd.f32 %v10439_v0, %v938_v22  ;;  %v1087_v52 = vadd.f32 %v10432_v60, %v937_v23  ;;  %2251 = vmatpush1.bf16.msra.mxu0 %v9257_v3  ;;  %v9265_v22 = vld [vmem:[#allocation3 + $0x2c4] ss:$16 sps:$4 sm:$0xff]   ;;  %2636 = vmatprep.subr.bf16.mxu1 %v9292_v15  ;;  %v9295_v63 = vld [vmem:[#allocation3 + $0x2ac] ss:$16 sps:$4 sm:$0xff]   ;;  %v9266_v3 = vld [vmem:[#allocation3 + $0x2e0] ss:$16 sps:$4 sm:$0xff]  }
  0xe2   : > { %13098 = vst [vmem:[#allocation17_spill] sm:$0xff] %v10514_v39  ;;  %v10519_v53 = vpop.permute.xlu0 %381  ;;  %v538_v7 = vmul.f32 %v10389_v42, %v10514_v39  ;;  %v539_v8 = vmul.f32 %v10396_v44, %v10514_v39  ;;  %2252 = vmatprep.subr.bf16.mxu0 %v9262_v6  ;;  %v9293_v15 = vld [vmem:[#allocation3 + $0x2a8] ss:$16 sps:$4 sm:$0xff]   ;;  %s8195_s6 = sshll.u32 %s289_s20, 4  ;;  %s12962_s6 = int_to_ptr.vmem [resolvable:$true] %s8195_s6 }
  0xe3   : > { %13099 = vst [vmem:[#allocation18_spill] sm:$0xff] %v10519_v53  ;;  %v1204_v55 = vpack.c.bf16 %v1088_v47, %v1084_v28  ;;  %v1203_v59 = vpack.c.bf16 %v1087_v52, %v1083_v51  ;;  %9142 = vset.pattern.permute.xlu1 %v13017_v2  ;;  %v9268_v47 = vld [vmem:[#allocation3 + $0x2e4] ss:$16 sps:$4 sm:$0xff]   ;;  %s10073_s25 = scalar_lea.vmem %s12962_s6, 32  ;;  %p10080_p2 = scmp.lt.s32.totalorder %s12962_s6, %s10078_s9 }
  0xe4   : > { %471 = vperm.xlu1 %9142, %v324_v54   ;;  %p10074_p6 = scmp.ne.s32.totalorder %s12962_s6, %s10073_s25  ;;  %p10081_p3 = scmp.lt.s32.totalorder %s10079_s10, %s10073_s25 }
  0xe5   : > { %2101 = vmatprep.mubr.bf16.mxu0 %v1204_v55  ;;  %2487 = vmatprep.mubr.bf16.mxu1 %v1204_v55 }
  0xe6   : > { %v10523_v5 = vpop.permute.xlu1 %669  ;;  %2102 = vmatmul.mubr.bf16.gmra.mrb[8].mxu0 %v1203_v59  ;;  %2488 = vmatmul.mubr.bf16.gmra.mrb[8].mxu1 %v1203_v59  ;;  %p10075_p10 = pnand %p10074_p6, %p13168_p9  ;;  %p10082_p4 = por %p10081_p3, %p10080_p2 }
  0xe7   : > { %13100 = vst [vmem:[#allocation19_spill] sm:$0xff] %v10523_v5  ;;  %v817_v9 = vmul.f32 %v10383_v40, %v10523_v5  ;;  %v818_v10 = vmul.f32 %v10400_v45, %v10523_v5  ;;  %v10533_v14 = vpop.permute.xlu0 %681  ;;  %2253 = vmatpush1.bf16.msra.mxu0 %v9260_v21  ;;  %v9269_v21 = vld [vmem:[#allocation3 + $0x300] ss:$16 sps:$4 sm:$0xff]  }
  0xe8   : > { %13101 = vst [vmem:[#allocation20_spill] sm:$0xff] %v10533_v14  ;;  %9143 = vset.pattern.permute.xlu1 %v10144_v1  ;;  %2254 = vmatprep.subr.bf16.mxu0 %v9265_v22  ;;  %v550_v22 = vmul.f32 %v10389_v42, %v10519_v53  ;;  %p10076_p12 = pneg %p10075_p10 }
  0xe9   : > { %v946_v17 = vadd.f32 %v818_v10, %v539_v8  ;;  %v945_v18 = vadd.f32 %v817_v9, %v538_v7  ;;  %753 = vperm.xlu1 %9143, %v324_v54   ;;  %v9290_v54 = vld [vmem:[#allocation3 + $0x288] ss:$16 sps:$4 sm:$0xff]   ;;  %v547_v7 = vmul.f32 %v10396_v44, %v10502_v19  ;;  %v9271_v8 = vld [vmem:[#allocation3 + $0x304] ss:$16 sps:$4 sm:$0xff]  }
  0xea   : > { %2637 = vmatpush1.bf16.msra.mxu1 %v9290_v54  ;;  %p10083_p7 = pnand %p10082_p4, %p10076_p12 }
  0xeb   : > { %v10538_v23 = vpop.permute.xlu1 %371  ;;  %v1096_v24 = vadd.f32 %v10439_v0, %v946_v17  ;;  %v1095_v25 = vadd.f32 %v10432_v60, %v945_v18  ;;  %v10542_v28 = vpop.permute.xlu0 %697  ;;  %2255 = vmatpush1.bf16.msra.mxu0 %v9263_v32  ;;  %2638 = vmatprep.subr.bf16.mxu1 %v9295_v63  ;;  %v829_v32 = vmul.f32 %v10383_v40, %v10533_v14 }
  0xec   : > { %13102 = vst [vmem:[#allocation21_spill] sm:$0xff] %v10538_v23  ;;  %13103 = vst [vmem:[#allocation22_spill] sm:$0xff] %v10542_v28  ;;  %v542_v4 = vmul.f32 %v10389_v42, %v10538_v23  ;;  %v543_v6 = vmul.f32 %v10396_v44, %v10538_v23  ;;  %2256 = vmatprep.subr.bf16.mxu0 %v9268_v47  ;;  %v830_v47 = vmul.f32 %v10400_v45, %v10533_v14  ;;  %v9307_v14 = vld [vmem:[#allocation3 + $0x384] ss:$16 sps:$4 sm:$0xff]  }
  0xed   : > { %v1208_v30 = vpack.c.bf16 %v1096_v24, %v1092_v16  ;;  %v1207_v31 = vpack.c.bf16 %v1095_v25, %v1091_v20  ;;  %757 = vperm.xlu1 %9143, %v10347_v29   ;;  %v546_v29 = vmul.f32 %v10389_v42, %v10502_v19 }
  0xee   : > { %2639 = vmatpush1.bf16.msra.mxu1 %v9293_v15 }
  0xef   : > { %2111 = vmatprep.mubr.bf16.mxu0 %v1208_v30  ;;  %2497 = vmatprep.mubr.bf16.mxu1 %v1208_v30  ;;  %v9280_v30 = vld [vmem:[#allocation3 + $0x324] ss:$16 sps:$4 sm:$0xff]  }
  0xf0   : > { %v10545_v51 = vpop.permute.xlu1 %673  ;;  %2112 = vmatmul.mubr.bf16.gmra.mrb[12].mxu0 %v1207_v31  ;;  %v10547_v52 = vpop.permute.xlu0 %396  ;;  %2498 = vmatmul.mubr.bf16.gmra.mrb[12].mxu1 %v1207_v31  ;;  %v551_v31 = vmul.f32 %v10396_v44, %v10519_v53 }
  0xf1   : > { %13104 = vst [vmem:[#allocation23_spill] sm:$0xff] %v10545_v51  ;;  %13105 = vst [vmem:[#allocation24_spill] sm:$0xff] %v10547_v52  ;;  %v821_v55 = vmul.f32 %v10383_v40, %v10545_v51  ;;  %v822_v59 = vmul.f32 %v10400_v45, %v10545_v51  ;;  %9144 = vset.pattern.permute.xlu1 %v13017_v2  ;;  %2257 = vmatpush1.bf16.msra.mxu0 %v9266_v3  ;;  %v9320_v51 = vld [vmem:[#allocation3 + $0x368] ss:$16 sps:$4 sm:$0xff]  }
  0xf2   : > { %486 = vperm.xlu1 %9144, %v327_v62   ;;  %2258 = vmatprep.subr.bf16.mxu0 %v9271_v8  ;;  %v9278_v8 = vld [vmem:[#allocation3 + $0x320] ss:$16 sps:$4 sm:$0xff]  }
  0xf3   : > { %v950_v18 = vadd.f32 %v822_v59, %v543_v6  ;;  %v949_v20 = vadd.f32 %v821_v55, %v542_v4  ;;  %v9301_v55 = vld [vmem:[#allocation3 + $0x2cc] ss:$16 sps:$4 sm:$0xff]   ;;  %v10589_v4 = vsub.s32 2, %v10362_v34 }
  0xf4   : > { %v10563_v9 = vpop.permute.xlu1 %677  ;;  %v10565_v10 = vpop.permute.xlu0 %401  ;;  %2640 = vmatprep.subr.bf16.mxu1 %v9301_v55 }
  0xf5   : > { %13106 = vst [vmem:[#allocation25_spill] sm:$0xff] %v10563_v9  ;;  %13107 = vst [vmem:[#allocation26_spill] sm:$0xff] %v10565_v10  ;;  %v825_v16 = vmul.f32 %v10383_v40, %v10563_v9  ;;  %v826_v17 = vmul.f32 %v10400_v45, %v10563_v9  ;;  %v1100_v63 = vadd.f32 %v10439_v0, %v950_v18  ;;  %2259 = vmatpush1.bf16.msra.mxu0 %v9269_v21 }
  0xf6   : > { %9146 = vset.pattern.permute.xlu1 %v10144_v1  ;;  %13109 = vst [vmem:[#allocation28_spill] sm:$0xff] %v10589_v4  ;;  %2260 = vmatprep.subr.bf16.mxu0 %v9280_v30  ;;  %v958_v18 = vadd.f32 %v830_v47, %v551_v31  ;;  %v10598_v21 = vrot.slane %v10373_v37, %v10589_v4  ;;  %v9287_v31 = vld [vmem:[#allocation3 + $0x340] ss:$16 sps:$4 sm:$0xff]  }
  0xf7   : > { %v954_v24 = vadd.f32 %v826_v17, %v547_v7  ;;  %v953_v25 = vadd.f32 %v825_v16, %v546_v29  ;;  %765 = vperm.xlu1 %9146, %v327_v62   ;;  %v1099_v29 = vadd.f32 %v10432_v60, %v949_v20  ;;  %v10592_v62 = vsub.s32 3, %v10362_v34  ;;  %v9289_v16 = vld [vmem:[#allocation3 + $0x344] ss:$16 sps:$4 sm:$0xff]   ;;  %v9299_v17 = vld [vmem:[#allocation3 + $0x2c8] ss:$16 sps:$4 sm:$0xff]  }
  0xf8   : > { %v10580_v54 = vpop.permute.xlu0 %416  ;;  %v957_v20 = vadd.f32 %v829_v32, %v550_v22  ;;  %v10616_v47 = vrot.slane %v10378_v38, %v10589_v4  ;;  %2641 = vmatpush1.bf16.msra.mxu1 %v9299_v17 }
  0xf9   : > { %v10582_v59 = vpop.permute.xlu1 %386  ;;  %v1104_v1 = vadd.f32 %v10439_v0, %v954_v24  ;;  %v1103_v3 = vadd.f32 %v10432_v60, %v953_v25  ;;  %13110 = vst [vmem:[#allocation29_spill] sm:$0xff] %v10592_v62  ;;  %v9304_v24 = vld [vmem:[#allocation3 + $0x2ec] ss:$16 sps:$4 sm:$0xff]   ;;  %2261 = vmatpush1.bf16.msra.mxu0 %v9278_v8  ;;  %v10612_v32 = vrot.slane %v10373_v37, %v10592_v62  ;;  %v9302_v37 = vld [vmem:[#allocation3 + $0x2e8] ss:$16 sps:$4 sm:$0xff]  }
  0xfa   : > { %13108 = vst [vmem:[#allocation27_spill] sm:$0xff] %v10582_v59  ;;  %v554_v30 = vmul.f32 %v10389_v42, %v10582_v59  ;;  %2262 = vmatprep.subr.bf16.mxu0 %v9289_v16  ;;  %v1107_v8 = vadd.f32 %v10432_v60, %v957_v20  ;;  %2642 = vmatprep.subr.bf16.mxu1 %v9304_v24 }
  0xfb   : > { %v1212_v6 = vpack.c.bf16 %v1104_v1, %v1100_v63  ;;  %v1211_v7 = vpack.c.bf16 %v1103_v3, %v1099_v29  ;;  %v555_v63 = vmul.f32 %v10396_v44, %v10582_v59  ;;  %v10620_v1 = vrot.slane %v10378_v38, %v10592_v62  ;;  %v9298_v29 = vld [vmem:[#allocation3 + $0x364] ss:$16 sps:$4 sm:$0xff]  }
  0xfc   : > { %v10594_v15 = vpop.permute.xlu0 %421  ;;  %2643 = vmatpush1.bf16.msra.mxu1 %v9302_v37 }
  0xfd   : > { %2121 = vmatprep.mubr.bf16.mxu0 %v1212_v6  ;;  %2507 = vmatprep.mubr.bf16.mxu1 %v1212_v6  ;;  %v1108_v6 = vadd.f32 %v10439_v0, %v958_v18  ;;  %v584_v2 = vmul.f32 %v10616_v47, %v10594_v15  ;;  %v585_v38 = vmul.f32 %v10620_v1, %v10594_v15  ;;  %v9310_v18 = vld [vmem:[#allocation3 + $0x30c] ss:$16 sps:$4 sm:$0xff]  }
  0xfe   : > { %v10600_v25 = vpop.permute.xlu1 %685  ;;  %2122 = vmatmul.mubr.bf16.gmra.mrb[16].mxu0 %v1211_v7  ;;  %2508 = vmatmul.mubr.bf16.gmra.mrb[16].mxu1 %v1211_v7 }
  0xff   : > { %13111 = vst [vmem:[#allocation30_spill] sm:$0xff] %v10600_v25  ;;  %v833_v55 = vmul.f32 %v10383_v40, %v10600_v25  ;;  %v834_v22 = vmul.f32 %v10400_v45, %v10600_v25  ;;  %2263 = vmatpush1.bf16.msra.mxu0 %v9287_v31  ;;  %2644 = vmatprep.subr.bf16.mxu1 %v9310_v18 }
 0x100   : > { %2264 = vmatprep.subr.bf16.mxu0 %v9298_v29 }
 0x101   : > { %v962_v3 = vadd.f32 %v834_v22, %v555_v63  ;;  %v961_v7 = vadd.f32 %v833_v55, %v554_v30  ;;  %v10624_v33 = vpop.permute.xlu0 %713  ;;  %v13112_v30 = vmov 0  }
 0x102   : > { %v863_v16 = vmul.f32 %v10598_v21, %v10624_v33  ;;  %v864_v17 = vmul.f32 %v10612_v32, %v10624_v33  ;;  %9147 = vset.pattern.permute.xlu1 %v13112_v30  ;;  %v9308_v30 = vld [vmem:[#allocation3 + $0x308] ss:$16 sps:$4 sm:$0xff]  }
 0x103   : > { %v10635_v20 = vpop.permute.xlu1 %391  ;;  %v1112_v63 = vadd.f32 %v10439_v0, %v962_v3  ;;  %v1111_v24 = vadd.f32 %v10432_v60, %v961_v7  ;;  %v9313_v3 = vld [vmem:[#allocation3 + $0x32c] ss:$16 sps:$4 sm:$0xff]   ;;  %2265 = vmatpush1.bf16.msra.mxu0 %v9296_v36  ;;  %2645 = vmatpush1.bf16.msra.mxu1 %v9308_v30  ;;  %v9311_v7 = vld [vmem:[#allocation3 + $0x328] ss:$16 sps:$4 sm:$0xff]   ;;  %v845_v30 = vmul.f32 %v10383_v40, %v10542_v28 }
 0x104   : > { %13113 = vst [vmem:[#allocation31_spill] sm:$0xff] %v10635_v20  ;;  %v10641_v35 = vadd.f32 %v863_v16, %v584_v2  ;;  %v10643_v59 = vadd.f32 %v864_v17, %v585_v38  ;;  %v9305_v2 = vld [vmem:[#allocation3 + $0x380] ss:$16 sps:$4 sm:$0xff]   ;;  %2266 = vmatprep.subr.bf16.mxu0 %v9307_v14  ;;  %v558_v37 = vmul.f32 %v10389_v42, %v10635_v20  ;;  %v9319_v36 = vld [vmem:[#allocation3 + $0x34c] ss:$16 sps:$4 sm:$0xff]  }
 0x105   : > { %v1216_v55 = vpack.c.bf16 %v1112_v63, %v1108_v6  ;;  %v1215_v22 = vpack.c.bf16 %v1111_v24, %v1107_v8  ;;  %v10639_v34 = vpop.permute.xlu0 %729  ;;  %v9316_v8 = vld [vmem:[#allocation3 + $0x3a4] ss:$16 sps:$4 sm:$0xff]   ;;  %v559_v38 = vmul.f32 %v10396_v44, %v10635_v20  ;;  %v562_v16 = vmul.f32 %v10389_v42, %v10547_v52  ;;  %2646 = vmatprep.subr.bf16.mxu1 %v9313_v3 }
 0x106   : > { %v563_v17 = vmul.f32 %v10396_v44, %v10547_v52  ;;  %v846_v20 = vmul.f32 %v10400_v45, %v10542_v28 }
 0x107   : > { %2131 = vmatprep.mubr.bf16.mxu0 %v1216_v55  ;;  %2517 = vmatprep.mubr.bf16.mxu1 %v1216_v55 }
 0x108   : > { %v10645_v25 = vpop.permute.xlu1 %689  ;;  %2132 = vmatmul.mubr.bf16.gmra.mrb[20].mxu0 %v1215_v22  ;;  %2518 = vmatmul.mubr.bf16.gmra.mrb[20].mxu1 %v1215_v22  ;;  %v9314_v22 = vld [vmem:[#allocation3 + $0x3a0] ss:$16 sps:$4 sm:$0xff]  }
 0x109   : > { %13114 = vst [vmem:[#allocation32_spill] sm:$0xff] %v10645_v25  ;;  %v837_v31 = vmul.f32 %v10383_v40, %v10645_v25  ;;  %v838_v29 = vmul.f32 %v10400_v45, %v10645_v25  ;;  %2267 = vmatpush1.bf16.msra.mxu0 %v9305_v2  ;;  %2647 = vmatpush1.bf16.msra.mxu1 %v9311_v7  ;;  %v9317_v25 = vld [vmem:[#allocation3 + $0x348] ss:$16 sps:$4 sm:$0xff]  }
 0x10a   : > { %v10651_v6 = vpop.permute.xlu0 %436  ;;  %2268 = vmatprep.subr.bf16.mxu0 %v9316_v8  ;;  %2648 = vmatprep.subr.bf16.mxu1 %v9319_v36  ;;  %v879_v2 = vmul.f32 %v10598_v21, %v10639_v34 }
 0x10b   : > { %v966_v24 = vadd.f32 %v838_v29, %v559_v38  ;;  %v965_v55 = vadd.f32 %v837_v31, %v558_v37  ;;  %v567_v31 = vmul.f32 %v10396_v44, %v10565_v10  ;;  %v9322_v29 = vld [vmem:[#allocation3 + $0x36c] ss:$16 sps:$4 sm:$0xff]   ;;  %v880_v37 = vmul.f32 %v10612_v32, %v10639_v34  ;;  %v9325_v38 = vld [vmem:[#allocation3 + $0x3c4] ss:$16 sps:$4 sm:$0xff]  }
 0x10c   : > { %v10661_v18 = vpop.permute.xlu1 %693 }
 0x10d   : > { %13115 = vst [vmem:[#allocation33_spill] sm:$0xff] %v10661_v18  ;;  %v841_v14 = vmul.f32 %v10383_v40, %v10661_v18  ;;  %v842_v63 = vmul.f32 %v10400_v45, %v10661_v18  ;;  %v566_v18 = vmul.f32 %v10389_v42, %v10565_v10  ;;  %2269 = vmatpush1.bf16.msra.mxu0 %v9314_v22 }
 0x10e   : > { %v10671_v3 = vpop.permute.xlu0 %441  ;;  %2649 = vmatpush1.bf16.msra.mxu1 %v9317_v25  ;;  %v974_v9 = vadd.f32 %v846_v20, %v567_v31  ;;  %2270 = vmatprep.subr.bf16.mxu0 %v9325_v38 }
 0x10f   : > { %v969_v52 = vadd.f32 %v841_v14, %v562_v16  ;;  %v970_v53 = vadd.f32 %v842_v63, %v563_v17  ;;  %v600_v7 = vmul.f32 %v10616_v47, %v10671_v3  ;;  %v601_v8 = vmul.f32 %v10620_v1, %v10671_v3  ;;  %2650 = vmatprep.subr.bf16.mxu1 %v9322_v29 }
 0x110   : > { %v1116_v17 = vadd.f32 %v10439_v0, %v966_v24  ;;  %v1115_v14 = vadd.f32 %v10432_v60, %v965_v55  ;;  %v9323_v24 = vld [vmem:[#allocation3 + $0x3c0] ss:$16 sps:$4 sm:$0xff]   ;;  %v9328_v55 = vld [vmem:[#allocation3 + $0x38c] ss:$16 sps:$4 sm:$0xff]  }
 0x111   : > { %v10685_v16 = vpop.permute.xlu1 %406  ;;  %v1120_v36 = vadd.f32 %v10439_v0, %v970_v53  ;;  %v1119_v63 = vadd.f32 %v10432_v60, %v969_v52  ;;  %v10693_v19 = vadd.f32 %v879_v2, %v600_v7  ;;  %v10695_v39 = vadd.f32 %v880_v37, %v601_v8  ;;  %v9334_v52 = vld [vmem:[#allocation3 + $0x3e4] ss:$16 sps:$4 sm:$0xff]   ;;  %2271 = vmatpush1.bf16.msra.mxu0 %v9323_v24  ;;  %v9332_v8 = vld [vmem:[#allocation3 + $0x3e0] ss:$16 sps:$4 sm:$0xff]  }
 0x112   : > { %13116 = vst [vmem:[#allocation34_spill] sm:$0xff] %v10685_v16  ;;  %v10691_v23 = vpop.permute.xlu0 %456  ;;  %v973_v53 = vadd.f32 %v845_v30, %v566_v18  ;;  %v570_v25 = vmul.f32 %v10389_v42, %v10685_v16  ;;  %v571_v20 = vmul.f32 %v10396_v44, %v10685_v16  ;;  %2651 = vmatpush1.bf16.msra.mxu1 %v9320_v51  ;;  %v9326_v18 = vld [vmem:[#allocation3 + $0x388] ss:$16 sps:$4 sm:$0xff]  }
 0x113   : > { %v1220_v10 = vpack.c.bf16 %v1120_v36, %v1116_v17  ;;  %v1219_v28 = vpack.c.bf16 %v1119_v63, %v1115_v14  ;;  %v1124_v30 = vadd.f32 %v10439_v0, %v974_v9  ;;  %2652 = vmatprep.subr.bf16.mxu1 %v9328_v55  ;;  %2272 = vmatprep.subr.bf16.mxu0 %v9334_v52 }
 0x114   : > { %v1123_v7 = vadd.f32 %v10432_v60, %v973_v53  ;;  %v9329_v53 = vld [vmem:[#allocation3 + $0x3a8] ss:$16 sps:$4 sm:$0xff]  }
 0x115   : > { %2141 = vmatprep.mubr.bf16.mxu0 %v1220_v10  ;;  %2527 = vmatprep.mubr.bf16.mxu1 %v1220_v10 }
 0x116   : > { %v10697_v22 = vpop.permute.xlu1 %701  ;;  %2142 = vmatmul.mubr.bf16.gmra.mrb[24].mxu0 %v1219_v28  ;;  %2528 = vmatmul.mubr.bf16.gmra.mrb[24].mxu1 %v1219_v28  ;;  %v9331_v28 = vld [vmem:[#allocation3 + $0x3ac] ss:$16 sps:$4 sm:$0xff]  }
 0x117   : > { %13117 = vst [vmem:[#allocation35_spill] sm:$0xff] %v10697_v22  ;;  %v849_v31 = vmul.f32 %v10383_v40, %v10697_v22  ;;  %v850_v29 = vmul.f32 %v10400_v45, %v10697_v22  ;;  %v10707_v10 = vpop.permute.xlu0 %745  ;;  %2653 = vmatpush1.bf16.msra.mxu1 %v9326_v18  ;;  %2273 = vmatpush1.bf16.msra.mxu0 %v9332_v8 }
 0x118   : > { %v895_v51 = vmul.f32 %v10598_v21, %v10707_v10  ;;  %v896_v9 = vmul.f32 %v10612_v32, %v10707_v10  ;;  %2654 = vmatprep.subr.bf16.mxu1 %v9331_v28  ;;  %v10729_v18 = vrot.slane %v10413_v50, %v10589_v4 }
 0x119   : > { %v978_v2 = vadd.f32 %v850_v29, %v571_v20  ;;  %v977_v37 = vadd.f32 %v849_v31, %v570_v25  ;;  %v9337_v25 = vld [vmem:[#allocation3 + $0x3cc] ss:$16 sps:$4 sm:$0xff]  }
 0x11b   : > { %v412_v38 = vpop.permute.xlu1 %411  ;;  %v1128_v17 = vadd.f32 %v10439_v0, %v978_v2  ;;  %v1127_v36 = vadd.f32 %v10432_v60, %v977_v37  ;;  %2655 = vmatpush1.bf16.msra.mxu1 %v9329_v53  ;;  %v9335_v2 = vld [vmem:[#allocation3 + $0x3c8] ss:$16 sps:$4 sm:$0xff]   ;;  %v10735_v37 = vrot.slane %v10413_v50, %v10592_v62  ;;  %v580_v50 = vmul.f32 %v10616_v47, %v10580_v54 }
 0x11c   : > { %v10717_v24 = vpop.permute.xlu0 %461  ;;  %v575_v8 = vmul.f32 %v10396_v44, %v412_v38  ;;  %2656 = vmatprep.subr.bf16.mxu1 %v9337_v25  ;;  %v576_v53 = vmul.f32 %v10616_v47, %v412_v38 }
 0x11d   : > { %v1224_v14 = vpack.c.bf16 %v1128_v17, %v1124_v30  ;;  %v1223_v63 = vpack.c.bf16 %v1127_v36, %v1123_v7  ;;  %v616_v55 = vmul.f32 %v10616_v47, %v10717_v24  ;;  %v617_v52 = vmul.f32 %v10620_v1, %v10717_v24 }
 0x11e   : > { %v574_v7 = vmul.f32 %v10389_v42, %v412_v38 }
 0x11f   : > { %2151 = vmatprep.mubr.bf16.mxu0 %v1224_v14  ;;  %2537 = vmatprep.mubr.bf16.mxu1 %v1224_v14  ;;  %v10723_v31 = vadd.f32 %v895_v51, %v616_v55  ;;  %v10725_v29 = vadd.f32 %v896_v9, %v617_v52  ;;  %v9340_v51 = vld [vmem:[#allocation3 + $0x3ec] ss:$16 sps:$4 sm:$0xff]   ;;  %v578_v9 = vmul.f32 %v10389_v42, %v10580_v54 }
 0x120   : > { %v706_v20 = vpop.permute.xlu1 %705  ;;  %2152 = vmatmul.mubr.bf16.gmra.mrb[28].mxu0 %v1223_v63  ;;  %2538 = vmatmul.mubr.bf16.gmra.mrb[28].mxu1 %v1223_v63  ;;  %v579_v14 = vmul.f32 %v10396_v44, %v10580_v54  ;;  %v581_v63 = vmul.f32 %v10620_v1, %v10580_v54  ;;  %v577_v55 = vmul.f32 %v10620_v1, %v412_v38 }
 0x121   : > { %v853_v30 = vmul.f32 %v10383_v40, %v706_v20  ;;  %v854_v28 = vmul.f32 %v10400_v45, %v706_v20  ;;  %v855_v17 = vmul.f32 %v10598_v21, %v706_v20  ;;  %v856_v36 = vmul.f32 %v10612_v32, %v706_v20  ;;  %2657 = vmatpush1.bf16.msra.mxu1 %v9335_v2 }
 0x122   : > { %v582_v54 = vmul.f32 %v10389_v42, %v10594_v15  ;;  %v583_v38 = vmul.f32 %v10396_v44, %v10594_v15  ;;  %2658 = vmatprep.subr.bf16.mxu1 %v9340_v51  ;;  %v861_v2 = vmul.f32 %v10383_v40, %v10624_v33 }
 0x123   : > { %v981_v52 = vadd.f32 %v853_v30, %v574_v7  ;;  %v982_v20 = vadd.f32 %v854_v28, %v575_v8  ;;  %v983_v5 = vadd.f32 %v855_v17, %v576_v53  ;;  %v984_v27 = vadd.f32 %v856_v36, %v577_v55 }
 0x124   : > { %v710_v25 = vpop.permute.xlu1 %709  ;;  %v862_v17 = vmul.f32 %v10400_v45, %v10624_v33 }
 0x125   : > { %v857_v62 = vmul.f32 %v10383_v40, %v710_v25  ;;  %v858_v4 = vmul.f32 %v10400_v45, %v710_v25  ;;  %v859_v16 = vmul.f32 %v10598_v21, %v710_v25  ;;  %v860_v22 = vmul.f32 %v10612_v32, %v710_v25  ;;  %2659 = vmatpush1.bf16.msra.mxu1 %v9338_v26 }
 0x126   : > { %v1132_v46 = vadd.f32 %v10439_v0, %v982_v20  ;;  %v1131_v57 = vadd.f32 %v10432_v60, %v981_v52 }
 0x127   : > { %v985_v30 = vadd.f32 %v857_v62, %v578_v9  ;;  %v986_v28 = vadd.f32 %v858_v4, %v579_v14  ;;  %v987_v7 = vadd.f32 %v859_v16, %v580_v50  ;;  %v988_v8 = vadd.f32 %v860_v22, %v581_v63 }
 0x128   : > { %v1134_v16 = vadd.f32 %v10735_v37, %v984_v27  ;;  %v1133_v22 = vadd.f32 %v10729_v18, %v983_v5  ;;  %v989_v14 = vadd.f32 %v861_v2, %v582_v54  ;;  %v990_v50 = vadd.f32 %v862_v17, %v583_v38 }
 0x129   : > { %v427_v36 = vpop.permute.xlu1 %426  ;;  %v1136_v53 = vadd.f32 %v10439_v0, %v986_v28  ;;  %v1135_v15 = vadd.f32 %v10432_v60, %v985_v30  ;;  %v1138_v4 = vadd.f32 %v10735_v37, %v988_v8  ;;  %v1137_v62 = vadd.f32 %v10729_v18, %v987_v7 }
 0x12a   : > { %v586_v55 = vmul.f32 %v10389_v42, %v427_v36  ;;  %v587_v26 = vmul.f32 %v10396_v44, %v427_v36  ;;  %v588_v52 = vmul.f32 %v10616_v47, %v427_v36  ;;  %v589_v27 = vmul.f32 %v10620_v1, %v427_v36 }
 0x12b   : > { %v1228_v51 = vpack.c.bf16 %v1136_v53, %v1132_v46  ;;  %v1227_v9 = vpack.c.bf16 %v1135_v15, %v1131_v57  ;;  %v10771_v63 = vpack.c.bf16 %v1138_v4, %v1134_v16  ;;  %v10773_v33 = vpack.c.bf16 %v1137_v62, %v1133_v22 }
 0x12c   : > { %v1140_v54 = vadd.f32 %v10439_v0, %v990_v50  ;;  %v1139_v38 = vadd.f32 %v10432_v60, %v989_v14  ;;  %v1142_v30 = vadd.f32 %v10735_v37, %v10643_v59  ;;  %v1141_v28 = vadd.f32 %v10729_v18, %v10641_v35 }
 0x12d   : > { %2161 = vmatprep.mubr.bf16.mxu0 %v1228_v51  ;;  %2547 = vmatprep.mubr.bf16.mxu1 %v1228_v51 }
 0x12e   : > { %v718_v20 = vpop.permute.xlu1 %717  ;;  %2162 = vmatmul.mubr.bf16.gmra.mrb[32].mxu0 %v1227_v9  ;;  %2548 = vmatmul.mubr.bf16.gmra.mrb[32].mxu1 %v1227_v9 }
 0x12f   : > { %v865_v46 = vmul.f32 %v10383_v40, %v718_v20  ;;  %v866_v57 = vmul.f32 %v10400_v45, %v718_v20  ;;  %v867_v5 = vmul.f32 %v10598_v21, %v718_v20  ;;  %v868_v25 = vmul.f32 %v10612_v32, %v718_v20 }
 0x131   : > { %v993_v7 = vadd.f32 %v865_v46, %v586_v55  ;;  %v994_v8 = vadd.f32 %v866_v57, %v587_v26  ;;  %v995_v2 = vadd.f32 %v867_v5, %v588_v52  ;;  %v996_v17 = vadd.f32 %v868_v25, %v589_v27 }
 0x132   : > { %v594_v46 = vmul.f32 %v10389_v42, %v10651_v6  ;;  %v595_v57 = vmul.f32 %v10396_v44, %v10651_v6 }
 0x133   : > { %v432_v36 = vpop.permute.xlu1 %431  ;;  %v1144_v53 = vadd.f32 %v10439_v0, %v994_v8  ;;  %v1143_v15 = vadd.f32 %v10432_v60, %v993_v7  ;;  %v1146_v4 = vadd.f32 %v10735_v37, %v996_v17  ;;  %v1145_v62 = vadd.f32 %v10729_v18, %v995_v2 }
 0x134   : > { %v592_v35 = vmul.f32 %v10616_v47, %v432_v36  ;;  %v593_v9 = vmul.f32 %v10620_v1, %v432_v36  ;;  %v590_v27 = vmul.f32 %v10389_v42, %v432_v36  ;;  %v591_v20 = vmul.f32 %v10396_v44, %v432_v36 }
 0x135   : > { %v1232_v16 = vpack.c.bf16 %v1144_v53, %v1140_v54  ;;  %v1231_v22 = vpack.c.bf16 %v1143_v15, %v1139_v38  ;;  %v10793_v51 = vpack.c.bf16 %v1146_v4, %v1142_v30  ;;  %v10795_v59 = vpack.c.bf16 %v1145_v62, %v1141_v28 }
 0x136   : > { %v596_v54 = vmul.f32 %v10616_v47, %v10651_v6  ;;  %v597_v38 = vmul.f32 %v10620_v1, %v10651_v6  ;;  %v877_v53 = vmul.f32 %v10383_v40, %v10639_v34  ;;  %v878_v15 = vmul.f32 %v10400_v45, %v10639_v34 }
 0x137   : > { %2171 = vmatprep.mubr.bf16.mxu0 %v1232_v16  ;;  %2557 = vmatprep.mubr.bf16.mxu1 %v1232_v16  ;;  %v598_v6 = vmul.f32 %v10389_v42, %v10671_v3  ;;  %v599_v4 = vmul.f32 %v10396_v44, %v10671_v3 }
 0x138   : > { %v722_v14 = vpop.permute.xlu1 %721  ;;  %2172 = vmatmul.mubr.bf16.gmra.mrb[36].mxu0 %v1231_v22  ;;  %2558 = vmatmul.mubr.bf16.gmra.mrb[36].mxu1 %v1231_v22 }
 0x139   : > { %v869_v50 = vmul.f32 %v10383_v40, %v722_v14  ;;  %v870_v55 = vmul.f32 %v10400_v45, %v722_v14  ;;  %v871_v26 = vmul.f32 %v10598_v21, %v722_v14  ;;  %v872_v52 = vmul.f32 %v10612_v32, %v722_v14 }
 0x13b   : > { %v999_v5 = vadd.f32 %v871_v26, %v592_v35  ;;  %v1000_v25 = vadd.f32 %v872_v52, %v593_v9  ;;  %v997_v30 = vadd.f32 %v869_v50, %v590_v27  ;;  %v998_v28 = vadd.f32 %v870_v55, %v591_v20 }
 0x13c   : > { %v726_v7 = vpop.permute.xlu1 %725 }
 0x13d   : > { %v873_v8 = vmul.f32 %v10383_v40, %v726_v7  ;;  %v874_v2 = vmul.f32 %v10400_v45, %v726_v7  ;;  %v875_v17 = vmul.f32 %v10598_v21, %v726_v7  ;;  %v876_v36 = vmul.f32 %v10612_v32, %v726_v7 }
 0x13e   : > { %v1148_v9 = vadd.f32 %v10439_v0, %v998_v28  ;;  %v1147_v14 = vadd.f32 %v10432_v60, %v997_v30  ;;  %v1150_v50 = vadd.f32 %v10735_v37, %v1000_v25  ;;  %v1149_v55 = vadd.f32 %v10729_v18, %v999_v5 }
 0x13f   : > { %v1001_v62 = vadd.f32 %v873_v8, %v594_v46  ;;  %v1002_v16 = vadd.f32 %v874_v2, %v595_v57  ;;  %v1003_v22 = vadd.f32 %v875_v17, %v596_v54  ;;  %v1004_v35 = vadd.f32 %v876_v36, %v597_v38 }
 0x140   : > { %v1005_v38 = vadd.f32 %v877_v53, %v598_v6  ;;  %v1006_v30 = vadd.f32 %v878_v15, %v599_v4  ;;  %v1158_v4 = vadd.f32 %v10735_v37, %v10695_v39 }
 0x141   : > { %v447_v26 = vpop.permute.xlu1 %446  ;;  %v1152_v34 = vadd.f32 %v10439_v0, %v1002_v16  ;;  %v1151_v52 = vadd.f32 %v10432_v60, %v1001_v62  ;;  %v1154_v27 = vadd.f32 %v10735_v37, %v1004_v35  ;;  %v1153_v3 = vadd.f32 %v10729_v18, %v1003_v22 }
 0x142   : > { %v602_v25 = vmul.f32 %v10389_v42, %v447_v26  ;;  %v603_v5 = vmul.f32 %v10396_v44, %v447_v26  ;;  %v604_v28 = vmul.f32 %v10616_v47, %v447_v26  ;;  %v605_v7 = vmul.f32 %v10620_v1, %v447_v26 }
 0x143   : > { %v1236_v20 = vpack.c.bf16 %v1152_v34, %v1148_v9  ;;  %v1235_v46 = vpack.c.bf16 %v1151_v52, %v1147_v14  ;;  %v10833_v57 = vpack.c.bf16 %v1154_v27, %v1150_v50  ;;  %v10835_v54 = vpack.c.bf16 %v1153_v3, %v1149_v55 }
 0x144   : > { %v1156_v15 = vadd.f32 %v10439_v0, %v1006_v30  ;;  %v1155_v6 = vadd.f32 %v10432_v60, %v1005_v38  ;;  %v1157_v62 = vadd.f32 %v10729_v18, %v10693_v19 }
 0x145   : > { %13118 = vst [vmem:[#allocation36_spill] sm:$0xff] %v10835_v54  ;;  %2181 = vmatprep.mubr.bf16.mxu0 %v1236_v20  ;;  %2567 = vmatprep.mubr.bf16.mxu1 %v1236_v20 }
 0x146   : > { %v734_v8 = vpop.permute.xlu1 %733  ;;  %2182 = vmatmul.mubr.bf16.gmra.mrb[40].mxu0 %v1235_v46  ;;  %2568 = vmatmul.mubr.bf16.gmra.mrb[40].mxu1 %v1235_v46 }
 0x147   : > { %v881_v2 = vmul.f32 %v10383_v40, %v734_v8  ;;  %v882_v17 = vmul.f32 %v10400_v45, %v734_v8  ;;  %v883_v36 = vmul.f32 %v10598_v21, %v734_v8  ;;  %v884_v53 = vmul.f32 %v10612_v32, %v734_v8 }
 0x148   : > { %v610_v8 = vmul.f32 %v10389_v42, %v10691_v23 }
 0x149   : > { %v1009_v16 = vadd.f32 %v881_v2, %v602_v25  ;;  %v1010_v22 = vadd.f32 %v882_v17, %v603_v5  ;;  %v1011_v35 = vadd.f32 %v883_v36, %v604_v28  ;;  %v1012_v9 = vadd.f32 %v884_v53, %v605_v7 }
 0x14a   : > { %v611_v2 = vmul.f32 %v10396_v44, %v10691_v23  ;;  %v612_v53 = vmul.f32 %v10616_v47, %v10691_v23 }
 0x14b   : > { %v1160_v14 = vadd.f32 %v10439_v0, %v1010_v22  ;;  %v1159_v50 = vadd.f32 %v10432_v60, %v1009_v16  ;;  %v1162_v55 = vadd.f32 %v10735_v37, %v1012_v9  ;;  %v1161_v26 = vadd.f32 %v10729_v18, %v1011_v35  ;;  %v452_v34 = vpop.permute.xlu1 %451 }
 0x14c   : > { %v608_v19 = vmul.f32 %v10616_v47, %v452_v34  ;;  %v609_v20 = vmul.f32 %v10620_v1, %v452_v34  ;;  %v606_v28 = vmul.f32 %v10389_v42, %v452_v34  ;;  %v607_v7 = vmul.f32 %v10396_v44, %v452_v34 }
 0x14d   : > { %v1240_v52 = vpack.c.bf16 %v1160_v14, %v1156_v15  ;;  %v1239_v27 = vpack.c.bf16 %v1159_v50, %v1155_v6  ;;  %v10855_v3 = vpack.c.bf16 %v1162_v55, %v1158_v4  ;;  %v10857_v39 = vpack.c.bf16 %v1161_v26, %v1157_v62 }
 0x14e   : > { %v613_v15 = vmul.f32 %v10620_v1, %v10691_v23  ;;  %v893_v14 = vmul.f32 %v10383_v40, %v10707_v10  ;;  %v894_v50 = vmul.f32 %v10400_v45, %v10707_v10  ;;  %v614_v23 = vmul.f32 %v10389_v42, %v10717_v24 }
 0x14f   : > { %13119 = vst [vmem:[#allocation37_spill] sm:$0xff] %v10855_v3  ;;  %13120 = vst [vmem:[#allocation38_spill] sm:$0xff] %v10857_v39  ;;  %2191 = vmatprep.mubr.bf16.mxu0 %v1240_v52  ;;  %2577 = vmatprep.mubr.bf16.mxu1 %v1240_v52  ;;  %v615_v55 = vmul.f32 %v10396_v44, %v10717_v24 }
 0x150   : > { %2192 = vmatmul.mubr.bf16.gmra.mrb[44].mxu0 %v1239_v27  ;;  %2578 = vmatmul.mubr.bf16.gmra.mrb[44].mxu1 %v1239_v27  ;;  %v738_v46 = vpop.permute.xlu1 %737 }
 0x151   : > { %v885_v38 = vmul.f32 %v10383_v40, %v738_v46  ;;  %v886_v30 = vmul.f32 %v10400_v45, %v738_v46  ;;  %v887_v25 = vmul.f32 %v10598_v21, %v738_v46  ;;  %v888_v5 = vmul.f32 %v10612_v32, %v738_v46 }
 0x153   : > { %v1015_v17 = vadd.f32 %v887_v25, %v608_v19  ;;  %v1016_v36 = vadd.f32 %v888_v5, %v609_v20  ;;  %v1013_v6 = vadd.f32 %v885_v38, %v606_v28  ;;  %v1014_v4 = vadd.f32 %v886_v30, %v607_v7 }
 0x154   : > { %v742_v62 = vpop.permute.xlu1 %741 }
 0x155   : > { %v889_v16 = vmul.f32 %v10383_v40, %v742_v62  ;;  %v890_v22 = vmul.f32 %v10400_v45, %v742_v62  ;;  %v891_v35 = vmul.f32 %v10598_v21, %v742_v62  ;;  %v892_v9 = vmul.f32 %v10612_v32, %v742_v62 }
 0x156   : > { %v1164_v19 = vadd.f32 %v10439_v0, %v1014_v4  ;;  %v1163_v20 = vadd.f32 %v10432_v60, %v1013_v6  ;;  %v1166_v46 = vadd.f32 %v10735_v37, %v1016_v36  ;;  %v1165_v38 = vadd.f32 %v10729_v18, %v1015_v17 }
 0x157   : > { %v1017_v26 = vadd.f32 %v889_v16, %v610_v8  ;;  %v1018_v34 = vadd.f32 %v890_v22, %v611_v2  ;;  %v1019_v52 = vadd.f32 %v891_v35, %v612_v53  ;;  %v1020_v27 = vadd.f32 %v892_v9, %v613_v15 }
 0x158   : > { %v1021_v53 = vadd.f32 %v893_v14, %v614_v23  ;;  %v1022_v15 = vadd.f32 %v894_v50, %v615_v55  ;;  %v477_v14 = vpop.permute.xlu0 %476  ;;  %v1174_v55 = vadd.f32 %v10735_v37, %v10725_v29 }
 0x159   : > { %v467_v30 = vpop.permute.xlu1 %466  ;;  %v1168_v10 = vadd.f32 %v10439_v0, %v1018_v34  ;;  %v1167_v25 = vadd.f32 %v10432_v60, %v1017_v26  ;;  %v1170_v5 = vadd.f32 %v10735_v37, %v1020_v27  ;;  %v1169_v24 = vadd.f32 %v10729_v18, %v1019_v52 }
 0x15a   : > { %v618_v36 = vmul.f32 %v10389_v42, %v467_v30  ;;  %v619_v17 = vmul.f32 %v10396_v44, %v467_v30  ;;  %v620_v6 = vmul.f32 %v10616_v47, %v467_v30  ;;  %v621_v4 = vmul.f32 %v10620_v1, %v467_v30 }
 0x15b   : > { %v1244_v28 = vpack.c.bf16 %v1168_v10, %v1164_v19  ;;  %v1243_v7 = vpack.c.bf16 %v1167_v25, %v1163_v20  ;;  %v10895_v8 = vpack.c.bf16 %v1170_v5, %v1166_v46  ;;  %v10897_v2 = vpack.c.bf16 %v1169_v24, %v1165_v38 }
 0x15c   : > { %v1172_v50 = vadd.f32 %v10439_v0, %v1022_v15  ;;  %v1171_v23 = vadd.f32 %v10432_v60, %v1021_v53  ;;  %v1173_v26 = vadd.f32 %v10729_v18, %v10723_v31  ;;  %v482_v25 = vpop.permute.xlu0 %481  ;;  %v792_v31 = vmul.f32 %v10612_v32, %v10385_v41 }
 0x15d   : > { %13121 = vst [vmem:[#allocation39_spill] sm:$0xff] %v10895_v8  ;;  %13122 = vst [vmem:[#allocation40_spill] sm:$0xff] %v10897_v2  ;;  %2201 = vmatprep.mubr.bf16.mxu0 %v1244_v28  ;;  %2587 = vmatprep.mubr.bf16.mxu1 %v1244_v28  ;;  %v10927_v53 = vmul.f32 %v10612_v32, %v10406_v48  ;;  %v517_v15 = vmul.f32 %v10620_v1, %v10408_v49 }
 0x15e   : > { %v750_v62 = vpop.permute.xlu1 %749  ;;  %2202 = vmatmul.mubr.bf16.gmra.mrb[48].mxu0 %v1243_v7  ;;  %2588 = vmatmul.mubr.bf16.gmra.mrb[48].mxu1 %v1243_v7  ;;  %v513_v7 = vmul.f32 %v10620_v1, %v10391_v43 }
 0x15f   : > { %v897_v16 = vmul.f32 %v10383_v40, %v750_v62  ;;  %v898_v22 = vmul.f32 %v10400_v45, %v750_v62  ;;  %v899_v35 = vmul.f32 %v10598_v21, %v750_v62  ;;  %v900_v9 = vmul.f32 %v10612_v32, %v750_v62 }
 0x161   : > { %v1025_v34 = vadd.f32 %v897_v16, %v618_v36  ;;  %v1026_v52 = vadd.f32 %v898_v22, %v619_v17  ;;  %v1027_v27 = vadd.f32 %v899_v35, %v620_v6  ;;  %v1028_v19 = vadd.f32 %v900_v9, %v621_v4 }
 0x162   : > { %v626_v36 = vmul.f32 %v10389_v42, %v477_v14  ;;  %v627_v17 = vmul.f32 %v10396_v44, %v477_v14 }
 0x163   : > { %v472_v20 = vpop.permute.xlu1 %471  ;;  %v1176_v46 = vadd.f32 %v10439_v0, %v1026_v52  ;;  %v1175_v38 = vadd.f32 %v10432_v60, %v1025_v34  ;;  %v1178_v30 = vadd.f32 %v10735_v37, %v1028_v19  ;;  %v1177_v10 = vadd.f32 %v10729_v18, %v1027_v27  ;;  %v762_v19 = vpop.permute.xlu0 %761 }
 0x164   : > { %v624_v6 = vmul.f32 %v10616_v47, %v472_v20  ;;  %v625_v4 = vmul.f32 %v10620_v1, %v472_v20  ;;  %v623_v34 = vmul.f32 %v10396_v44, %v472_v20  ;;  %v630_v52 = vmul.f32 %v10389_v42, %v482_v25 }
 0x165   : > { %v1248_v5 = vpack.c.bf16 %v1176_v46, %v1172_v50  ;;  %v1247_v24 = vpack.c.bf16 %v1175_v38, %v1171_v23  ;;  %v10917_v29 = vpack.c.bf16 %v1178_v30, %v1174_v55  ;;  %v10919_v28 = vpack.c.bf16 %v1177_v10, %v1173_v26  ;;  %v9343_v50 = vld [vmem:[#allocation3 + $0x404] ss:$16 sps:$4 sm:$0xff]  }
 0x166   : > { %v628_v23 = vmul.f32 %v10616_v47, %v477_v14  ;;  %v629_v55 = vmul.f32 %v10620_v1, %v477_v14  ;;  %v622_v26 = vmul.f32 %v10389_v42, %v472_v20  ;;  %v631_v27 = vmul.f32 %v10396_v44, %v482_v25  ;;  %3805 = vmatprep.subr.bf16.mxu0 %v9343_v50 }
 0x167   : > { %13123 = vst [vmem:[#allocation41_spill] sm:$0xff] %v10917_v29  ;;  %13124 = vst [vmem:[#allocation42_spill] sm:$0xff] %v10919_v28  ;;  %2211 = vmatprep.mubr.bf16.mxu0 %v1248_v5  ;;  %2597 = vmatprep.mubr.bf16.mxu1 %v1248_v5  ;;  %v632_v30 = vmul.f32 %v10616_v47, %v482_v25  ;;  %v633_v10 = vmul.f32 %v10620_v1, %v482_v25 }
 0x168   : > { %v754_v62 = vpop.permute.xlu1 %753  ;;  %2212 = vmatmul.mubr.bf16.gmra.mrb[52].mxu0 %v1247_v24  ;;  %2598 = vmatmul.mubr.bf16.gmra.mrb[52].mxu1 %v1247_v24  ;;  %v909_v2 = vmul.f32 %v10383_v40, %v762_v19 }
 0x169   : > { %v901_v16 = vmul.f32 %v10383_v40, %v754_v62  ;;  %v902_v22 = vmul.f32 %v10400_v45, %v754_v62  ;;  %v903_v35 = vmul.f32 %v10598_v21, %v754_v62  ;;  %v904_v9 = vmul.f32 %v10612_v32, %v754_v62 }
 0x16b   : > { %v1031_v46 = vadd.f32 %v903_v35, %v624_v6  ;;  %v1032_v38 = vadd.f32 %v904_v9, %v625_v4  ;;  %v1029_v5 = vadd.f32 %v901_v16, %v622_v26  ;;  %v1030_v24 = vadd.f32 %v902_v22, %v623_v34 }
 0x16c   : > { %v758_v62 = vpop.permute.xlu1 %757  ;;  %v910_v6 = vmul.f32 %v10400_v45, %v762_v19  ;;  %v911_v4 = vmul.f32 %v10598_v21, %v762_v19  ;;  %v912_v35 = vmul.f32 %v10612_v32, %v762_v19  ;;  %v9346_v19 = vld [vmem:[#allocation3 + $0x40c] ss:$16 sps:$4 sm:$0xff]  }
 0x16d   : > { %v905_v14 = vmul.f32 %v10383_v40, %v758_v62  ;;  %v906_v28 = vmul.f32 %v10400_v45, %v758_v62  ;;  %v907_v20 = vmul.f32 %v10598_v21, %v758_v62  ;;  %v908_v29 = vmul.f32 %v10612_v32, %v758_v62  ;;  %4191 = vmatprep.subr.bf16.mxu1 %v9346_v19 }
 0x16e   : > { %v1180_v50 = vadd.f32 %v10439_v0, %v1030_v24  ;;  %v1179_v26 = vadd.f32 %v10432_v60, %v1029_v5  ;;  %v1182_v34 = vadd.f32 %v10735_v37, %v1032_v38  ;;  %v1181_v62 = vadd.f32 %v10729_v18, %v1031_v46 }
 0x16f   : > { %v1033_v25 = vadd.f32 %v905_v14, %v626_v36  ;;  %v1034_v16 = vadd.f32 %v906_v28, %v627_v17  ;;  %v1035_v22 = vadd.f32 %v907_v20, %v628_v23  ;;  %v1036_v9 = vadd.f32 %v908_v29, %v629_v55 }
 0x170   : > { %v795_v29 = vmul.f32 %v10598_v21, %v10406_v48  ;;  %v920_v36 = vadd.f32 %v792_v31, %v513_v7  ;;  %v516_v38 = vmul.f32 %v10616_v47, %v10408_v49  ;;  %v1037_v5 = vadd.f32 %v909_v2, %v630_v52 }
 0x171   : > { %v487_v8 = vpop.permute.xlu1 %486  ;;  %v1184_v39 = vadd.f32 %v10439_v0, %v1034_v16  ;;  %v1183_v3 = vadd.f32 %v10432_v60, %v1033_v25  ;;  %v1186_v54 = vadd.f32 %v10735_v37, %v1036_v9  ;;  %v1185_v28 = vadd.f32 %v10729_v18, %v1035_v22 }
 0x172   : > { %v1038_v24 = vadd.f32 %v910_v6, %v631_v27  ;;  %v924_v14 = vadd.f32 %v10927_v53, %v517_v15  ;;  %v1039_v20 = vadd.f32 %v911_v4, %v632_v30  ;;  %v1040_v25 = vadd.f32 %v912_v35, %v633_v10 }
 0x173   : > { %v1252_v17 = vpack.c.bf16 %v1184_v39, %v1180_v50  ;;  %v1251_v23 = vpack.c.bf16 %v1183_v3, %v1179_v26  ;;  %v10965_v55 = vpack.c.bf16 %v1186_v54, %v1182_v34  ;;  %v10967_v46 = vpack.c.bf16 %v1185_v28, %v1181_v62 }
 0x174   : > { %v634_v16 = vmul.f32 %v10389_v42, %v487_v8  ;;  %v635_v48 = vmul.f32 %v10396_v44, %v487_v8  ;;  %v636_v54 = vmul.f32 %v10616_v47, %v487_v8  ;;  %v637_v3 = vmul.f32 %v10620_v1, %v487_v8 }
 0x175   : > { %2221 = vmatprep.mubr.bf16.mxu0 %v1252_v17  ;;  %2607 = vmatprep.mubr.bf16.mxu1 %v1252_v17  ;;  %v521_v42 = vmul.f32 %v10620_v1, %v10428_v58  ;;  %v804_v44 = vmul.f32 %v10612_v32, %v10454_v13  ;;  %v800_v8 = vmul.f32 %v10612_v32, %v10450_v11 }
 0x176   : > { %v766_v39 = vpop.permute.xlu1 %765  ;;  %2222 = vmatmul.mubr.bf16.gmra.mrb[56].mxu0 %v1251_v23  ;;  %2608 = vmatmul.mubr.bf16.gmra.mrb[56].mxu1 %v1251_v23  ;;  %v1074_v53 = vadd.f32 %v10735_v37, %v924_v14  ;;  %v1187_v30 = vadd.f32 %v10432_v60, %v1037_v5  ;;  %v1190_v10 = vadd.f32 %v10735_v37, %v1040_v25 }
 0x177   : > { %v913_v49 = vmul.f32 %v10383_v40, %v766_v39  ;;  %v914_v2 = vmul.f32 %v10400_v45, %v766_v39  ;;  %v915_v31 = vmul.f32 %v10598_v21, %v766_v39  ;;  %v916_v7 = vmul.f32 %v10612_v32, %v766_v39 }
 0x178   : > { %v1188_v45 = vadd.f32 %v10439_v0, %v1038_v24  ;;  %v1189_v6 = vadd.f32 %v10729_v18, %v1039_v20  ;;  %v791_v50 = vmul.f32 %v10598_v21, %v10385_v41  ;;  %v512_v26 = vmul.f32 %v10616_v47, %v10391_v43 }
 0x179   : > { %v1041_v15 = vadd.f32 %v913_v49, %v634_v16  ;;  %v1042_v52 = vadd.f32 %v914_v2, %v635_v48  ;;  %v1043_v40 = vadd.f32 %v915_v31, %v636_v54  ;;  %v1044_v27 = vadd.f32 %v916_v7, %v637_v3  ;;  %v13125_v48 = vld [vmem:[#allocation14_spill] sm:$0xff]  ;;  %v9344_v2 = vld [vmem:[#allocation3 + $0x408] ss:$16 sps:$4 sm:$0xff]  }
 0x17a   : > { %v525_v34 = vmul.f32 %v10620_v1, %v10434_v61  ;;  %v1070_v62 = vadd.f32 %v10735_v37, %v920_v36  ;;  %v923_v17 = vadd.f32 %v795_v29, %v516_v38  ;;  %v928_v5 = vadd.f32 %v800_v8, %v521_v42  ;;  %v9341_v49 = vld [vmem:[#allocation3 + $0x400] ss:$16 sps:$4 sm:$0xff]   ;;  %v13126_v31 = vld [vmem:[#allocation13_spill] sm:$0xff] }
 0x17b   : > { %v1192_v4 = vadd.f32 %v10439_v0, %v1042_v52  ;;  %v1191_v35 = vadd.f32 %v10432_v60, %v1041_v15  ;;  %v1194_v22 = vadd.f32 %v10735_v37, %v1044_v27  ;;  %v1193_v9 = vadd.f32 %v10729_v18, %v1043_v40  ;;  %v9349_v8 = vld [vmem:[#allocation3 + $0x424] ss:$16 sps:$4 sm:$0xff]   ;;  %v13127_v15 = vld [vmem:[#allocation12_spill] sm:$0xff] }
 0x17c   : > { %v1198_v23 = vpack.c.bf16 %v1074_v53, %v1070_v62  ;;  %v932_v41 = vadd.f32 %v804_v44, %v525_v34  ;;  %v919_v24 = vadd.f32 %v791_v50, %v512_v26  ;;  %v520_v43 = vmul.f32 %v10616_v47, %v10428_v58  ;;  %v9352_v53 = vld [vmem:[#allocation3 + $0x42c] ss:$16 sps:$4 sm:$0xff]   ;;  %v13130_v34 = vld [vmem:[#allocation17_spill] sm:$0xff] }
 0x17d   : > { %v1256_v19 = vpack.c.bf16 %v1192_v4, %v1188_v45  ;;  %v1255_v28 = vpack.c.bf16 %v1191_v35, %v1187_v30  ;;  %v11002_v0 = vpack.c.bf16 %v1194_v22, %v1190_v10  ;;  %v11004_v60 = vpack.c.bf16 %v1193_v9, %v1189_v6  ;;  %v9347_v10 = vld [vmem:[#allocation3 + $0x420] ss:$16 sps:$4 sm:$0xff]   ;;  %v9350_v6 = vld [vmem:[#allocation3 + $0x428] ss:$16 sps:$4 sm:$0xff]   ;;  %v9358_v26 = vld [vmem:[#allocation3 + $0x44c] ss:$16 sps:$4 sm:$0xff]  }
 0x17e   : > { %v799_v36 = vmul.f32 %v10598_v21, %v10450_v11  ;;  %v1073_v14 = vadd.f32 %v10729_v18, %v923_v17  ;;  %v803_v29 = vmul.f32 %v10598_v21, %v10454_v13  ;;  %v812_v38 = vmul.f32 %v10612_v32, %v10496_v12  ;;  %v13128_v4 = vld [vmem:[#allocation19_spill] sm:$0xff] }
 0x17f   : > { %2231 = vmatprep.mubr.bf16.mxu0 %v1256_v19  ;;  %2617 = vmatprep.mubr.bf16.mxu1 %v1256_v19  ;;  %v533_v20 = vmul.f32 %v10620_v1, %v10475_v56  ;;  %v1078_v25 = vadd.f32 %v10735_v37, %v928_v5  ;;  %v1082_v58 = vadd.f32 %v10735_v37, %v932_v41  ;;  %v13129_v22 = vld [vmem:[#allocation15_spill] sm:$0xff]  ;;  %v9353_v5 = vld [vmem:[#allocation3 + $0x440] ss:$16 sps:$4 sm:$0xff]  }
 0x180   : > { %2232 = vmatmul.mubr.bf16.gmra.mrb[60].mxu0 %v1255_v28  ;;  %2618 = vmatmul.mubr.bf16.gmra.mrb[60].mxu1 %v1255_v28  ;;  %v1069_v16 = vadd.f32 %v10729_v18, %v919_v24  ;;  %v524_v11 = vmul.f32 %v10616_v47, %v10434_v61  ;;  %v808_v54 = vmul.f32 %v10612_v32, %v13125_v48  ;;  %v9356_v41 = vld [vmem:[#allocation3 + $0x448] ss:$16 sps:$4 sm:$0xff]  }
 0x181   : > { %2274 = vmatprep.mubr.bf16.mxu0 %v1198_v23  ;;  %2660 = vmatprep.mubr.bf16.mxu1 %v1198_v23  ;;  %v927_v3 = vadd.f32 %v799_v36, %v520_v43  ;;  %v529_v7 = vmul.f32 %v10620_v1, %v13126_v31  ;;  %v1202_v42 = vpack.c.bf16 %v1082_v58, %v1078_v25 }
 0x182   : > { %v1197_v13 = vpack.c.bf16 %v1073_v14, %v1069_v16  ;;  %v931_v39 = vadd.f32 %v803_v29, %v524_v11  ;;  %v940_v44 = vadd.f32 %v812_v38, %v533_v20  ;;  %v816_v61 = vmul.f32 %v10612_v32, %v13127_v15  ;;  %v9361_v14 = vld [vmem:[#allocation3 + $0x464] ss:$16 sps:$4 sm:$0xff]   ;;  %v9364_v29 = vld [vmem:[#allocation3 + $0x46c] ss:$16 sps:$4 sm:$0xff]  }
 0x183   : > { %v1077_v52 = vadd.f32 %v10729_v18, %v927_v3  ;;  %v936_v40 = vadd.f32 %v808_v54, %v529_v7  ;;  %v811_v27 = vmul.f32 %v10598_v21, %v10496_v12  ;;  %v532_v45 = vmul.f32 %v10616_v47, %v10475_v56  ;;  %v9355_v12 = vld [vmem:[#allocation3 + $0x444] ss:$16 sps:$4 sm:$0xff]   ;;  %v13131_v16 = vld [vmem:[#allocation16_spill] sm:$0xff]  ;;  %v9362_v3 = vld [vmem:[#allocation3 + $0x468] ss:$16 sps:$4 sm:$0xff]  }
 0x184   : > { %v1081_v30 = vadd.f32 %v10729_v18, %v931_v39  ;;  %v820_v35 = vmul.f32 %v10612_v32, %v13128_v4  ;;  %v537_v9 = vmul.f32 %v10620_v1, %v13129_v22  ;;  %v1090_v50 = vadd.f32 %v10735_v37, %v940_v44  ;;  %v9359_v54 = vld [vmem:[#allocation3 + $0x460] ss:$16 sps:$4 sm:$0xff]   ;;  %v9370_v7 = vld [vmem:[#allocation3 + $0x48c] ss:$16 sps:$4 sm:$0xff]  }
 0x185   : > { %v807_v56 = vmul.f32 %v10598_v21, %v13125_v48  ;;  %v541_v62 = vmul.f32 %v10620_v1, %v13130_v34  ;;  %v1086_v19 = vadd.f32 %v10735_v37, %v936_v40  ;;  %v528_v28 = vmul.f32 %v10616_v47, %v13126_v31  ;;  %v9367_v31 = vld [vmem:[#allocation3 + $0x484] ss:$16 sps:$4 sm:$0xff]   ;;  %v9365_v40 = vld [vmem:[#allocation3 + $0x480] ss:$16 sps:$4 sm:$0xff]  }
 0x186   : > { %v1201_v17 = vpack.c.bf16 %v1081_v30, %v1077_v52  ;;  %v939_v23 = vadd.f32 %v811_v27, %v532_v45  ;;  %v944_v43 = vadd.f32 %v816_v61, %v537_v9  ;;  %v815_v20 = vmul.f32 %v10598_v21, %v13127_v15  ;;  %v9368_v27 = vld [vmem:[#allocation3 + $0x488] ss:$16 sps:$4 sm:$0xff]   ;;  %v13135_v9 = vld [vmem:[#allocation18_spill] sm:$0xff] }
 0x187   : > { %v1206_v24 = vpack.c.bf16 %v1090_v50, %v1086_v19  ;;  %v948_v36 = vadd.f32 %v820_v35, %v541_v62  ;;  %v935_v38 = vadd.f32 %v807_v56, %v528_v28  ;;  %v536_v25 = vmul.f32 %v10616_v47, %v13129_v22  ;;  %v13134_v45 = vld [vmem:[#allocation21_spill] sm:$0xff]  ;;  %v9376_v35 = vld [vmem:[#allocation3 + $0x4ac] ss:$16 sps:$4 sm:$0xff]   ;;  %v9371_v62 = vld [vmem:[#allocation3 + $0x4a0] ss:$16 sps:$4 sm:$0xff]  }
 0x188   : > { %2275 = vmatmul.mubr.bf16.vlgmr.msra.gmra.mrb[0].mxu0 %v1197_v13  ;;  %2661 = vmatmul.mubr.bf16.vlgmr.msra.gmra.mrb[0].mxu1 %v1197_v13  ;;  %v819_v58 = vmul.f32 %v10598_v21, %v13128_v4  ;;  %v549_v11 = vmul.f32 %v10620_v1, %v13131_v16  ;;  %v1089_v48 = vadd.f32 %v10729_v18, %v939_v23  ;;  %v13132_v13 = vld [vmem:[#allocation25_spill] sm:$0xff]  ;;  %v13136_v28 = vld [vmem:[#allocation30_spill] sm:$0xff]  ;;  %v13137_v23 = vld [vmem:[#allocation20_spill] sm:$0xff] }
 0x189   : > { %2284 = vmatprep.mubr.bf16.mxu0 %v1202_v42  ;;  %2670 = vmatprep.mubr.bf16.mxu1 %v1202_v42  ;;  %v828_v39 = vmul.f32 %v10612_v32, %v13132_v13  ;;  %v540_v42 = vmul.f32 %v10616_v47, %v13130_v34  ;;  %v1085_v44 = vadd.f32 %v10729_v18, %v935_v38  ;;  %v9373_v4 = vld [vmem:[#allocation3 + $0x4a4] ss:$16 sps:$4 sm:$0xff]   ;;  %v9374_v19 = vld [vmem:[#allocation3 + $0x4a8] ss:$16 sps:$4 sm:$0xff]  }
 0x18a   : > { %3806 = vmatpush1.bf16.msra.mxu0 %v9341_v49  ;;  %4192 = vmatpush1.bf16.msra.mxu1 %v9344_v2  ;;  %v1094_v49 = vadd.f32 %v10735_v37, %v944_v43  ;;  %v1098_v2 = vadd.f32 %v10735_v37, %v948_v36  ;;  %v943_v61 = vadd.f32 %v815_v20, %v536_v25  ;;  %v9382_v43 = vld [vmem:[#allocation3 + $0x4cc] ss:$16 sps:$4 sm:$0xff]  }
 0x18b   : > { %3807 = vmatprep.subr.bf16.mxu0 %v9349_v8  ;;  %4193 = vmatprep.subr.bf16.mxu1 %v9352_v53  ;;  %v13133_v8 = vld [vmem:[#allocation23_spill] sm:$0xff]  ;;  %v1205_v15 = vpack.c.bf16 %v1089_v48, %v1085_v44  ;;  %v947_v52 = vadd.f32 %v819_v58, %v540_v42  ;;  %v545_v30 = vmul.f32 %v10620_v1, %v13134_v45  ;;  %v13139_v42 = vld [vmem:[#allocation24_spill] sm:$0xff] }
 0x18c   : > { %v824_v53 = vmul.f32 %v10612_v32, %v13133_v8  ;;  %v548_v22 = vmul.f32 %v10616_v47, %v13131_v16  ;;  %v553_v50 = vmul.f32 %v10620_v1, %v13135_v9  ;;  %v1093_v56 = vadd.f32 %v10729_v18, %v943_v61  ;;  %v9377_v16 = vld [vmem:[#allocation3 + $0x4c0] ss:$16 sps:$4 sm:$0xff]   ;;  %v13140_v61 = vld [vmem:[#allocation33_spill] sm:$0xff] }
 0x18d   : > { %v1097_v34 = vadd.f32 %v10729_v18, %v947_v52  ;;  %v823_v36 = vmul.f32 %v10598_v21, %v13133_v8  ;;  %v544_v20 = vmul.f32 %v10616_v47, %v13134_v45  ;;  %v565_v44 = vmul.f32 %v10620_v1, %v13139_v42  ;;  %v9391_v45 = vld [vmem:[#allocation3 + $0x504] ss:$16 sps:$4 sm:$0xff]  }
 0x18e   : > { %3808 = vmatpush1.bf16.msra.mxu0 %v9347_v10  ;;  %4194 = vmatpush1.bf16.msra.mxu1 %v9350_v6  ;;  %v1210_v10 = vpack.c.bf16 %v1098_v2, %v1094_v49  ;;  %v956_v6 = vadd.f32 %v828_v39, %v549_v11  ;;  %v9380_v11 = vld [vmem:[#allocation3 + $0x4c8] ss:$16 sps:$4 sm:$0xff]   ;;  %v9388_v39 = vld [vmem:[#allocation3 + $0x4ec] ss:$16 sps:$4 sm:$0xff]   ;;  %v552_v2 = vmul.f32 %v10616_v47, %v13135_v9 }
 0x18f   : > { %3809 = vmatprep.subr.bf16.mxu0 %v9355_v12  ;;  %4195 = vmatprep.subr.bf16.mxu1 %v9358_v26  ;;  %v952_v12 = vadd.f32 %v824_v53, %v545_v30  ;;  %v827_v26 = vmul.f32 %v10598_v21, %v13132_v13  ;;  %v1209_v25 = vpack.c.bf16 %v1097_v34, %v1093_v56  ;;  %v9385_v13 = vld [vmem:[#allocation3 + $0x4e4] ss:$16 sps:$4 sm:$0xff]   ;;  %v9383_v53 = vld [vmem:[#allocation3 + $0x4e0] ss:$16 sps:$4 sm:$0xff]   ;;  %v9394_v30 = vld [vmem:[#allocation3 + $0x50c] ss:$16 sps:$4 sm:$0xff]  }
 0x190   : > { %2285 = vmatmul.mubr.bf16.gmra.mrb[4].mxu0 %v1201_v17  ;;  %2671 = vmatmul.mubr.bf16.gmra.mrb[4].mxu1 %v1201_v17  ;;  %v836_v17 = vmul.f32 %v10612_v32, %v13136_v28  ;;  %v951_v49 = vadd.f32 %v823_v36, %v544_v20  ;;  %v844_v52 = vmul.f32 %v10612_v32, %v13140_v61  ;;  %v13142_v56 = vld [vmem:[#allocation31_spill] sm:$0xff] }
 0x191   : > { %2294 = vmatprep.mubr.bf16.mxu0 %v1206_v24  ;;  %2680 = vmatprep.mubr.bf16.mxu1 %v1206_v24  ;;  %v9379_v24 = vld [vmem:[#allocation3 + $0x4c4] ss:$16 sps:$4 sm:$0xff]   ;;  %v1102_v38 = vadd.f32 %v10735_v37, %v952_v12  ;;  %v955_v58 = vadd.f32 %v827_v26, %v548_v22  ;;  %v9389_v12 = vld [vmem:[#allocation3 + $0x500] ss:$16 sps:$4 sm:$0xff]   ;;  %v9392_v26 = vld [vmem:[#allocation3 + $0x508] ss:$16 sps:$4 sm:$0xff]   ;;  %v561_v34 = vmul.f32 %v10620_v1, %v13142_v56 }
 0x192   : > { %3810 = vmatpush1.bf16.msra.mxu0 %v9353_v5  ;;  %4196 = vmatpush1.bf16.msra.mxu1 %v9356_v41  ;;  %v832_v5 = vmul.f32 %v10612_v32, %v13137_v23  ;;  %v1106_v41 = vadd.f32 %v10735_v37, %v956_v6  ;;  %v1101_v6 = vadd.f32 %v10729_v18, %v951_v49  ;;  %v13144_v20 = vld [vmem:[#allocation35_spill] sm:$0xff] }
 0x193   : > { %3811 = vmatprep.subr.bf16.mxu0 %v9361_v14  ;;  %4197 = vmatprep.subr.bf16.mxu1 %v9364_v29  ;;  %v13138_v14 = vld [vmem:[#allocation27_spill] sm:$0xff]  ;;  %v1105_v8 = vadd.f32 %v10729_v18, %v955_v58  ;;  %v13145_v58 = vld [vmem:[#allocation26_spill] sm:$0xff] }
 0x194   : > { %v557_v29 = vmul.f32 %v10620_v1, %v13138_v14  ;;  %v1214_v48 = vpack.c.bf16 %v1106_v41, %v1102_v38  ;;  %v564_v41 = vmul.f32 %v10616_v47, %v13139_v42  ;;  %v9398_v38 = vld [vmem:[#allocation3 + $0x528] ss:$16 sps:$4 sm:$0xff]  }
 0x195   : > { %v1213_v22 = vpack.c.bf16 %v1105_v8, %v1101_v6  ;;  %v9404_v42 = vld [vmem:[#allocation3 + $0x548] ss:$16 sps:$4 sm:$0xff]  }
 0x196   : > { %3812 = vmatpush1.bf16.msra.mxu0 %v9359_v54  ;;  %4198 = vmatpush1.bf16.msra.mxu1 %v9362_v3  ;;  %v960_v54 = vadd.f32 %v832_v5, %v553_v50  ;;  %v964_v3 = vadd.f32 %v836_v17, %v557_v29  ;;  %v9400_v17 = vld [vmem:[#allocation3 + $0x52c] ss:$16 sps:$4 sm:$0xff]   ;;  %v9395_v29 = vld [vmem:[#allocation3 + $0x520] ss:$16 sps:$4 sm:$0xff]  }
 0x197   : > { %3813 = vmatprep.subr.bf16.mxu0 %v9367_v31  ;;  %4199 = vmatprep.subr.bf16.mxu1 %v9370_v7  ;;  %v831_v31 = vmul.f32 %v10598_v21, %v13137_v23  ;;  %v835_v7 = vmul.f32 %v10598_v21, %v13136_v28  ;;  %v9397_v28 = vld [vmem:[#allocation3 + $0x524] ss:$16 sps:$4 sm:$0xff]   ;;  %v13143_v23 = vld [vmem:[#allocation22_spill] sm:$0xff] }
 0x198   : > { %2295 = vmatmul.mubr.bf16.gmra.mrb[8].mxu0 %v1205_v15  ;;  %2681 = vmatmul.mubr.bf16.gmra.mrb[8].mxu1 %v1205_v15  ;;  %v9386_v15 = vld [vmem:[#allocation3 + $0x4e8] ss:$16 sps:$4 sm:$0xff]   ;;  %v848_v5 = vmul.f32 %v10612_v32, %v13143_v23 }
 0x199   : > { %2304 = vmatprep.mubr.bf16.mxu0 %v1210_v10  ;;  %2690 = vmatprep.mubr.bf16.mxu1 %v1210_v10  ;;  %v556_v10 = vmul.f32 %v10616_v47, %v13138_v14  ;;  %v959_v9 = vadd.f32 %v831_v31, %v552_v2 }
 0x19a   : > { %3814 = vmatpush1.bf16.msra.mxu0 %v9365_v40  ;;  %4200 = vmatpush1.bf16.msra.mxu1 %v9368_v27  ;;  %v1110_v40 = vadd.f32 %v10735_v37, %v960_v54  ;;  %v1114_v27 = vadd.f32 %v10735_v37, %v964_v3  ;;  %v9406_v54 = vld [vmem:[#allocation3 + $0x54c] ss:$16 sps:$4 sm:$0xff]  }
 0x19b   : > { %3815 = vmatprep.subr.bf16.mxu0 %v9373_v4  ;;  %4201 = vmatprep.subr.bf16.mxu1 %v9376_v35  ;;  %v13141_v4 = vld [vmem:[#allocation32_spill] sm:$0xff]  ;;  %v963_v50 = vadd.f32 %v835_v7, %v556_v10  ;;  %v1109_v36 = vadd.f32 %v10729_v18, %v959_v9  ;;  %v9410_v10 = vld [vmem:[#allocation3 + $0x568] ss:$16 sps:$4 sm:$0xff]  }
 0x19c   : > { %v840_v35 = vmul.f32 %v10612_v32, %v13141_v4  ;;  %v839_v3 = vmul.f32 %v10598_v21, %v13141_v4  ;;  %v9401_v7 = vld [vmem:[#allocation3 + $0x540] ss:$16 sps:$4 sm:$0xff]  }
 0x19d   : > { %v1113_v14 = vadd.f32 %v10729_v18, %v963_v50 }
 0x19e   : > { %3816 = vmatpush1.bf16.msra.mxu0 %v9371_v62  ;;  %4202 = vmatpush1.bf16.msra.mxu1 %v9374_v19  ;;  %v972_v62 = vadd.f32 %v844_v52, %v565_v44  ;;  %v1218_v19 = vpack.c.bf16 %v1114_v27, %v1110_v40  ;;  %v847_v52 = vmul.f32 %v10598_v21, %v13143_v23  ;;  %v9422_v23 = vld [vmem:[#allocation3 + $0x5a8] ss:$16 sps:$4 sm:$0xff]  }
 0x19f   : > { %3817 = vmatprep.subr.bf16.mxu0 %v9379_v24  ;;  %4203 = vmatprep.subr.bf16.mxu1 %v9382_v43  ;;  %v968_v24 = vadd.f32 %v840_v35, %v561_v34  ;;  %v843_v43 = vmul.f32 %v10598_v21, %v13140_v61  ;;  %v1217_v31 = vpack.c.bf16 %v1113_v14, %v1109_v36  ;;  %v9412_v61 = vld [vmem:[#allocation3 + $0x56c] ss:$16 sps:$4 sm:$0xff]   ;;  %v9415_v35 = vld [vmem:[#allocation3 + $0x584] ss:$16 sps:$4 sm:$0xff]   ;;  %v9416_v34 = vld [vmem:[#allocation3 + $0x588] ss:$16 sps:$4 sm:$0xff]  }
 0x1a0   : > { %2305 = vmatmul.mubr.bf16.gmra.mrb[12].mxu0 %v1209_v25  ;;  %2691 = vmatmul.mubr.bf16.gmra.mrb[12].mxu1 %v1209_v25  ;;  %v852_v25 = vmul.f32 %v10612_v32, %v13144_v20  ;;  %v560_v32 = vmul.f32 %v10616_v47, %v13142_v56  ;;  %v851_v40 = vmul.f32 %v10598_v21, %v13144_v20  ;;  %v9413_v56 = vld [vmem:[#allocation3 + $0x580] ss:$16 sps:$4 sm:$0xff]   ;;  %v13152_v36 = vld [vmem:[#allocation41_spill] sm:$0xff] }
 0x1a1   : > { %2314 = vmatprep.mubr.bf16.mxu0 %v1214_v48  ;;  %2700 = vmatprep.mubr.bf16.mxu1 %v1214_v48  ;;  %v9403_v48 = vld [vmem:[#allocation3 + $0x544] ss:$16 sps:$4 sm:$0xff]   ;;  %v1118_v49 = vadd.f32 %v10735_v37, %v968_v24  ;;  %v971_v2 = vadd.f32 %v843_v43, %v564_v41  ;;  %v568_v27 = vmul.f32 %v10616_v47, %v13145_v58  ;;  %v9425_v41 = vld [vmem:[#allocation3 + $0x5c0] ss:$16 sps:$4 sm:$0xff]   ;;  %v9430_v24 = vld [vmem:[#allocation3 + $0x5cc] ss:$16 sps:$4 sm:$0xff]  }
 0x1a2   : > { %3818 = vmatpush1.bf16.msra.mxu0 %v9377_v16  ;;  %4204 = vmatpush1.bf16.msra.mxu1 %v9380_v11  ;;  %v569_v16 = vmul.f32 %v10620_v1, %v13145_v58  ;;  %v1122_v11 = vadd.f32 %v10735_v37, %v972_v62  ;;  %v13151_v43 = vld [vmem:[#allocation40_spill] sm:$0xff]  ;;  %v9433_v14 = vld [vmem:[#allocation3 + $0x5e4] ss:$16 sps:$4 sm:$0xff]   ;;  %v9434_v20 = vld [vmem:[#allocation3 + $0x5e8] ss:$16 sps:$4 sm:$0xff]  }
 0x1a3   : > { %3819 = vmatprep.subr.bf16.mxu0 %v9385_v13  ;;  %4205 = vmatprep.subr.bf16.mxu1 %v9388_v39  ;;  %v13146_v13 = vld [vmem:[#allocation34_spill] sm:$0xff]  ;;  %v975_v50 = vadd.f32 %v847_v52, %v568_v27  ;;  %v9439_v58 = vld [vmem:[#allocation3 + $0x604] ss:$16 sps:$4 sm:$0xff]  }
 0x1a4   : > { %v573_v39 = vmul.f32 %v10620_v1, %v13146_v13  ;;  %v976_v44 = vadd.f32 %v848_v5, %v569_v16  ;;  %v1222_v8 = vpack.c.bf16 %v1122_v11, %v1118_v49  ;;  %v967_v1 = vadd.f32 %v839_v3, %v560_v32  ;;  %v9442_v16 = vld [vmem:[#allocation3 + $0x60c] ss:$16 sps:$4 sm:$0xff]  }
 0x1a5   : > { %v572_v21 = vmul.f32 %v10616_v47, %v13146_v13  ;;  %v1125_v47 = vadd.f32 %v10729_v18, %v975_v50  ;;  %v13154_v11 = vld [vmem:[#allocation10_spill] sm:$0xff] }
 0x1a6   : > { %3820 = vmatpush1.bf16.msra.mxu0 %v9383_v53  ;;  %4206 = vmatpush1.bf16.msra.mxu1 %v9386_v15  ;;  %v980_v53 = vadd.f32 %v852_v25, %v573_v39  ;;  %v9409_v15 = vld [vmem:[#allocation3 + $0x564] ss:$16 sps:$4 sm:$0xff]   ;;  %v1126_v6 = vadd.f32 %v10735_v37, %v976_v44  ;;  %v1117_v9 = vadd.f32 %v10729_v18, %v967_v1  ;;  %v13153_v25 = vld [vmem:[#allocation42_spill] sm:$0xff] }
 0x1a7   : > { %3821 = vmatprep.subr.bf16.mxu0 %v9391_v45  ;;  %4207 = vmatprep.subr.bf16.mxu1 %v9394_v30  ;;  %v1121_v45 = vadd.f32 %v10729_v18, %v971_v2  ;;  %v9407_v30 = vld [vmem:[#allocation3 + $0x560] ss:$16 sps:$4 sm:$0xff]   ;;  %v13157_v39 = vld [vmem:[#allocation29_spill] sm:$0xff] }
 0x1a8   : > { %2315 = vmatmul.mubr.bf16.gmra.mrb[16].mxu0 %v1213_v22  ;;  %2701 = vmatmul.mubr.bf16.gmra.mrb[16].mxu1 %v1213_v22  ;;  %v1130_v4 = vadd.f32 %v10735_v37, %v980_v53  ;;  %v9418_v22 = vld [vmem:[#allocation3 + $0x58c] ss:$16 sps:$4 sm:$0xff]   ;;  %v9421_v37 = vld [vmem:[#allocation3 + $0x5a4] ss:$16 sps:$4 sm:$0xff]  }
 0x1a9   : > { %2324 = vmatprep.mubr.bf16.mxu0 %v1218_v19  ;;  %2710 = vmatprep.mubr.bf16.mxu1 %v1218_v19  ;;  %v9424_v19 = vld [vmem:[#allocation3 + $0x5ac] ss:$16 sps:$4 sm:$0xff]  }
 0x1aa   : > { %3822 = vmatpush1.bf16.msra.mxu0 %v9389_v12  ;;  %4208 = vmatpush1.bf16.msra.mxu1 %v9392_v26  ;;  %v1221_v12 = vpack.c.bf16 %v1121_v45, %v1117_v9  ;;  %v979_v26 = vadd.f32 %v851_v40, %v572_v21  ;;  %v1226_v62 = vpack.c.bf16 %v1130_v4, %v1126_v6 }
 0x1ab   : > { %3823 = vmatprep.subr.bf16.mxu0 %v9397_v28  ;;  %4209 = vmatprep.subr.bf16.mxu1 %v9400_v17  ;;  %v9419_v17 = vld [vmem:[#allocation3 + $0x5a0] ss:$16 sps:$4 sm:$0xff]  }
 0x1ac   : > { %v1129_v28 = vadd.f32 %v10729_v18, %v979_v26  ;;  %v13147_v18 = vld [vmem:[#allocation36_spill] sm:$0xff] }
 0x1ae   : > { %3824 = vmatpush1.bf16.msra.mxu0 %v9395_v29  ;;  %4210 = vmatpush1.bf16.msra.mxu1 %v9398_v38  ;;  %v1225_v5 = vpack.c.bf16 %v1129_v28, %v1125_v47  ;;  %v9431_v29 = vld [vmem:[#allocation3 + $0x5e0] ss:$16 sps:$4 sm:$0xff]   ;;  %v9436_v38 = vld [vmem:[#allocation3 + $0x5ec] ss:$16 sps:$4 sm:$0xff]  }
 0x1af   : > { %3825 = vmatprep.subr.bf16.mxu0 %v9403_v48  ;;  %4211 = vmatprep.subr.bf16.mxu1 %v9406_v54  ;;  %v13155_v54 = vld [vmem:[#allocation28_spill] sm:$0xff] }
 0x1b0   : > { %2325 = vmatmul.mubr.bf16.gmra.mrb[20].mxu0 %v1217_v31  ;;  %2711 = vmatmul.mubr.bf16.gmra.mrb[20].mxu1 %v1217_v31 }
 0x1b1   : > { %2334 = vmatprep.mubr.bf16.mxu0 %v1222_v8  ;;  %2720 = vmatprep.mubr.bf16.mxu1 %v1222_v8 }
 0x1b2   : > { %3826 = vmatpush1.bf16.msra.mxu0 %v9401_v7  ;;  %4212 = vmatpush1.bf16.msra.mxu1 %v9404_v42 }
 0x1b3   : > { %3827 = vmatprep.subr.bf16.mxu0 %v9409_v15  ;;  %4213 = vmatprep.subr.bf16.mxu1 %v9412_v61 }
 0x1b6   : > { %3828 = vmatpush1.bf16.msra.mxu0 %v9407_v30  ;;  %4214 = vmatpush1.bf16.msra.mxu1 %v9410_v10 }
 0x1b7   : > { %3829 = vmatprep.subr.bf16.mxu0 %v9415_v35  ;;  %4215 = vmatprep.subr.bf16.mxu1 %v9418_v22 }
 0x1b8   : > { %2335 = vmatmul.mubr.bf16.gmra.mrb[24].mxu0 %v1221_v12  ;;  %2721 = vmatmul.mubr.bf16.gmra.mrb[24].mxu1 %v1221_v12 }
 0x1b9   : > { %2344 = vmatprep.mubr.bf16.mxu0 %v1226_v62  ;;  %2730 = vmatprep.mubr.bf16.mxu1 %v1226_v62 }
 0x1ba   : > { %3830 = vmatpush1.bf16.msra.mxu0 %v9413_v56  ;;  %4216 = vmatpush1.bf16.msra.mxu1 %v9416_v34 }
 0x1bb   : > { %3831 = vmatprep.subr.bf16.mxu0 %v9421_v37  ;;  %4217 = vmatprep.subr.bf16.mxu1 %v9424_v19 }
 0x1be   : > { %3832 = vmatpush1.bf16.msra.mxu0 %v9419_v17  ;;  %4218 = vmatpush1.bf16.msra.mxu1 %v9422_v23 }
 0x1bf   : > { %4219 = vmatprep.subr.bf16.mxu1 %v9430_v24 }
 0x1c0   : > { %2345 = vmatmul.mubr.bf16.gmra.mrb[28].mxu0 %v1225_v5  ;;  %2731 = vmatmul.mubr.bf16.gmra.mrb[28].mxu1 %v1225_v5 }
 0x1c1   : > { %2354 = vmatprep.mubr.bf16.mxu0 %v10771_v63  ;;  %2740 = vmatprep.mubr.bf16.mxu1 %v10771_v63  ;;  %v13148_v63 = vld [vmem:[#allocation37_spill] sm:$0xff] }
 0x1c8   : > { %2355 = vmatmul.mubr.bf16.gmra.mrb[32].mxu0 %v10773_v33  ;;  %2741 = vmatmul.mubr.bf16.gmra.mrb[32].mxu1 %v10773_v33  ;;  %v13149_v33 = vld [vmem:[#allocation38_spill] sm:$0xff] }
 0x1c9   : > { %2364 = vmatprep.mubr.bf16.mxu0 %v10793_v51  ;;  %2750 = vmatprep.mubr.bf16.mxu1 %v10793_v51  ;;  %v13150_v51 = vld [vmem:[#allocation39_spill] sm:$0xff] }
 0x1d0   : > { %2365 = vmatmul.mubr.bf16.gmra.mrb[36].mxu0 %v10795_v59  ;;  %2751 = vmatmul.mubr.bf16.gmra.mrb[36].mxu1 %v10795_v59  ;;  %v9427_v59 = vld [vmem:[#allocation3 + $0x5c4] ss:$16 sps:$4 sm:$0xff]  }
 0x1d1   : > { %2374 = vmatprep.mubr.bf16.mxu0 %v10833_v57  ;;  %2760 = vmatprep.mubr.bf16.mxu1 %v10833_v57  ;;  %v9428_v57 = vld [vmem:[#allocation3 + $0x5c8] ss:$16 sps:$4 sm:$0xff]  }
 0x1d2   : > { %3833 = vmatprep.subr.bf16.mxu0 %v9427_v59  ;;  %4220 = vmatpush1.bf16.msra.mxu1 %v9428_v57 }
 0x1d3   : > { %3834 = vmatpush1.bf16.msra.mxu0 %v9425_v41  ;;  %4221 = vmatprep.subr.bf16.mxu1 %v9436_v38 }
 0x1d4   : > { %3835 = vmatprep.subr.bf16.mxu0 %v9433_v14 }
 0x1d6   : > { %4222 = vmatpush1.bf16.msra.mxu1 %v9434_v20 }
 0x1d7   : > { %3836 = vmatpush1.bf16.msra.mxu0 %v9431_v29  ;;  %4384 = vmatprep.subr.bf16.mxu1 %v9442_v16 }
 0x1d8   : > { %2375 = vmatmul.mubr.bf16.gmra.mrb[40].mxu0 %v13147_v18  ;;  %2761 = vmatmul.mubr.bf16.gmra.mrb[40].mxu1 %v13147_v18 }
 0x1d9   : > { %2384 = vmatprep.mubr.bf16.mxu0 %v13148_v63  ;;  %2770 = vmatprep.mubr.bf16.mxu1 %v13148_v63 }
 0x1da   : > { %3998 = vmatprep.subr.bf16.mxu0 %v9439_v58 }
 0x1e0   : > { %2385 = vmatmul.mubr.bf16.gmra.mrb[44].mxu0 %v13149_v33  ;;  %2771 = vmatmul.mubr.bf16.gmra.mrb[44].mxu1 %v13149_v33 }
 0x1e1   : > { %2394 = vmatprep.mubr.bf16.mxu0 %v13150_v51  ;;  %2780 = vmatprep.mubr.bf16.mxu1 %v13150_v51 }
 0x1e8   : > { %2395 = vmatmul.mubr.bf16.gmra.mrb[48].mxu0 %v13151_v43  ;;  %2781 = vmatmul.mubr.bf16.gmra.mrb[48].mxu1 %v13151_v43 }
 0x1e9   : > { %2404 = vmatprep.mubr.bf16.mxu0 %v13152_v36  ;;  %2790 = vmatprep.mubr.bf16.mxu1 %v13152_v36 }
 0x1f0   : > { %2405 = vmatmul.mubr.bf16.gmra.mrb[52].mxu0 %v13153_v25  ;;  %2791 = vmatmul.mubr.bf16.gmra.mrb[52].mxu1 %v13153_v25 }
 0x1f1   : > { %2414 = vmatprep.mubr.bf16.mxu0 %v10965_v55  ;;  %2800 = vmatprep.mubr.bf16.mxu1 %v10965_v55  ;;  %v1387_v55 = vld [vmem:[%s13008_s4] sm:$0xf] }
 0x1f2   : > { %v11176_v48 = vrot.slane %v1387_v55, %v13154_v11  ;;  %v11179_v3 = vrot.slane %v1387_v55, %v13155_v54 }
 0x1f8   : > { %2415 = vmatmul.mubr.bf16.gmra.mrb[56].mxu0 %v10967_v46  ;;  %2801 = vmatmul.mubr.bf16.gmra.mrb[56].mxu1 %v10967_v46  ;;  %v13156_v46 = vld [vmem:[#allocation11_spill] sm:$0xff] }
 0x1f9   : > { %2424 = vmatprep.mubr.bf16.mxu0 %v11002_v0  ;;  %2810 = vmatprep.mubr.bf16.mxu1 %v11002_v0  ;;  %v11182_v13 = vrot.slane %v1387_v55, %v13156_v46  ;;  %v11185_v0 = vrot.slane %v1387_v55, %v13157_v39 }
 0x200   : > { %2425 = vmatmul.mubr.bf16.gmra.mrb[60].mxu0 %v11004_v60  ;;  %2811 = vmatmul.mubr.bf16.gmra.mrb[60].mxu1 %v11004_v60 }
 0x25b   : > { %v2276_v49 = vpop.f32.mrb[0].mxu0  ;;  %v2662_v32 = vpop.f32.mrb[0].mxu1 }
 0x25c   : > { %v8539_v60 = vadd.f32 %v2276_v49, %v11176_v48  ;;  %v8603_v2 = vadd.f32 %v2662_v32, %v11179_v3  ;;  %v2278_v31 = vpop.f32.mrb[1].mxu0  ;;  %v2664_v7 = vpop.f32.mrb[1].mxu1  ;;  %v9437_v32 = vld [vmem:[#allocation3 + $0x600] ss:$16 sps:$4 sm:$0xff]  }
 0x25d   : > { %v8540_v42 = vadd.f32 %v2278_v31, %v11182_v13  ;;  %v8604_v44 = vadd.f32 %v2664_v7, %v11185_v0  ;;  %v2280_v8 = vpop.f32.mrb[2].mxu0  ;;  %v2666_v53 = vpop.f32.mrb[2].mxu1  ;;  %v9445_v7 = vld [vmem:[#allocation3 + $0x624] ss:$16 sps:$4 sm:$0xff]  }
 0x25e   : > { %9533 = vtanh.f32 %v8539_v60  ;;  %v8541_v15 = vadd.f32 %v2280_v8, %v11176_v48  ;;  %v2282_v61 = vpop.f32.mrb[3].mxu0  ;;  %v2668_v1 = vpop.f32.mrb[3].mxu1  ;;  %v8605_v52 = vadd.f32 %v2666_v53, %v11179_v3  ;;  %v9440_v60 = vld [vmem:[#allocation3 + $0x608] ss:$16 sps:$4 sm:$0xff]  }
 0x25f   : > { %9535 = vtanh.f32 %v8603_v2  ;;  %v8542_v40 = vadd.f32 %v2282_v61, %v11182_v13  ;;  %v8606_v27 = vadd.f32 %v2668_v1, %v11185_v0 }
 0x260   : > { %9537 = vtanh.f32 %v8540_v42  ;;  %v9448_v42 = vld [vmem:[#allocation3 + $0x62c] ss:$16 sps:$4 sm:$0xff]  }
 0x261   : > { %9539 = vtanh.f32 %v8604_v44 }
 0x262   : > { %9541 = vtanh.f32 %v8541_v15 }
 0x263   : > { %9543 = vtanh.f32 %v8605_v52  ;;  %v2286_v45 = vpop.f32.mrb[4].mxu0  ;;  %v2672_v30 = vpop.f32.mrb[4].mxu1 }
 0x264   : > { %9545 = vtanh.f32 %v8542_v40  ;;  %v8543_v10 = vadd.f32 %v2286_v45, %v11176_v48  ;;  %v8607_v6 = vadd.f32 %v2672_v30, %v11179_v3  ;;  %v2288_v4 = vpop.f32.mrb[5].mxu0  ;;  %v2674_v35 = vpop.f32.mrb[5].mxu1  ;;  %v9443_v40 = vld [vmem:[#allocation3 + $0x620] ss:$16 sps:$4 sm:$0xff]  }
 0x265   : > { %9547 = vtanh.f32 %v8606_v27  ;;  %v8544_v22 = vadd.f32 %v2288_v4, %v11182_v13  ;;  %v8608_v21 = vadd.f32 %v2674_v35, %v11185_v0  ;;  %v2290_v9 = vpop.f32.mrb[6].mxu0  ;;  %v2676_v50 = vpop.f32.mrb[6].mxu1  ;;  %v9446_v27 = vld [vmem:[#allocation3 + $0x628] ss:$16 sps:$4 sm:$0xff]   ;;  %v9451_v35 = vld [vmem:[#allocation3 + $0x644] ss:$16 sps:$4 sm:$0xff]  }
 0x266   : > { %9549 = vtanh.f32 %v8543_v10  ;;  %v8545_v12 = vadd.f32 %v2290_v9, %v11176_v48  ;;  %v2292_v26 = vpop.f32.mrb[7].mxu0  ;;  %v2678_v56 = vpop.f32.mrb[7].mxu1  ;;  %v8609_v34 = vadd.f32 %v2676_v50, %v11179_v3 }
 0x267   : > { %9551 = vtanh.f32 %v8607_v6  ;;  %v8546_v37 = vadd.f32 %v2292_v26, %v11182_v13  ;;  %v8610_v47 = vadd.f32 %v2678_v56, %v11185_v0 }
 0x268   : > { %v9534_v62 = vpop.eup %9533  ;;  %9553 = vtanh.f32 %v8544_v22  ;;  %v9454_v22 = vld [vmem:[#allocation3 + $0x64c] ss:$16 sps:$4 sm:$0xff]  }
 0x269   : > { %v9536_v19 = vpop.eup %9535  ;;  %9555 = vtanh.f32 %v8608_v21 }
 0x26a   : > { %v9538_v28 = vpop.eup %9537  ;;  %9557 = vtanh.f32 %v8545_v12 }
 0x26b   : > { %v9540_v17 = vpop.eup %9539  ;;  %9559 = vtanh.f32 %v8609_v34  ;;  %v2296_v23 = vpop.f32.mrb[8].mxu0 }
 0x26c   : > { %v2682_v5 = vpop.f32.mrb[8].mxu1  ;;  %v9542_v18 = vpop.eup %9541  ;;  %9561 = vtanh.f32 %v8546_v37  ;;  %v8547_v63 = vadd.f32 %v2296_v23, %v11176_v48 }
 0x26d   : > { %v8611_v33 = vadd.f32 %v2682_v5, %v11179_v3  ;;  %v2298_v51 = vpop.f32.mrb[9].mxu0  ;;  %v2684_v59 = vpop.f32.mrb[9].mxu1  ;;  %9563 = vtanh.f32 %v8610_v47  ;;  %v2949_v14 = vpack.c.bf16 %v9542_v18, %v9534_v62  ;;  %v9449_v5 = vld [vmem:[#allocation3 + $0x640] ss:$16 sps:$4 sm:$0xff]   ;;  %v9452_v18 = vld [vmem:[#allocation3 + $0x648] ss:$16 sps:$4 sm:$0xff]  }
 0x26e   : > { %v9544_v41 = vpop.eup %9543  ;;  %v8548_v24 = vadd.f32 %v2298_v51, %v11182_v13  ;;  %v8612_v57 = vadd.f32 %v2684_v59, %v11185_v0  ;;  %v2300_v43 = vpop.f32.mrb[10].mxu0  ;;  %9565 = vtanh.f32 %v8547_v63  ;;  %v9457_v51 = vld [vmem:[#allocation3 + $0x664] ss:$16 sps:$4 sm:$0xff]   ;;  %v9460_v59 = vld [vmem:[#allocation3 + $0x66c] ss:$16 sps:$4 sm:$0xff]  }
 0x26f   : > { %v2686_v36 = vpop.f32.mrb[10].mxu1  ;;  %v9546_v29 = vpop.eup %9545  ;;  %v8549_v38 = vadd.f32 %v2300_v43, %v11176_v48  ;;  %v11208_v58 = vpack.c.bf16 %v9544_v41, %v9536_v19  ;;  %9567 = vtanh.f32 %v8611_v33 }
 0x270   : > { %v2302_v20 = vpop.f32.mrb[11].mxu0  ;;  %v2688_v25 = vpop.f32.mrb[11].mxu1  ;;  %v8613_v55 = vadd.f32 %v2686_v36, %v11179_v3  ;;  %v2950_v49 = vpack.c.bf16 %v9546_v29, %v9538_v28  ;;  %9569 = vtanh.f32 %v8548_v24 }
 0x271   : > { %v9548_v16 = vpop.eup %9547  ;;  %v8550_v31 = vadd.f32 %v2302_v20, %v11182_v13  ;;  %9571 = vtanh.f32 %v8612_v57  ;;  %v8614_v53 = vadd.f32 %v2688_v25, %v11185_v0  ;;  %v9458_v20 = vld [vmem:[#allocation3 + $0x668] ss:$16 sps:$4 sm:$0xff]  }
 0x272   : > { %v9550_v2 = vpop.eup %9549  ;;  %v11212_v44 = vpack.c.bf16 %v9548_v16, %v9540_v17  ;;  %3837 = vmatprep.mubr.bf16.mxu0 %v2950_v49  ;;  %4223 = vmatprep.mubr.bf16.mxu1 %v2950_v49  ;;  %9573 = vtanh.f32 %v8549_v38  ;;  %v9455_v38 = vld [vmem:[#allocation3 + $0x660] ss:$16 sps:$4 sm:$0xff]  }
 0x273   : > { %v9552_v8 = vpop.eup %9551  ;;  %3838 = vmatmul.mubr.bf16.vlgmr.msra.gmra.mrb[64].mxu0 %v2949_v14  ;;  %4224 = vmatmul.mubr.bf16.vlgmr.msra.gmra.mrb[64].mxu1 %v2949_v14  ;;  %9575 = vtanh.f32 %v8613_v55  ;;  %v2306_v1 = vpop.f32.mrb[12].mxu0 }
 0x274   : > { %v9554_v15 = vpop.eup %9553  ;;  %3999 = vmatpush1.bf16.msra.mxu0 %v9437_v32  ;;  %4385 = vmatpush1.bf16.msra.mxu1 %v9440_v60  ;;  %v2692_v52 = vpop.f32.mrb[12].mxu1  ;;  %9577 = vtanh.f32 %v8550_v31  ;;  %v8551_v30 = vadd.f32 %v2306_v1, %v11176_v48  ;;  %v9463_v60 = vld [vmem:[#allocation3 + $0x684] ss:$16 sps:$4 sm:$0xff]  }
 0x275   : > { %v9556_v61 = vpop.eup %9555  ;;  %v8615_v10 = vadd.f32 %v2692_v52, %v11179_v3  ;;  %v2308_v6 = vpop.f32.mrb[13].mxu0  ;;  %4000 = vmatprep.subr.bf16.mxu0 %v9445_v7  ;;  %4386 = vmatprep.subr.bf16.mxu1 %v9448_v42  ;;  %9579 = vtanh.f32 %v8614_v53 }
 0x276   : > { %v9558_v45 = vpop.eup %9557  ;;  %v2694_v4 = vpop.f32.mrb[13].mxu1  ;;  %v8552_v9 = vadd.f32 %v2308_v6, %v11182_v13  ;;  %9581 = vtanh.f32 %v8551_v30  ;;  %v9461_v6 = vld [vmem:[#allocation3 + $0x680] ss:$16 sps:$4 sm:$0xff]  }
 0x277   : > { %v9560_v21 = vpop.eup %9559  ;;  %v8616_v50 = vadd.f32 %v2694_v4, %v11185_v0  ;;  %v2310_v12 = vpop.f32.mrb[14].mxu0  ;;  %v2953_v56 = vpack.c.bf16 %v9558_v45, %v9550_v2  ;;  %9583 = vtanh.f32 %v8615_v10  ;;  %v9466_v2 = vld [vmem:[#allocation3 + $0x68c] ss:$16 sps:$4 sm:$0xff]   ;;  %v9464_v4 = vld [vmem:[#allocation3 + $0x688] ss:$16 sps:$4 sm:$0xff]  }
 0x278   : > { %v2696_v26 = vpop.f32.mrb[14].mxu1  ;;  %v9562_v34 = vpop.eup %9561  ;;  %v8553_v62 = vadd.f32 %v2310_v12, %v11176_v48  ;;  %v11220_v47 = vpack.c.bf16 %v9560_v21, %v9552_v8  ;;  %4001 = vmatpush1.bf16.msra.mxu0 %v9443_v40  ;;  %4387 = vmatpush1.bf16.msra.mxu1 %v9446_v27  ;;  %9585 = vtanh.f32 %v8552_v9  ;;  %v9469_v21 = vld [vmem:[#allocation3 + $0x6a4] ss:$16 sps:$4 sm:$0xff]   ;;  %v9472_v9 = vld [vmem:[#allocation3 + $0x6ac] ss:$16 sps:$4 sm:$0xff]  }
 0x279   : > { %v2312_v37 = vpop.f32.mrb[15].mxu0  ;;  %v2698_v19 = vpop.f32.mrb[15].mxu1  ;;  %v8617_v17 = vadd.f32 %v2696_v26, %v11179_v3  ;;  %v2954_v23 = vpack.c.bf16 %v9562_v34, %v9554_v15  ;;  %4002 = vmatprep.subr.bf16.mxu0 %v9451_v35  ;;  %4388 = vmatprep.subr.bf16.mxu1 %v9454_v22  ;;  %9587 = vtanh.f32 %v8616_v50 }
 0x27a   : > { %v9564_v28 = vpop.eup %9563  ;;  %v8554_v33 = vadd.f32 %v2312_v37, %v11182_v13  ;;  %v8618_v57 = vadd.f32 %v2698_v19, %v11185_v0  ;;  %9589 = vtanh.f32 %v8553_v62  ;;  %v9467_v19 = vld [vmem:[#allocation3 + $0x6a0] ss:$16 sps:$4 sm:$0xff]  }
 0x27b   : > { %v9566_v63 = vpop.eup %9565  ;;  %v11224_v41 = vpack.c.bf16 %v9564_v28, %v9556_v61  ;;  %3847 = vmatprep.mubr.bf16.mxu0 %v2954_v23  ;;  %4233 = vmatprep.mubr.bf16.mxu1 %v2954_v23  ;;  %9591 = vtanh.f32 %v8617_v17  ;;  %v2316_v14 = vpop.f32.mrb[16].mxu0  ;;  %v9470_v28 = vld [vmem:[#allocation3 + $0x6a8] ss:$16 sps:$4 sm:$0xff]  }
 0x27c   : > { %v9568_v24 = vpop.eup %9567  ;;  %3848 = vmatmul.mubr.bf16.gmra.mrb[68].mxu0 %v2953_v56  ;;  %4234 = vmatmul.mubr.bf16.gmra.mrb[68].mxu1 %v2953_v56  ;;  %v2702_v29 = vpop.f32.mrb[16].mxu1  ;;  %9593 = vtanh.f32 %v8554_v33  ;;  %v8555_v16 = vadd.f32 %v2316_v14, %v11176_v48  ;;  %v9475_v33 = vld [vmem:[#allocation3 + $0x6c4] ss:$16 sps:$4 sm:$0xff]  }
 0x27d   : > { %v9570_v43 = vpop.eup %9569  ;;  %4003 = vmatpush1.bf16.msra.mxu0 %v9449_v5  ;;  %4389 = vmatpush1.bf16.msra.mxu1 %v9452_v18  ;;  %v8619_v55 = vadd.f32 %v2702_v29, %v11179_v3  ;;  %v2318_v49 = vpop.f32.mrb[17].mxu0  ;;  %9595 = vtanh.f32 %v8618_v57 }
 0x27e   : > { %v9572_v36 = vpop.eup %9571  ;;  %v2704_v32 = vpop.f32.mrb[17].mxu1  ;;  %4004 = vmatprep.subr.bf16.mxu0 %v9457_v51  ;;  %4390 = vmatprep.subr.bf16.mxu1 %v9460_v59  ;;  %v8556_v7 = vadd.f32 %v2318_v49, %v11182_v13  ;;  %9597 = vtanh.f32 %v8555_v16  ;;  %v9478_v51 = vld [vmem:[#allocation3 + $0x6cc] ss:$16 sps:$4 sm:$0xff]  }
 0x27f   : > { %v9574_v25 = vpop.eup %9573  ;;  %v8620_v42 = vadd.f32 %v2704_v32, %v11185_v0  ;;  %v2320_v8 = vpop.f32.mrb[18].mxu0  ;;  %9599 = vtanh.f32 %v8619_v55 }
 0x280   : > { %v9576_v31 = vpop.eup %9575  ;;  %v2706_v53 = vpop.f32.mrb[18].mxu1  ;;  %v2957_v15 = vpack.c.bf16 %v9574_v25, %v9566_v63  ;;  %v8557_v1 = vadd.f32 %v2320_v8, %v11176_v48  ;;  %9601 = vtanh.f32 %v8556_v7  ;;  %v9484_v8 = vld [vmem:[#allocation3 + $0x6ec] ss:$16 sps:$4 sm:$0xff]  }
 0x281   : > { %v9578_v61 = vpop.eup %9577  ;;  %v2322_v52 = vpop.f32.mrb[19].mxu0  ;;  %v11232_v27 = vpack.c.bf16 %v9576_v31, %v9568_v24  ;;  %v8621_v30 = vadd.f32 %v2706_v53, %v11179_v3  ;;  %4005 = vmatpush1.bf16.msra.mxu0 %v9455_v38  ;;  %4391 = vmatpush1.bf16.msra.mxu1 %v9458_v20  ;;  %9603 = vtanh.f32 %v8620_v42  ;;  %v9481_v42 = vld [vmem:[#allocation3 + $0x6e4] ss:$16 sps:$4 sm:$0xff]  }
 0x282   : > { %v2708_v40 = vpop.f32.mrb[19].mxu1  ;;  %v9580_v45 = vpop.eup %9579  ;;  %v2958_v10 = vpack.c.bf16 %v9578_v61, %v9570_v43  ;;  %v8558_v22 = vadd.f32 %v2322_v52, %v11182_v13  ;;  %4006 = vmatprep.subr.bf16.mxu0 %v9463_v60  ;;  %4392 = vmatprep.subr.bf16.mxu1 %v9466_v2  ;;  %9605 = vtanh.f32 %v8557_v1  ;;  %v9473_v60 = vld [vmem:[#allocation3 + $0x6c0] ss:$16 sps:$4 sm:$0xff]   ;;  %v9476_v2 = vld [vmem:[#allocation3 + $0x6c8] ss:$16 sps:$4 sm:$0xff]  }
 0x283   : > { %v9582_v35 = vpop.eup %9581  ;;  %v11236_v50 = vpack.c.bf16 %v9580_v45, %v9572_v36  ;;  %v8622_v26 = vadd.f32 %v2708_v40, %v11185_v0  ;;  %9607 = vtanh.f32 %v8621_v30  ;;  %v2326_v62 = vpop.f32.mrb[20].mxu0  ;;  %v9479_v30 = vld [vmem:[#allocation3 + $0x6e0] ss:$16 sps:$4 sm:$0xff]  }
 0x284   : > { %v9584_v12 = vpop.eup %9583  ;;  %3857 = vmatprep.mubr.bf16.mxu0 %v2958_v10  ;;  %4243 = vmatprep.mubr.bf16.mxu1 %v2958_v10  ;;  %v2712_v37 = vpop.f32.mrb[20].mxu1  ;;  %9609 = vtanh.f32 %v8558_v22  ;;  %v8559_v23 = vadd.f32 %v2326_v62, %v11176_v48  ;;  %v9482_v10 = vld [vmem:[#allocation3 + $0x6e8] ss:$16 sps:$4 sm:$0xff]  }
 0x285   : > { %v9586_v56 = vpop.eup %9585  ;;  %3858 = vmatmul.mubr.bf16.gmra.mrb[72].mxu0 %v2957_v15  ;;  %4244 = vmatmul.mubr.bf16.gmra.mrb[72].mxu1 %v2957_v15  ;;  %v8623_v5 = vadd.f32 %v2712_v37, %v11179_v3  ;;  %v2328_v18 = vpop.f32.mrb[21].mxu0  ;;  %9611 = vtanh.f32 %v8622_v26 }
 0x286   : > { %v9588_v34 = vpop.eup %9587  ;;  %4007 = vmatpush1.bf16.msra.mxu0 %v9461_v6  ;;  %4393 = vmatpush1.bf16.msra.mxu1 %v9464_v4  ;;  %v2714_v63 = vpop.f32.mrb[21].mxu1  ;;  %v8560_v24 = vadd.f32 %v2328_v18, %v11182_v13  ;;  %9613 = vtanh.f32 %v8559_v23 }
 0x287   : > { %v9590_v17 = vpop.eup %9589  ;;  %4008 = vmatprep.subr.bf16.mxu0 %v9469_v21  ;;  %4394 = vmatprep.subr.bf16.mxu1 %v9472_v9  ;;  %v8624_v57 = vadd.f32 %v2714_v63, %v11185_v0  ;;  %v2330_v43 = vpop.f32.mrb[22].mxu0  ;;  %9615 = vtanh.f32 %v8623_v5  ;;  %v9487_v9 = vld [vmem:[#allocation3 + $0x704] ss:$16 sps:$4 sm:$0xff]  }
 0x288   : > { %v9592_v59 = vpop.eup %9591  ;;  %v2716_v36 = vpop.f32.mrb[22].mxu1  ;;  %v2961_v14 = vpack.c.bf16 %v9590_v17, %v9582_v35  ;;  %v8561_v38 = vadd.f32 %v2330_v43, %v11176_v48  ;;  %9617 = vtanh.f32 %v8560_v24  ;;  %v9488_v24 = vld [vmem:[#allocation3 + $0x708] ss:$16 sps:$4 sm:$0xff]  }
 0x289   : > { %v9594_v29 = vpop.eup %9593  ;;  %v2332_v20 = vpop.f32.mrb[23].mxu0  ;;  %v11244_v16 = vpack.c.bf16 %v9592_v59, %v9584_v12  ;;  %v8625_v49 = vadd.f32 %v2716_v36, %v11179_v3  ;;  %9619 = vtanh.f32 %v8624_v57  ;;  %v9490_v12 = vld [vmem:[#allocation3 + $0x70c] ss:$16 sps:$4 sm:$0xff]   ;;  %v9485_v59 = vld [vmem:[#allocation3 + $0x700] ss:$16 sps:$4 sm:$0xff]  }
 0x28a   : > { %v2718_v25 = vpop.f32.mrb[23].mxu1  ;;  %v9596_v55 = vpop.eup %9595  ;;  %v2962_v32 = vpack.c.bf16 %v9594_v29, %v9586_v56  ;;  %4009 = vmatpush1.bf16.msra.mxu0 %v9467_v19  ;;  %4395 = vmatpush1.bf16.msra.mxu1 %v9470_v28  ;;  %v8562_v7 = vadd.f32 %v2332_v20, %v11182_v13  ;;  %9621 = vtanh.f32 %v8561_v38  ;;  %v9493_v36 = vld [vmem:[#allocation3 + $0x724] ss:$16 sps:$4 sm:$0xff]  }
 0x28b   : > { %v9598_v31 = vpop.eup %9597  ;;  %4010 = vmatprep.subr.bf16.mxu0 %v9475_v33  ;;  %4396 = vmatprep.subr.bf16.mxu1 %v9478_v51  ;;  %v11248_v53 = vpack.c.bf16 %v9596_v55, %v9588_v34  ;;  %v8626_v61 = vadd.f32 %v2718_v25, %v11185_v0  ;;  %9623 = vtanh.f32 %v8625_v49  ;;  %v2336_v40 = vpop.f32.mrb[24].mxu0 }
 0x28c   : > { %v9600_v15 = vpop.eup %9599  ;;  %3867 = vmatprep.mubr.bf16.mxu0 %v2962_v32  ;;  %4253 = vmatprep.mubr.bf16.mxu1 %v2962_v32  ;;  %v2722_v45 = vpop.f32.mrb[24].mxu1  ;;  %9625 = vtanh.f32 %v8562_v7  ;;  %v8563_v4 = vadd.f32 %v2336_v40, %v11176_v48 }
 0x28d   : > { %v9602_v1 = vpop.eup %9601  ;;  %3868 = vmatmul.mubr.bf16.gmra.mrb[76].mxu0 %v2961_v14  ;;  %4254 = vmatmul.mubr.bf16.gmra.mrb[76].mxu1 %v2961_v14  ;;  %v8627_v35 = vadd.f32 %v2722_v45, %v11179_v3  ;;  %v2338_v22 = vpop.f32.mrb[25].mxu0  ;;  %9627 = vtanh.f32 %v8626_v61  ;;  %v9496_v14 = vld [vmem:[#allocation3 + $0x72c] ss:$16 sps:$4 sm:$0xff]   ;;  %v9499_v61 = vld [vmem:[#allocation3 + $0x744] ss:$16 sps:$4 sm:$0xff]  }
 0x28e   : > { %v9604_v52 = vpop.eup %9603  ;;  %4011 = vmatpush1.bf16.msra.mxu0 %v9473_v60  ;;  %4397 = vmatpush1.bf16.msra.mxu1 %v9476_v2  ;;  %v2724_v21 = vpop.f32.mrb[25].mxu1  ;;  %v8564_v56 = vadd.f32 %v2338_v22, %v11182_v13  ;;  %9629 = vtanh.f32 %v8563_v4  ;;  %v9491_v60 = vld [vmem:[#allocation3 + $0x720] ss:$16 sps:$4 sm:$0xff]   ;;  %v9494_v2 = vld [vmem:[#allocation3 + $0x728] ss:$16 sps:$4 sm:$0xff]  }
 0x28f   : > { %v9606_v6 = vpop.eup %9605  ;;  %4012 = vmatprep.subr.bf16.mxu0 %v9481_v42  ;;  %4398 = vmatprep.subr.bf16.mxu1 %v9484_v8  ;;  %v8628_v34 = vadd.f32 %v2724_v21, %v11185_v0  ;;  %v2340_v62 = vpop.f32.mrb[26].mxu0  ;;  %9631 = vtanh.f32 %v8627_v35 }
 0x290   : > { %v9608_v26 = vpop.eup %9607  ;;  %v2726_v37 = vpop.f32.mrb[26].mxu1  ;;  %v2965_v19 = vpack.c.bf16 %v9606_v6, %v9598_v31  ;;  %v8565_v17 = vadd.f32 %v2340_v62, %v11176_v48  ;;  %9633 = vtanh.f32 %v8564_v56  ;;  %v9500_v62 = vld [vmem:[#allocation3 + $0x748] ss:$16 sps:$4 sm:$0xff]  }
 0x291   : > { %v9610_v28 = vpop.eup %9609  ;;  %v2342_v23 = vpop.f32.mrb[27].mxu0  ;;  %v11256_v18 = vpack.c.bf16 %v9608_v26, %v9600_v15  ;;  %v8629_v33 = vadd.f32 %v2726_v37, %v11179_v3  ;;  %9635 = vtanh.f32 %v8628_v34  ;;  %v9497_v34 = vld [vmem:[#allocation3 + $0x740] ss:$16 sps:$4 sm:$0xff]  }
 0x292   : > { %v2728_v5 = vpop.f32.mrb[27].mxu1  ;;  %v9612_v63 = vpop.eup %9611  ;;  %v2966_v51 = vpack.c.bf16 %v9610_v28, %v9602_v1  ;;  %4013 = vmatpush1.bf16.msra.mxu0 %v9479_v30  ;;  %4399 = vmatpush1.bf16.msra.mxu1 %v9482_v10  ;;  %v8566_v43 = vadd.f32 %v2342_v23, %v11182_v13  ;;  %9637 = vtanh.f32 %v8565_v17  ;;  %v9502_v1 = vld [vmem:[#allocation3 + $0x74c] ss:$16 sps:$4 sm:$0xff]   ;;  %v9505_v28 = vld [vmem:[#allocation3 + $0x764] ss:$16 sps:$4 sm:$0xff]  }
 0x293   : > { %v9614_v57 = vpop.eup %9613  ;;  %4014 = vmatprep.subr.bf16.mxu0 %v9487_v9  ;;  %4400 = vmatprep.subr.bf16.mxu1 %v9490_v12  ;;  %v11260_v29 = vpack.c.bf16 %v9612_v63, %v9604_v52  ;;  %v8630_v20 = vadd.f32 %v2728_v5, %v11185_v0  ;;  %9639 = vtanh.f32 %v8629_v33  ;;  %v2346_v49 = vpop.f32.mrb[28].mxu0  ;;  %v9508_v17 = vld [vmem:[#allocation3 + $0x76c] ss:$16 sps:$4 sm:$0xff]  }
 0x294   : > { %v9616_v38 = vpop.eup %9615  ;;  %3877 = vmatprep.mubr.bf16.mxu0 %v2966_v51  ;;  %4263 = vmatprep.mubr.bf16.mxu1 %v2966_v51  ;;  %v2732_v32 = vpop.f32.mrb[28].mxu1  ;;  %9641 = vtanh.f32 %v8566_v43  ;;  %v8567_v7 = vadd.f32 %v2346_v49, %v11176_v48  ;;  %v9506_v43 = vld [vmem:[#allocation3 + $0x768] ss:$16 sps:$4 sm:$0xff]   ;;  %v9514_v49 = vld [vmem:[#allocation3 + $0x78c] ss:$16 sps:$4 sm:$0xff]  }
 0x295   : > { %v9618_v25 = vpop.eup %9617  ;;  %3878 = vmatmul.mubr.bf16.gmra.mrb[80].mxu0 %v2965_v19  ;;  %4264 = vmatmul.mubr.bf16.gmra.mrb[80].mxu1 %v2965_v19  ;;  %v8631_v42 = vadd.f32 %v2732_v32, %v11179_v3  ;;  %v2348_v8 = vpop.f32.mrb[29].mxu0  ;;  %9643 = vtanh.f32 %v8630_v20 }
 0x296   : > { %v9620_v55 = vpop.eup %9619  ;;  %4015 = vmatpush1.bf16.msra.mxu0 %v9485_v59  ;;  %4401 = vmatpush1.bf16.msra.mxu1 %v9488_v24  ;;  %v2734_v15 = vpop.f32.mrb[29].mxu1  ;;  %v8568_v40 = vadd.f32 %v2348_v8, %v11182_v13  ;;  %9645 = vtanh.f32 %v8567_v7 }
 0x297   : > { %v9622_v31 = vpop.eup %9621  ;;  %4016 = vmatprep.subr.bf16.mxu0 %v9493_v36  ;;  %4402 = vmatprep.subr.bf16.mxu1 %v9496_v14  ;;  %v8632_v45 = vadd.f32 %v2734_v15, %v11185_v0  ;;  %v2350_v30 = vpop.f32.mrb[30].mxu0  ;;  %9647 = vtanh.f32 %v8631_v42 }
 0x298   : > { %v9624_v52 = vpop.eup %9623  ;;  %v2736_v10 = vpop.f32.mrb[30].mxu1  ;;  %v2969_v6 = vpack.c.bf16 %v9622_v31, %v9614_v57  ;;  %v8569_v35 = vadd.f32 %v2350_v30, %v11176_v48  ;;  %9649 = vtanh.f32 %v8568_v40  ;;  %v9503_v57 = vld [vmem:[#allocation3 + $0x760] ss:$16 sps:$4 sm:$0xff]  }
 0x299   : > { %v9626_v4 = vpop.eup %9625  ;;  %v2352_v22 = vpop.f32.mrb[31].mxu0  ;;  %v11268_v9 = vpack.c.bf16 %v9624_v52, %v9616_v38  ;;  %v8633_v26 = vadd.f32 %v2736_v10, %v11179_v3  ;;  %9651 = vtanh.f32 %v8632_v45  ;;  %v9509_v10 = vld [vmem:[#allocation3 + $0x780] ss:$16 sps:$4 sm:$0xff]  }
 0x29a   : > { %v2738_v21 = vpop.f32.mrb[31].mxu1  ;;  %v9628_v12 = vpop.eup %9627  ;;  %v2970_v56 = vpack.c.bf16 %v9626_v4, %v9618_v25  ;;  %4017 = vmatpush1.bf16.msra.mxu0 %v9491_v60  ;;  %4403 = vmatpush1.bf16.msra.mxu1 %v9494_v2  ;;  %v8570_v19 = vadd.f32 %v2352_v22, %v11182_v13  ;;  %9653 = vtanh.f32 %v8569_v35  ;;  %v9517_v22 = vld [vmem:[#allocation3 + $0x7a4] ss:$16 sps:$4 sm:$0xff]  }
 0x29b   : > { %v9630_v37 = vpop.eup %9629  ;;  %4018 = vmatprep.subr.bf16.mxu0 %v9499_v61  ;;  %4404 = vmatprep.subr.bf16.mxu1 %v9502_v1  ;;  %v11272_v23 = vpack.c.bf16 %v9628_v12, %v9620_v55  ;;  %v8634_v63 = vadd.f32 %v2738_v21, %v11185_v0  ;;  %9655 = vtanh.f32 %v8633_v26  ;;  %v2356_v59 = vpop.f32.mrb[32].mxu0  ;;  %v9511_v55 = vld [vmem:[#allocation3 + $0x784] ss:$16 sps:$4 sm:$0xff]   ;;  %v9520_v21 = vld [vmem:[#allocation3 + $0x7ac] ss:$16 sps:$4 sm:$0xff]  }
 0x29c   : > { %v9632_v5 = vpop.eup %9631  ;;  %3887 = vmatprep.mubr.bf16.mxu0 %v2970_v56  ;;  %4273 = vmatprep.mubr.bf16.mxu1 %v2970_v56  ;;  %v2742_v24 = vpop.f32.mrb[32].mxu1  ;;  %9657 = vtanh.f32 %v8570_v19  ;;  %v8571_v14 = vadd.f32 %v2356_v59, %v11176_v48 }
 0x29d   : > { %v9634_v33 = vpop.eup %9633  ;;  %3888 = vmatmul.mubr.bf16.gmra.mrb[84].mxu0 %v2969_v6  ;;  %4274 = vmatmul.mubr.bf16.gmra.mrb[84].mxu1 %v2969_v6  ;;  %v8635_v38 = vadd.f32 %v2742_v24, %v11179_v3  ;;  %v2358_v20 = vpop.f32.mrb[33].mxu0  ;;  %9659 = vtanh.f32 %v8634_v63  ;;  %v9512_v6 = vld [vmem:[#allocation3 + $0x788] ss:$16 sps:$4 sm:$0xff]   ;;  %v9523_v24 = vld [vmem:[#allocation3 + $0x7c4] ss:$16 sps:$4 sm:$0xff]  }
 0x29e   : > { %v9636_v51 = vpop.eup %9635  ;;  %4019 = vmatpush1.bf16.msra.mxu0 %v9497_v34  ;;  %4405 = vmatpush1.bf16.msra.mxu1 %v9500_v62  ;;  %v2744_v25 = vpop.f32.mrb[33].mxu1  ;;  %v8572_v60 = vadd.f32 %v2358_v20, %v11182_v13  ;;  %9661 = vtanh.f32 %v8571_v14 }
 0x29f   : > { %v9638_v36 = vpop.eup %9637  ;;  %4020 = vmatprep.subr.bf16.mxu0 %v9505_v28  ;;  %4406 = vmatprep.subr.bf16.mxu1 %v9508_v17  ;;  %v8636_v2 = vadd.f32 %v2744_v25, %v11185_v0  ;;  %v2360_v31 = vpop.f32.mrb[34].mxu0  ;;  %9663 = vtanh.f32 %v8635_v38  ;;  %v9515_v28 = vld [vmem:[#allocation3 + $0x7a0] ss:$16 sps:$4 sm:$0xff]   ;;  %v9518_v17 = vld [vmem:[#allocation3 + $0x7a8] ss:$16 sps:$4 sm:$0xff]  }
 0x2a0   : > { %v9640_v32 = vpop.eup %9639  ;;  %v2746_v7 = vpop.f32.mrb[34].mxu1  ;;  %v2973_v42 = vpack.c.bf16 %v9638_v36, %v9630_v37  ;;  %v8573_v15 = vadd.f32 %v2360_v31, %v11176_v48  ;;  %9665 = vtanh.f32 %v8572_v60 }
 0x2a1   : > { %v9642_v8 = vpop.eup %9641  ;;  %v2362_v61 = vpop.f32.mrb[35].mxu0  ;;  %v11280_v52 = vpack.c.bf16 %v9640_v32, %v9632_v5  ;;  %v8637_v45 = vadd.f32 %v2746_v7, %v11179_v3  ;;  %9667 = vtanh.f32 %v8636_v2 }
 0x2a2   : > { %v2748_v1 = vpop.f32.mrb[35].mxu1  ;;  %v9644_v40 = vpop.eup %9643  ;;  %v2974_v30 = vpack.c.bf16 %v9642_v8, %v9634_v33  ;;  %4021 = vmatpush1.bf16.msra.mxu0 %v9503_v57  ;;  %4407 = vmatpush1.bf16.msra.mxu1 %v9506_v43  ;;  %v8574_v35 = vadd.f32 %v2362_v61, %v11182_v13  ;;  %9669 = vtanh.f32 %v8573_v15  ;;  %v9526_v57 = vld [vmem:[#allocation3 + $0x7cc] ss:$16 sps:$4 sm:$0xff]   ;;  %v9521_v8 = vld [vmem:[#allocation3 + $0x7c0] ss:$16 sps:$4 sm:$0xff]  }
 0x2a3   : > { %v9646_v4 = vpop.eup %9645  ;;  %4022 = vmatprep.subr.bf16.mxu0 %v9511_v55  ;;  %4408 = vmatprep.subr.bf16.mxu1 %v9514_v49  ;;  %v11284_v12 = vpack.c.bf16 %v9644_v40, %v9636_v51  ;;  %v8638_v56 = vadd.f32 %v2748_v1, %v11185_v0  ;;  %9671 = vtanh.f32 %v8637_v45  ;;  %v2366_v37 = vpop.f32.mrb[36].mxu0  ;;  %v9524_v15 = vld [vmem:[#allocation3 + $0x7c8] ss:$16 sps:$4 sm:$0xff]   ;;  %v9529_v40 = vld [vmem:[#allocation3 + $0x7e4] ss:$16 sps:$4 sm:$0xff]  }
 0x2a4   : > { %v9648_v26 = vpop.eup %9647  ;;  %3897 = vmatprep.mubr.bf16.mxu0 %v2974_v30  ;;  %4283 = vmatprep.mubr.bf16.mxu1 %v2974_v30  ;;  %v2752_v19 = vpop.f32.mrb[36].mxu1  ;;  %9673 = vtanh.f32 %v8574_v35  ;;  %v8575_v63 = vadd.f32 %v2366_v37, %v11176_v48  ;;  %v9532_v45 = vld [vmem:[#allocation3 + $0x7ec] ss:$16 sps:$4 sm:$0xff]  }
 0x2a5   : > { %v9650_v34 = vpop.eup %9649  ;;  %3898 = vmatmul.mubr.bf16.gmra.mrb[88].mxu0 %v2973_v42  ;;  %4284 = vmatmul.mubr.bf16.gmra.mrb[88].mxu1 %v2973_v42  ;;  %v8639_v33 = vadd.f32 %v2752_v19, %v11179_v3  ;;  %v2368_v51 = vpop.f32.mrb[37].mxu0  ;;  %9675 = vtanh.f32 %v8638_v56  ;;  %v9530_v56 = vld [vmem:[#allocation3 + $0x7e8] ss:$16 sps:$4 sm:$0xff]  }
 0x2a6   : > { %v9652_v62 = vpop.eup %9651  ;;  %4023 = vmatpush1.bf16.msra.mxu0 %v9509_v10  ;;  %4409 = vmatpush1.bf16.msra.mxu1 %v9512_v6  ;;  %v2754_v59 = vpop.f32.mrb[37].mxu1  ;;  %v8576_v36 = vadd.f32 %v2368_v51, %v11182_v13  ;;  %9677 = vtanh.f32 %v8575_v63 }
 0x2a7   : > { %v9654_v5 = vpop.eup %9653  ;;  %4024 = vmatprep.subr.bf16.mxu0 %v9517_v22  ;;  %4410 = vmatprep.subr.bf16.mxu1 %v9520_v21  ;;  %v8640_v14 = vadd.f32 %v2754_v59, %v11185_v0  ;;  %v2370_v38 = vpop.f32.mrb[38].mxu0  ;;  %9679 = vtanh.f32 %v8639_v33 }
 0x2a8   : > { %v9656_v43 = vpop.eup %9655  ;;  %v2756_v20 = vpop.f32.mrb[38].mxu1  ;;  %v2977_v25 = vpack.c.bf16 %v9654_v5, %v9646_v4  ;;  %v8577_v49 = vadd.f32 %v2370_v38, %v11176_v48  ;;  %9681 = vtanh.f32 %v8576_v36 }
 0x2a9   : > { %v9658_v55 = vpop.eup %9657  ;;  %v2372_v32 = vpop.f32.mrb[39].mxu0  ;;  %v11292_v2 = vpack.c.bf16 %v9656_v43, %v9648_v26  ;;  %v8641_v7 = vadd.f32 %v2756_v20, %v11179_v3  ;;  %9683 = vtanh.f32 %v8640_v14  ;;  %v9527_v26 = vld [vmem:[#allocation3 + $0x7e0] ss:$16 sps:$4 sm:$0xff]  }
 0x2aa   : > { %v2758_v60 = vpop.f32.mrb[39].mxu1  ;;  %v9660_v31 = vpop.eup %9659  ;;  %v2978_v42 = vpack.c.bf16 %v9658_v55, %v9650_v34  ;;  %4025 = vmatpush1.bf16.msra.mxu0 %v9515_v28  ;;  %4411 = vmatpush1.bf16.msra.mxu1 %v9518_v17  ;;  %v8578_v1 = vadd.f32 %v2372_v32, %v11182_v13  ;;  %9685 = vtanh.f32 %v8577_v49 }
 0x2ab   : > { %v9662_v61 = vpop.eup %9661  ;;  %4026 = vmatprep.subr.bf16.mxu0 %v9523_v24  ;;  %4412 = vmatprep.subr.bf16.mxu1 %v9526_v57  ;;  %v11296_v30 = vpack.c.bf16 %v9660_v31, %v9652_v62  ;;  %v8642_v6 = vadd.f32 %v2758_v60, %v11185_v0  ;;  %9687 = vtanh.f32 %v8641_v7  ;;  %v2376_v22 = vpop.f32.mrb[40].mxu0 }
 0x2ac   : > { %v9664_v10 = vpop.eup %9663  ;;  %3907 = vmatprep.mubr.bf16.mxu0 %v2978_v42  ;;  %4293 = vmatprep.mubr.bf16.mxu1 %v2978_v42  ;;  %v2762_v21 = vpop.f32.mrb[40].mxu1  ;;  %9689 = vtanh.f32 %v8578_v1  ;;  %v8579_v62 = vadd.f32 %v2376_v22, %v11176_v48 }
 0x2ad   : > { %v9666_v4 = vpop.eup %9665  ;;  %3908 = vmatmul.mubr.bf16.gmra.mrb[92].mxu0 %v2977_v25  ;;  %4294 = vmatmul.mubr.bf16.gmra.mrb[92].mxu1 %v2977_v25  ;;  %v8643_v37 = vadd.f32 %v2762_v21, %v11179_v3  ;;  %v2378_v19 = vpop.f32.mrb[41].mxu0  ;;  %9691 = vtanh.f32 %v8642_v6 }
 0x2ae   : > { %v9668_v35 = vpop.eup %9667  ;;  %4027 = vmatpush1.bf16.msra.mxu0 %v9521_v8  ;;  %4413 = vmatpush1.bf16.msra.mxu1 %v9524_v15  ;;  %v2764_v28 = vpop.f32.mrb[41].mxu1  ;;  %v8580_v5 = vadd.f32 %v2378_v19, %v11182_v13  ;;  %9693 = vtanh.f32 %v8579_v62 }
 0x2af   : > { %v9670_v34 = vpop.eup %9669  ;;  %4028 = vmatprep.subr.bf16.mxu0 %v9529_v40  ;;  %4414 = vmatprep.subr.bf16.mxu1 %v9532_v45  ;;  %v8644_v63 = vadd.f32 %v2764_v28, %v11185_v0  ;;  %v2380_v33 = vpop.f32.mrb[42].mxu0  ;;  %9695 = vtanh.f32 %v8643_v37 }
 0x2b0   : > { %v9672_v17 = vpop.eup %9671  ;;  %v2766_v51 = vpop.f32.mrb[42].mxu1  ;;  %v2981_v59 = vpack.c.bf16 %v9670_v34, %v9662_v61  ;;  %v8581_v57 = vadd.f32 %v2380_v33, %v11176_v48  ;;  %9697 = vtanh.f32 %v8580_v5 }
 0x2b1   : > { %v9674_v24 = vpop.eup %9673  ;;  %v2382_v43 = vpop.f32.mrb[43].mxu0  ;;  %v11304_v14 = vpack.c.bf16 %v9672_v17, %v9664_v10  ;;  %v8645_v20 = vadd.f32 %v2766_v51, %v11179_v3  ;;  %9699 = vtanh.f32 %v8644_v63 }
 0x2b2   : > { %v2768_v36 = vpop.f32.mrb[43].mxu1  ;;  %v9676_v38 = vpop.eup %9675  ;;  %v2982_v25 = vpack.c.bf16 %v9674_v24, %v9666_v4  ;;  %4029 = vmatpush1.bf16.msra.mxu0 %v9527_v26  ;;  %4415 = vmatpush1.bf16.msra.mxu1 %v9530_v56  ;;  %v8582_v49 = vadd.f32 %v2382_v43, %v11182_v13  ;;  %9701 = vtanh.f32 %v8581_v57 }
 0x2b3   : > { %v9678_v55 = vpop.eup %9677  ;;  %v11308_v32 = vpack.c.bf16 %v9676_v38, %v9668_v35  ;;  %v8646_v31 = vadd.f32 %v2768_v36, %v11185_v0  ;;  %9703 = vtanh.f32 %v8645_v20  ;;  %v2386_v8 = vpop.f32.mrb[44].mxu0 }
 0x2b4   : > { %v9680_v60 = vpop.eup %9679  ;;  %3917 = vmatprep.mubr.bf16.mxu0 %v2982_v25  ;;  %4303 = vmatprep.mubr.bf16.mxu1 %v2982_v25  ;;  %v2772_v15 = vpop.f32.mrb[44].mxu1  ;;  %9705 = vtanh.f32 %v8582_v49  ;;  %v8583_v1 = vadd.f32 %v2386_v8, %v11176_v48 }
 0x2b5   : > { %v9682_v7 = vpop.eup %9681  ;;  %3918 = vmatmul.mubr.bf16.gmra.mrb[96].mxu0 %v2981_v59  ;;  %4304 = vmatmul.mubr.bf16.gmra.mrb[96].mxu1 %v2981_v59  ;;  %v8647_v40 = vadd.f32 %v2772_v15, %v11179_v3  ;;  %v2388_v45 = vpop.f32.mrb[45].mxu0  ;;  %9707 = vtanh.f32 %v8646_v31 }
 0x2b6   : > { %v9684_v42 = vpop.eup %9683  ;;  %v2774_v10 = vpop.f32.mrb[45].mxu1  ;;  %v8584_v4 = vadd.f32 %v2388_v45, %v11182_v13  ;;  %9709 = vtanh.f32 %v8583_v1 }
 0x2b7   : > { %v9686_v61 = vpop.eup %9685  ;;  %v8648_v35 = vadd.f32 %v2774_v10, %v11185_v0  ;;  %v2390_v22 = vpop.f32.mrb[46].mxu0  ;;  %9711 = vtanh.f32 %v8647_v40 }
 0x2b8   : > { %v9688_v6 = vpop.eup %9687  ;;  %v2776_v21 = vpop.f32.mrb[46].mxu1  ;;  %v2985_v26 = vpack.c.bf16 %v9686_v61, %v9678_v55  ;;  %v8585_v34 = vadd.f32 %v2390_v22, %v11176_v48  ;;  %9713 = vtanh.f32 %v8584_v4 }
 0x2b9   : > { %v9690_v56 = vpop.eup %9689  ;;  %v2392_v62 = vpop.f32.mrb[47].mxu0  ;;  %v11316_v19 = vpack.c.bf16 %v9688_v6, %v9680_v60  ;;  %v8649_v17 = vadd.f32 %v2776_v21, %v11179_v3  ;;  %9715 = vtanh.f32 %v8648_v35 }
 0x2ba   : > { %v2778_v37 = vpop.f32.mrb[47].mxu1  ;;  %v9692_v28 = vpop.eup %9691  ;;  %v2986_v5 = vpack.c.bf16 %v9690_v56, %v9682_v7  ;;  %v8586_v33 = vadd.f32 %v2392_v62, %v11182_v13  ;;  %9717 = vtanh.f32 %v8585_v34 }
 0x2bb   : > { %v9694_v63 = vpop.eup %9693  ;;  %v11320_v51 = vpack.c.bf16 %v9692_v28, %v9684_v42  ;;  %v8650_v24 = vadd.f32 %v2778_v37, %v11185_v0  ;;  %9719 = vtanh.f32 %v8649_v17  ;;  %v2396_v36 = vpop.f32.mrb[48].mxu0 }
 0x2bc   : > { %v9696_v59 = vpop.eup %9695  ;;  %3927 = vmatprep.mubr.bf16.mxu0 %v2986_v5  ;;  %4313 = vmatprep.mubr.bf16.mxu1 %v2986_v5  ;;  %v2782_v38 = vpop.f32.mrb[48].mxu1  ;;  %9721 = vtanh.f32 %v8586_v33  ;;  %v8587_v25 = vadd.f32 %v2396_v36, %v11176_v48 }
 0x2bd   : > { %v9698_v57 = vpop.eup %9697  ;;  %3928 = vmatmul.mubr.bf16.gmra.mrb[100].mxu0 %v2985_v26  ;;  %4314 = vmatmul.mubr.bf16.gmra.mrb[100].mxu1 %v2985_v26  ;;  %v8651_v55 = vadd.f32 %v2782_v38, %v11179_v3  ;;  %v2398_v49 = vpop.f32.mrb[49].mxu0  ;;  %9723 = vtanh.f32 %v8650_v24 }
 0x2be   : > { %v9700_v43 = vpop.eup %9699  ;;  %v2784_v60 = vpop.f32.mrb[49].mxu1  ;;  %v8588_v7 = vadd.f32 %v2398_v49, %v11182_v13  ;;  %9725 = vtanh.f32 %v8587_v25 }
 0x2bf   : > { %v9702_v20 = vpop.eup %9701  ;;  %v8652_v42 = vadd.f32 %v2784_v60, %v11185_v0  ;;  %v2400_v8 = vpop.f32.mrb[50].mxu0  ;;  %9727 = vtanh.f32 %v8651_v55 }
 0x2c0   : > { %v9704_v31 = vpop.eup %9703  ;;  %v2786_v15 = vpop.f32.mrb[50].mxu1  ;;  %v2989_v61 = vpack.c.bf16 %v9702_v20, %v9694_v63  ;;  %v8589_v40 = vadd.f32 %v2400_v8, %v11176_v48  ;;  %9729 = vtanh.f32 %v8588_v7 }
 0x2c1   : > { %v9706_v1 = vpop.eup %9705  ;;  %v2402_v45 = vpop.f32.mrb[51].mxu0  ;;  %v11328_v6 = vpack.c.bf16 %v9704_v31, %v9696_v59  ;;  %v8653_v35 = vadd.f32 %v2786_v15, %v11179_v3  ;;  %9731 = vtanh.f32 %v8652_v42 }
 0x2c2   : > { %v2788_v10 = vpop.f32.mrb[51].mxu1  ;;  %v9708_v4 = vpop.eup %9707  ;;  %v2990_v22 = vpack.c.bf16 %v9706_v1, %v9698_v57  ;;  %v8590_v26 = vadd.f32 %v2402_v45, %v11182_v13  ;;  %9733 = vtanh.f32 %v8589_v40 }
 0x2c3   : > { %v9710_v21 = vpop.eup %9709  ;;  %v11332_v56 = vpack.c.bf16 %v9708_v4, %v9700_v43  ;;  %v8654_v62 = vadd.f32 %v2788_v10, %v11185_v0  ;;  %9735 = vtanh.f32 %v8653_v35  ;;  %v2406_v17 = vpop.f32.mrb[52].mxu0 }
 0x2c4   : > { %v9712_v34 = vpop.eup %9711  ;;  %3937 = vmatprep.mubr.bf16.mxu0 %v2990_v22  ;;  %4323 = vmatprep.mubr.bf16.mxu1 %v2990_v22  ;;  %v2792_v5 = vpop.f32.mrb[52].mxu1  ;;  %9737 = vtanh.f32 %v8590_v26  ;;  %v8591_v33 = vadd.f32 %v2406_v17, %v11176_v48 }
 0x2c5   : > { %v9714_v37 = vpop.eup %9713  ;;  %3938 = vmatmul.mubr.bf16.gmra.mrb[104].mxu0 %v2989_v61  ;;  %4324 = vmatmul.mubr.bf16.gmra.mrb[104].mxu1 %v2989_v61  ;;  %v8655_v59 = vadd.f32 %v2792_v5, %v11179_v3  ;;  %v2408_v24 = vpop.f32.mrb[53].mxu0  ;;  %9739 = vtanh.f32 %v8654_v62 }
 0x2c6   : > { %v9716_v28 = vpop.eup %9715  ;;  %v2794_v57 = vpop.f32.mrb[53].mxu1  ;;  %v8592_v36 = vadd.f32 %v2408_v24, %v11182_v13  ;;  %9741 = vtanh.f32 %v8591_v33 }
 0x2c7   : > { %v9718_v63 = vpop.eup %9717  ;;  %v8656_v38 = vadd.f32 %v2794_v57, %v11185_v0  ;;  %v2410_v20 = vpop.f32.mrb[54].mxu0  ;;  %9743 = vtanh.f32 %v8655_v59 }
 0x2c8   : > { %v9720_v43 = vpop.eup %9719  ;;  %v2796_v25 = vpop.f32.mrb[54].mxu1  ;;  %v2993_v55 = vpack.c.bf16 %v9718_v63, %v9710_v21  ;;  %v8593_v60 = vadd.f32 %v2410_v20, %v11176_v48  ;;  %9745 = vtanh.f32 %v8592_v36 }
 0x2c9   : > { %v9722_v49 = vpop.eup %9721  ;;  %v2412_v31 = vpop.f32.mrb[55].mxu0  ;;  %v11340_v42 = vpack.c.bf16 %v9720_v43, %v9712_v34  ;;  %v8657_v15 = vadd.f32 %v2796_v25, %v11179_v3  ;;  %9747 = vtanh.f32 %v8656_v38 }
 0x2ca   : > { %v2798_v7 = vpop.f32.mrb[55].mxu1  ;;  %v9724_v8 = vpop.eup %9723  ;;  %v2994_v61 = vpack.c.bf16 %v9722_v49, %v9714_v37  ;;  %v8594_v40 = vadd.f32 %v2412_v31, %v11182_v13  ;;  %9749 = vtanh.f32 %v8593_v60 }
 0x2cb   : > { %v9726_v1 = vpop.eup %9725  ;;  %v11344_v45 = vpack.c.bf16 %v9724_v8, %v9716_v28  ;;  %v8658_v4 = vadd.f32 %v2798_v7, %v11185_v0  ;;  %9751 = vtanh.f32 %v8657_v15  ;;  %v2416_v21 = vpop.f32.mrb[56].mxu0 }
 0x2cc   : > { %v9728_v10 = vpop.eup %9727  ;;  %3947 = vmatprep.mubr.bf16.mxu0 %v2994_v61  ;;  %4333 = vmatprep.mubr.bf16.mxu1 %v2994_v61  ;;  %v2802_v26 = vpop.f32.mrb[56].mxu1  ;;  %9753 = vtanh.f32 %v8594_v40  ;;  %v8595_v62 = vadd.f32 %v2416_v21, %v11176_v48 }
 0x2cd   : > { %v9730_v35 = vpop.eup %9729  ;;  %3948 = vmatmul.mubr.bf16.gmra.mrb[108].mxu0 %v2993_v55  ;;  %4334 = vmatmul.mubr.bf16.gmra.mrb[108].mxu1 %v2993_v55  ;;  %v8659_v37 = vadd.f32 %v2802_v26, %v11179_v3  ;;  %v2418_v28 = vpop.f32.mrb[57].mxu0  ;;  %9755 = vtanh.f32 %v8658_v4 }
 0x2ce   : > { %v9732_v22 = vpop.eup %9731  ;;  %v2804_v17 = vpop.f32.mrb[57].mxu1  ;;  %v8596_v63 = vadd.f32 %v2418_v28, %v11182_v13  ;;  %9757 = vtanh.f32 %v8595_v62 }
 0x2cf   : > { %v9734_v34 = vpop.eup %9733  ;;  %v8660_v33 = vadd.f32 %v2804_v17, %v11185_v0  ;;  %v2420_v59 = vpop.f32.mrb[58].mxu0  ;;  %9759 = vtanh.f32 %v8659_v37 }
 0x2d0   : > { %v9736_v5 = vpop.eup %9735  ;;  %v2806_v24 = vpop.f32.mrb[58].mxu1  ;;  %v2997_v57 = vpack.c.bf16 %v9734_v34, %v9726_v1  ;;  %v8597_v36 = vadd.f32 %v2420_v59, %v11176_v48  ;;  %9761 = vtanh.f32 %v8596_v63 }
 0x2d1   : > { %v9738_v43 = vpop.eup %9737  ;;  %v2422_v38 = vpop.f32.mrb[59].mxu0  ;;  %v11352_v25 = vpack.c.bf16 %v9736_v5, %v9728_v10  ;;  %v8661_v49 = vadd.f32 %v2806_v24, %v11179_v3  ;;  %9763 = vtanh.f32 %v8660_v33 }
 0x2d2   : > { %v2808_v20 = vpop.f32.mrb[59].mxu1  ;;  %v9740_v55 = vpop.eup %9739  ;;  %v2998_v60 = vpack.c.bf16 %v9738_v43, %v9730_v35  ;;  %v8598_v7 = vadd.f32 %v2422_v38, %v11182_v13  ;;  %9765 = vtanh.f32 %v8597_v36 }
 0x2d3   : > { %v9742_v31 = vpop.eup %9741  ;;  %v11356_v8 = vpack.c.bf16 %v9740_v55, %v9732_v22  ;;  %v8662_v61 = vadd.f32 %v2808_v20, %v11185_v0  ;;  %9767 = vtanh.f32 %v8661_v49  ;;  %v2426_v10 = vpop.f32.mrb[60].mxu0 }
 0x2d4   : > { %v9744_v15 = vpop.eup %9743  ;;  %3957 = vmatprep.mubr.bf16.mxu0 %v2998_v60  ;;  %4343 = vmatprep.mubr.bf16.mxu1 %v2998_v60  ;;  %v2812_v4 = vpop.f32.mrb[60].mxu1  ;;  %9769 = vtanh.f32 %v8598_v7  ;;  %v8599_v21 = vadd.f32 %v2426_v10, %v11176_v48 }
 0x2d5   : > { %v9746_v1 = vpop.eup %9745  ;;  %3958 = vmatmul.mubr.bf16.gmra.mrb[112].mxu0 %v2997_v57  ;;  %4344 = vmatmul.mubr.bf16.gmra.mrb[112].mxu1 %v2997_v57  ;;  %v8663_v22 = vadd.f32 %v2812_v4, %v11179_v3  ;;  %v2428_v26 = vpop.f32.mrb[61].mxu0  ;;  %9771 = vtanh.f32 %v8662_v61 }
 0x2d6   : > { %v9748_v40 = vpop.eup %9747  ;;  %v2814_v34 = vpop.f32.mrb[61].mxu1  ;;  %v8600_v37 = vadd.f32 %v2428_v26, %v11182_v13  ;;  %9773 = vtanh.f32 %v8599_v21 }
 0x2d7   : > { %v9750_v35 = vpop.eup %9749  ;;  %v8664_v28 = vadd.f32 %v2814_v34, %v11185_v0  ;;  %v2430_v17 = vpop.f32.mrb[62].mxu0  ;;  %9775 = vtanh.f32 %v8663_v22 }
 0x2d8   : > { %v9752_v62 = vpop.eup %9751  ;;  %v2816_v5 = vpop.f32.mrb[62].mxu1  ;;  %v3001_v63 = vpack.c.bf16 %v9750_v35, %v9742_v31  ;;  %v8601_v59 = vadd.f32 %v2430_v17, %v11176_v48  ;;  %9777 = vtanh.f32 %v8600_v37 }
 0x2d9   : > { %v9754_v33 = vpop.eup %9753  ;;  %v2432_v24 = vpop.f32.mrb[63].mxu0  ;;  %v11364_v43 = vpack.c.bf16 %v9752_v62, %v9744_v15  ;;  %v8665_v38 = vadd.f32 %v2816_v5, %v11179_v3  ;;  %9779 = vtanh.f32 %v8664_v28 }
 0x2da   : > { %v2818_v57 = vpop.f32.mrb[63].mxu1  ;;  %v9756_v36 = vpop.eup %9755  ;;  %v3002_v20 = vpack.c.bf16 %v9754_v33, %v9746_v1  ;;  %v8602_v49 = vadd.f32 %v2432_v24, %v11182_v13  ;;  %9781 = vtanh.f32 %v8601_v59  ;;  %v5207_v59 = vld [vmem:[#allocation2] sm:$0x1] }
 0x2db   : > { %v9758_v55 = vpop.eup %9757  ;;  %v11368_v60 = vpack.c.bf16 %v9756_v36, %v9748_v40  ;;  %v8666_v7 = vadd.f32 %v2818_v57, %v11185_v0  ;;  %9783 = vtanh.f32 %v8665_v38  ;;  %5210 = vperm.xlu1 %9147, %v5207_v59  }
 0x2dc   : > { %v9760_v31 = vpop.eup %9759  ;;  %3967 = vmatprep.mubr.bf16.mxu0 %v3002_v20  ;;  %4353 = vmatprep.mubr.bf16.mxu1 %v3002_v20  ;;  %9785 = vtanh.f32 %v8602_v49 }
 0x2dd   : > { %v9762_v48 = vpop.eup %9761  ;;  %3968 = vmatmul.mubr.bf16.gmra.mrb[116].mxu0 %v3001_v63  ;;  %4354 = vmatmul.mubr.bf16.gmra.mrb[116].mxu1 %v3001_v63  ;;  %9787 = vtanh.f32 %v8666_v7 }
 0x2de   : > { %v9764_v15 = vpop.eup %9763 }
 0x2df   : > { %v9766_v3 = vpop.eup %9765 }
 0x2e0   : > { %v9768_v61 = vpop.eup %9767  ;;  %v3005_v1 = vpack.c.bf16 %v9766_v3, %v9758_v55 }
 0x2e1   : > { %v9770_v13 = vpop.eup %9769  ;;  %v11371_v40 = vpack.c.bf16 %v9768_v61, %v9760_v31 }
 0x2e2   : > { %v9772_v10 = vpop.eup %9771  ;;  %v3006_v4 = vpack.c.bf16 %v9770_v13, %v9762_v48  ;;  %v4897_v48 = vld [vmem:[%s13009_s5] sm:$0xf] }
 0x2e3   : > { %v9774_v35 = vpop.eup %9773  ;;  %v11373_v0 = vpack.c.bf16 %v9772_v10, %v9764_v15  ;;  %v11478_v10 = vrot.slane %v4897_v48, %v13154_v11 }
 0x2e4   : > { %v9776_v21 = vpop.eup %9775  ;;  %3977 = vmatprep.mubr.bf16.mxu0 %v3006_v4  ;;  %4363 = vmatprep.mubr.bf16.mxu1 %v3006_v4  ;;  %v11481_v4 = vrot.slane %v4897_v48, %v13156_v46 }
 0x2e5   : > { %v9778_v22 = vpop.eup %9777  ;;  %3978 = vmatmul.mubr.bf16.gmra.mrb[120].mxu0 %v3005_v1  ;;  %4364 = vmatmul.mubr.bf16.gmra.mrb[120].mxu1 %v3005_v1 }
 0x2e6   : > { %v9780_v26 = vpop.eup %9779 }
 0x2e7   : > { %v9782_v34 = vpop.eup %9781 }
 0x2e8   : > { %v9784_v62 = vpop.eup %9783  ;;  %v3009_v37 = vpack.c.bf16 %v9782_v34, %v9774_v35  ;;  %v11484_v35 = vrot.slane %v4897_v48, %v13155_v54 }
 0x2e9   : > { %v9786_v28 = vpop.eup %9785  ;;  %v11375_v17 = vpack.c.bf16 %v9784_v62, %v9776_v21  ;;  %v11489_v62 = vrot.slane %v4897_v48, %v13157_v39 }
 0x2ea   : > { %v9788_v5 = vpop.eup %9787  ;;  %v3010_v63 = vpack.c.bf16 %v9786_v28, %v9778_v22 }
 0x2eb   : > { %v11377_v33 = vpack.c.bf16 %v9788_v5, %v9780_v26 }
 0x2ec   : > { %3987 = vmatprep.mubr.bf16.mxu0 %v3010_v63  ;;  %4373 = vmatprep.mubr.bf16.mxu1 %v3010_v63 }
 0x2ed   : > { %3988 = vmatmul.mubr.bf16.gmra.mrb[124].mxu0 %v3009_v37  ;;  %4374 = vmatmul.mubr.bf16.gmra.mrb[124].mxu1 %v3009_v37 }
 0x2ee   : > { %4030 = vmatprep.mubr.bf16.mxu0 %v11212_v44  ;;  %4416 = vmatprep.mubr.bf16.mxu1 %v11212_v44 }
 0x2f5   : > { %4031 = vmatmul.mubr.bf16.vlgmr.msra.gmra.mrb[64].mxu0 %v11208_v58  ;;  %4417 = vmatmul.mubr.bf16.vlgmr.msra.gmra.mrb[64].mxu1 %v11208_v58  ;;  %v8404_v58 = vld [vmem:[%s13008_s4 + $0x4] sm:$0xf] }
 0x2f6   : > { %4040 = vmatprep.mubr.bf16.mxu0 %v11224_v41  ;;  %4426 = vmatprep.mubr.bf16.mxu1 %v11224_v41  ;;  %v11447_v44 = vrot.slane %v8404_v58, %v13154_v11  ;;  %v11453_v41 = vrot.slane %v8404_v58, %v13156_v46 }
 0x2fd   : > { %4041 = vmatmul.mubr.bf16.gmra.mrb[68].mxu0 %v11220_v47  ;;  %4427 = vmatmul.mubr.bf16.gmra.mrb[68].mxu1 %v11220_v47  ;;  %v11450_v47 = vrot.slane %v8404_v58, %v13155_v54 }
 0x2fe   : > { %4050 = vmatprep.mubr.bf16.mxu0 %v11236_v50  ;;  %4436 = vmatprep.mubr.bf16.mxu1 %v11236_v50 }
 0x305   : > { %4051 = vmatmul.mubr.bf16.gmra.mrb[72].mxu0 %v11232_v27  ;;  %4437 = vmatmul.mubr.bf16.gmra.mrb[72].mxu1 %v11232_v27  ;;  %v11456_v27 = vrot.slane %v8404_v58, %v13157_v39 }
 0x306   : > { %4060 = vmatprep.mubr.bf16.mxu0 %v11248_v53  ;;  %4446 = vmatprep.mubr.bf16.mxu1 %v11248_v53 }
 0x30d   : > { %4061 = vmatmul.mubr.bf16.gmra.mrb[76].mxu0 %v11244_v16  ;;  %4447 = vmatmul.mubr.bf16.gmra.mrb[76].mxu1 %v11244_v16 }
 0x30e   : > { %4070 = vmatprep.mubr.bf16.mxu0 %v11260_v29  ;;  %4456 = vmatprep.mubr.bf16.mxu1 %v11260_v29 }
 0x315   : > { %4071 = vmatmul.mubr.bf16.gmra.mrb[80].mxu0 %v11256_v18  ;;  %4457 = vmatmul.mubr.bf16.gmra.mrb[80].mxu1 %v11256_v18 }
 0x316   : > { %4080 = vmatprep.mubr.bf16.mxu0 %v11272_v23  ;;  %4466 = vmatprep.mubr.bf16.mxu1 %v11272_v23 }
 0x31d   : > { %4081 = vmatmul.mubr.bf16.gmra.mrb[84].mxu0 %v11268_v9  ;;  %4467 = vmatmul.mubr.bf16.gmra.mrb[84].mxu1 %v11268_v9 }
 0x31e   : > { %4090 = vmatprep.mubr.bf16.mxu0 %v11284_v12  ;;  %4476 = vmatprep.mubr.bf16.mxu1 %v11284_v12 }
 0x325   : > { %4091 = vmatmul.mubr.bf16.gmra.mrb[88].mxu0 %v11280_v52  ;;  %4477 = vmatmul.mubr.bf16.gmra.mrb[88].mxu1 %v11280_v52 }
 0x326   : > { %4100 = vmatprep.mubr.bf16.mxu0 %v11296_v30  ;;  %4486 = vmatprep.mubr.bf16.mxu1 %v11296_v30 }
 0x32d   : > { %4101 = vmatmul.mubr.bf16.gmra.mrb[92].mxu0 %v11292_v2  ;;  %4487 = vmatmul.mubr.bf16.gmra.mrb[92].mxu1 %v11292_v2 }
 0x32e   : > { %4110 = vmatprep.mubr.bf16.mxu0 %v11308_v32  ;;  %4496 = vmatprep.mubr.bf16.mxu1 %v11308_v32 }
 0x335   : > { %4111 = vmatmul.mubr.bf16.gmra.mrb[96].mxu0 %v11304_v14  ;;  %4497 = vmatmul.mubr.bf16.gmra.mrb[96].mxu1 %v11304_v14 }
 0x336   : > { %4120 = vmatprep.mubr.bf16.mxu0 %v11320_v51  ;;  %4506 = vmatprep.mubr.bf16.mxu1 %v11320_v51 }
 0x33d   : > { %4121 = vmatmul.mubr.bf16.gmra.mrb[100].mxu0 %v11316_v19  ;;  %4507 = vmatmul.mubr.bf16.gmra.mrb[100].mxu1 %v11316_v19 }
 0x33e   : > { %4130 = vmatprep.mubr.bf16.mxu0 %v11332_v56  ;;  %4516 = vmatprep.mubr.bf16.mxu1 %v11332_v56 }
 0x345   : > { %4131 = vmatmul.mubr.bf16.gmra.mrb[104].mxu0 %v11328_v6  ;;  %4517 = vmatmul.mubr.bf16.gmra.mrb[104].mxu1 %v11328_v6 }
 0x346   : > { %4140 = vmatprep.mubr.bf16.mxu0 %v11344_v45  ;;  %4526 = vmatprep.mubr.bf16.mxu1 %v11344_v45 }
 0x34d   : > { %4141 = vmatmul.mubr.bf16.gmra.mrb[108].mxu0 %v11340_v42  ;;  %4527 = vmatmul.mubr.bf16.gmra.mrb[108].mxu1 %v11340_v42 }
 0x34e   : > { %4150 = vmatprep.mubr.bf16.mxu0 %v11356_v8  ;;  %4536 = vmatprep.mubr.bf16.mxu1 %v11356_v8 }
 0x355   : > { %4151 = vmatmul.mubr.bf16.gmra.mrb[112].mxu0 %v11352_v25  ;;  %4537 = vmatmul.mubr.bf16.gmra.mrb[112].mxu1 %v11352_v25 }
 0x356   : > { %4160 = vmatprep.mubr.bf16.mxu0 %v11368_v60  ;;  %4546 = vmatprep.mubr.bf16.mxu1 %v11368_v60 }
 0x35d   : > { %4161 = vmatmul.mubr.bf16.gmra.mrb[116].mxu0 %v11364_v43  ;;  %4547 = vmatmul.mubr.bf16.gmra.mrb[116].mxu1 %v11364_v43 }
 0x35e   : > { %4170 = vmatprep.mubr.bf16.mxu0 %v11373_v0  ;;  %4556 = vmatprep.mubr.bf16.mxu1 %v11373_v0 }
 0x365   : > { %4171 = vmatmul.mubr.bf16.gmra.mrb[120].mxu0 %v11371_v40  ;;  %4557 = vmatmul.mubr.bf16.gmra.mrb[120].mxu1 %v11371_v40 }
 0x366   : > { %4180 = vmatprep.mubr.bf16.mxu0 %v11377_v33  ;;  %4566 = vmatprep.mubr.bf16.mxu1 %v11377_v33 }
 0x36d   : > { %4181 = vmatmul.mubr.bf16.gmra.mrb[124].mxu0 %v11375_v17  ;;  %4567 = vmatmul.mubr.bf16.gmra.mrb[124].mxu1 %v11375_v17 }
 0x3c8   : > { %v4032_v50 = vpop.f32.mrb[64].mxu0  ;;  %v4418_v16 = vpop.f32.mrb[64].mxu1 }
 0x3c9   : > { %v8667_v53 = vadd.f32 %v4032_v50, %v11447_v44  ;;  %v8731_v18 = vadd.f32 %v4418_v16, %v11450_v47  ;;  %v4034_v29 = vpop.f32.mrb[65].mxu0  ;;  %v4420_v9 = vpop.f32.mrb[65].mxu1 }
 0x3ca   : > { %v8668_v23 = vadd.f32 %v4034_v29, %v11453_v41  ;;  %v8732_v52 = vadd.f32 %v4420_v9, %v11456_v27  ;;  %v4036_v12 = vpop.f32.mrb[66].mxu0  ;;  %v4422_v2 = vpop.f32.mrb[66].mxu1 }
 0x3cb   : > { %9789 = vtanh.f32 %v8667_v53  ;;  %v8669_v30 = vadd.f32 %v4036_v12, %v11447_v44  ;;  %v4038_v14 = vpop.f32.mrb[67].mxu0  ;;  %v4424_v32 = vpop.f32.mrb[67].mxu1  ;;  %v8733_v19 = vadd.f32 %v4422_v2, %v11450_v47 }
 0x3cc   : > { %9791 = vtanh.f32 %v8731_v18  ;;  %v8670_v51 = vadd.f32 %v4038_v14, %v11453_v41  ;;  %v8734_v6 = vadd.f32 %v4424_v32, %v11456_v27 }
 0x3cd   : > { %9793 = vtanh.f32 %v8668_v23 }
 0x3ce   : > { %9795 = vtanh.f32 %v8732_v52 }
 0x3cf   : > { %9797 = vtanh.f32 %v8669_v30 }
 0x3d0   : > { %9799 = vtanh.f32 %v8733_v19  ;;  %v4042_v56 = vpop.f32.mrb[68].mxu0  ;;  %v4428_v42 = vpop.f32.mrb[68].mxu1 }
 0x3d1   : > { %9801 = vtanh.f32 %v8670_v51  ;;  %v8671_v45 = vadd.f32 %v4042_v56, %v11447_v44  ;;  %v8735_v25 = vadd.f32 %v4428_v42, %v11450_v47  ;;  %v4044_v8 = vpop.f32.mrb[69].mxu0  ;;  %v4430_v24 = vpop.f32.mrb[69].mxu1 }
 0x3d2   : > { %9803 = vtanh.f32 %v8734_v6  ;;  %v8672_v57 = vadd.f32 %v4044_v8, %v11453_v41  ;;  %v8736_v43 = vadd.f32 %v4430_v24, %v11456_v27  ;;  %v4046_v36 = vpop.f32.mrb[70].mxu0  ;;  %v4432_v38 = vpop.f32.mrb[70].mxu1 }
 0x3d3   : > { %9805 = vtanh.f32 %v8671_v45  ;;  %v8673_v20 = vadd.f32 %v4046_v36, %v11447_v44  ;;  %v4048_v55 = vpop.f32.mrb[71].mxu0  ;;  %v4434_v49 = vpop.f32.mrb[71].mxu1  ;;  %v8737_v60 = vadd.f32 %v4432_v38, %v11450_v47 }
 0x3d4   : > { %9807 = vtanh.f32 %v8735_v25  ;;  %v8674_v7 = vadd.f32 %v4048_v55, %v11453_v41  ;;  %v8738_v3 = vadd.f32 %v4434_v49, %v11456_v27 }
 0x3d5   : > { %v9790_v31 = vpop.eup %9789  ;;  %9809 = vtanh.f32 %v8672_v57 }
 0x3d6   : > { %v9792_v15 = vpop.eup %9791  ;;  %9811 = vtanh.f32 %v8736_v43 }
 0x3d7   : > { %v9794_v61 = vpop.eup %9793  ;;  %9813 = vtanh.f32 %v8673_v20 }
 0x3d8   : > { %v9796_v1 = vpop.eup %9795  ;;  %9815 = vtanh.f32 %v8737_v60  ;;  %v4052_v13 = vpop.f32.mrb[72].mxu0 }
 0x3d9   : > { %v4438_v40 = vpop.f32.mrb[72].mxu1  ;;  %v9798_v0 = vpop.eup %9797  ;;  %9817 = vtanh.f32 %v8674_v7  ;;  %v8675_v21 = vadd.f32 %v4052_v13, %v11447_v44 }
 0x3da   : > { %v8739_v22 = vadd.f32 %v4438_v40, %v11450_v47  ;;  %v4054_v26 = vpop.f32.mrb[73].mxu0  ;;  %v4440_v34 = vpop.f32.mrb[73].mxu1  ;;  %9819 = vtanh.f32 %v8738_v3  ;;  %v4705_v33 = vpack.c.bf16 %v9798_v0, %v9790_v31 }
 0x3db   : > { %v9800_v37 = vpop.eup %9799  ;;  %v8676_v28 = vadd.f32 %v4054_v26, %v11453_v41  ;;  %v8740_v17 = vadd.f32 %v4440_v34, %v11456_v27  ;;  %v4056_v5 = vpop.f32.mrb[74].mxu0  ;;  %9821 = vtanh.f32 %v8675_v21 }
 0x3dc   : > { %v4442_v63 = vpop.f32.mrb[74].mxu1  ;;  %v9802_v59 = vpop.eup %9801  ;;  %v8677_v58 = vadd.f32 %v4056_v5, %v11447_v44  ;;  %v4707_v18 = vpack.c.bf16 %v9800_v37, %v9792_v15  ;;  %9823 = vtanh.f32 %v8739_v22  ;;  %v4773_v30 = vunpack.c.h.bf16 %v4705_v33 }
 0x3dd   : > { %v8741_v50 = vadd.f32 %v4442_v63, %v11450_v47  ;;  %v4058_v16 = vpop.f32.mrb[75].mxu0  ;;  %v4444_v53 = vpop.f32.mrb[75].mxu1  ;;  %v4706_v52 = vpack.c.bf16 %v9802_v59, %v9794_v61  ;;  %9825 = vtanh.f32 %v8676_v28  ;;  %v4769_v51 = vunpack.c.l.bf16 %v4705_v33 }
 0x3de   : > { %v9804_v29 = vpop.eup %9803  ;;  %v8678_v9 = vadd.f32 %v4058_v16, %v11453_v41  ;;  %v8742_v23 = vadd.f32 %v4444_v53, %v11456_v27  ;;  %v4775_v14 = vunpack.c.h.bf16 %v4707_v18  ;;  %9827 = vtanh.f32 %v8740_v17 }
 0x3df   : > { %v9806_v12 = vpop.eup %9805  ;;  %v4708_v2 = vpack.c.bf16 %v9804_v29, %v9796_v1  ;;  %v4774_v19 = vunpack.c.h.bf16 %v4706_v52  ;;  %v4770_v6 = vunpack.c.l.bf16 %v4706_v52  ;;  %9829 = vtanh.f32 %v8677_v58 }
 0x3e0   : > { %v9808_v32 = vpop.eup %9807  ;;  %v4923_v45 = vmul.f32 %v11478_v10, %v4773_v30  ;;  %v4925_v25 = vmul.f32 %v11484_v35, %v4775_v14  ;;  %9831 = vtanh.f32 %v8741_v50  ;;  %v4062_v24 = vpop.f32.mrb[76].mxu0  ;;  %v4771_v36 = vunpack.c.l.bf16 %v4707_v18 }
 0x3e1   : > { %v9810_v56 = vpop.eup %9809  ;;  %v4776_v42 = vunpack.c.h.bf16 %v4708_v2  ;;  %v4448_v57 = vpop.f32.mrb[76].mxu1  ;;  %v4924_v43 = vmul.f32 %v11481_v4, %v4774_v19  ;;  %v4772_v38 = vunpack.c.l.bf16 %v4708_v2  ;;  %9833 = vtanh.f32 %v8678_v9 }
 0x3e2   : > { %v9812_v8 = vpop.eup %9811  ;;  %v8679_v55 = vadd.f32 %v4062_v24, %v11447_v44  ;;  %v8743_v49 = vadd.f32 %v4448_v57, %v11450_v47  ;;  %v4064_v60 = vpop.f32.mrb[77].mxu0  ;;  %9835 = vtanh.f32 %v8742_v23  ;;  %v4919_v34 = vmul.f32 %v11478_v10, %v4769_v51 }
 0x3e3   : > { %v9814_v20 = vpop.eup %9813  ;;  %v4450_v31 = vpop.f32.mrb[77].mxu1  ;;  %v4926_v7 = vmul.f32 %v11489_v62, %v4776_v42  ;;  %v8680_v15 = vadd.f32 %v4064_v60, %v11453_v41  ;;  %v5052_v13 = vadd.f32 %v4924_v43, %v4923_v45  ;;  %v4920_v33 = vmul.f32 %v11481_v4, %v4770_v6 }
 0x3e4   : > { %v9816_v48 = vpop.eup %9815  ;;  %v8744_v3 = vadd.f32 %v4450_v31, %v11456_v27  ;;  %v4066_v61 = vpop.f32.mrb[78].mxu0  ;;  %9837 = vtanh.f32 %v8679_v55  ;;  %v4921_v59 = vmul.f32 %v11484_v35, %v4771_v36  ;;  %v4922_v58 = vmul.f32 %v11489_v62, %v4772_v38 }
 0x3e5   : > { %v4452_v1 = vpop.f32.mrb[78].mxu1  ;;  %v9818_v40 = vpop.eup %9817  ;;  %v8681_v0 = vadd.f32 %v4066_v61, %v11447_v44  ;;  %9839 = vtanh.f32 %v8743_v49  ;;  %v5053_v5 = vadd.f32 %v5052_v13, %v4925_v25  ;;  %v4709_v53 = vpack.c.bf16 %v9814_v20, %v9806_v12 }
 0x3e6   : > { %v8745_v21 = vadd.f32 %v4452_v1, %v11450_v47  ;;  %v4068_v22 = vpop.f32.mrb[79].mxu0  ;;  %v4454_v26 = vpop.f32.mrb[79].mxu1  ;;  %9841 = vtanh.f32 %v8680_v15  ;;  %v4710_v18 = vpack.c.bf16 %v9818_v40, %v9810_v56  ;;  %v5047_v9 = vadd.f32 %v4920_v33, %v4919_v34 }
 0x3e7   : > { %v9820_v37 = vpop.eup %9819  ;;  %v8682_v28 = vadd.f32 %v4068_v22, %v11453_v41  ;;  %v8746_v17 = vadd.f32 %v4454_v26, %v11456_v27  ;;  %9843 = vtanh.f32 %v8744_v3  ;;  %v5054_v16 = vadd.f32 %v5053_v5, %v4926_v7 }
 0x3e8   : > { %v11510_v63 = vpop.eup %9821  ;;  %9845 = vtanh.f32 %v8681_v0  ;;  %v4711_v23 = vpack.c.bf16 %v9816_v48, %v9808_v32  ;;  %v4712_v52 = vpack.c.bf16 %v9820_v37, %v9812_v8  ;;  %v4072_v30 = vpop.f32.mrb[80].mxu0  ;;  %v4777_v19 = vunpack.c.l.bf16 %v4709_v53 }
 0x3e9   : > { %v11515_v50 = vpop.eup %9823  ;;  %9847 = vtanh.f32 %v8745_v21  ;;  %5055 = vadd.xlane.f32.xlu0 %v5054_v16  ;;  %v4458_v14 = vpop.f32.mrb[80].mxu1  ;;  %v4778_v51 = vunpack.c.l.bf16 %v4710_v18  ;;  %v4781_v6 = vunpack.c.h.bf16 %v4709_v53  ;;  %v5048_v45 = vadd.f32 %v5047_v9, %v4921_v59 }
 0x3ea   : > { %v11517_v29 = vpop.eup %9825  ;;  %9849 = vtanh.f32 %v8682_v28  ;;  %v8683_v12 = vadd.f32 %v4072_v30, %v11447_v44  ;;  %v8747_v56 = vadd.f32 %v4458_v14, %v11450_v47  ;;  %v4074_v25 = vpop.f32.mrb[81].mxu0  ;;  %v4779_v38 = vunpack.c.l.bf16 %v4711_v23 }
 0x3eb   : > { %v11519_v2 = vpop.eup %9827  ;;  %v4460_v24 = vpop.f32.mrb[81].mxu1  ;;  %9851 = vtanh.f32 %v8746_v17  ;;  %v8684_v8 = vadd.f32 %v4074_v25, %v11453_v41  ;;  %v5049_v55 = vadd.f32 %v5048_v45, %v4922_v58  ;;  %v4780_v61 = vunpack.c.l.bf16 %v4712_v52 }
 0x3ec   : > { %v9830_v42 = vpop.eup %9829  ;;  %v8748_v57 = vadd.f32 %v4460_v24, %v11456_v27  ;;  %v4076_v43 = vpop.f32.mrb[82].mxu0  ;;  %9853 = vtanh.f32 %v8683_v12  ;;  %v4927_v13 = vmul.f32 %v11478_v10, %v4777_v19  ;;  %v4928_v40 = vmul.f32 %v11481_v4, %v4778_v51 }
 0x3ed   : > { %v11523_v32 = vpop.eup %9831  ;;  %v4462_v36 = vpop.f32.mrb[82].mxu1  ;;  %v8685_v49 = vadd.f32 %v4076_v43, %v11447_v44  ;;  %9855 = vtanh.f32 %v8747_v56  ;;  %5050 = vadd.xlane.f32.xlu1 %v5049_v55  ;;  %v4929_v0 = vmul.f32 %v11484_v35, %v4779_v38  ;;  %v4930_v22 = vmul.f32 %v11489_v62, %v4780_v61 }
 0x3ee   : > { %v11527_v20 = vpop.eup %9833  ;;  %v8749_v60 = vadd.f32 %v4462_v36, %v11450_v47  ;;  %v4078_v31 = vpop.f32.mrb[83].mxu0  ;;  %9857 = vtanh.f32 %v8684_v8  ;;  %v4782_v26 = vunpack.c.h.bf16 %v4710_v18  ;;  %v4783_v34 = vunpack.c.h.bf16 %v4711_v23 }
 0x3ef   : > { %v4464_v7 = vpop.f32.mrb[83].mxu1  ;;  %v11531_v48 = vpop.eup %9835  ;;  %v8686_v15 = vadd.f32 %v4078_v31, %v11453_v41  ;;  %9859 = vtanh.f32 %v8748_v57  ;;  %v5057_v28 = vadd.f32 %v4928_v40, %v4927_v13  ;;  %v4784_v17 = vunpack.c.h.bf16 %v4712_v52 }
 0x3f0   : > { %v8750_v3 = vadd.f32 %v4464_v7, %v11456_v27  ;;  %v11535_v1 = vpop.eup %9837  ;;  %9861 = vtanh.f32 %v8685_v49  ;;  %v4931_v5 = vmul.f32 %v11478_v10, %v4781_v6  ;;  %v4932_v59 = vmul.f32 %v11481_v4, %v4782_v26  ;;  %v4082_v16 = vpop.f32.mrb[84].mxu0 }
 0x3f1   : > { %v11540_v21 = vpop.eup %9839  ;;  %9863 = vtanh.f32 %v8749_v60  ;;  %v4933_v58 = vmul.f32 %v11484_v35, %v4783_v34  ;;  %v4468_v53 = vpop.f32.mrb[84].mxu1  ;;  %v11551_v9 = vpack.c.bf16 %v9830_v42, %v11510_v63  ;;  %v5058_v23 = vadd.f32 %v5057_v28, %v4929_v0 }
 0x3f2   : > { %v11543_v37 = vpop.eup %9841  ;;  %9865 = vtanh.f32 %v8686_v15  ;;  %v4934_v52 = vmul.f32 %v11489_v62, %v4784_v17  ;;  %v8687_v30 = vadd.f32 %v4082_v16, %v11447_v44  ;;  %v4084_v14 = vpop.f32.mrb[85].mxu0  ;;  %v5062_v6 = vadd.f32 %v4932_v59, %v4931_v5 }
 0x3f3   : > { %v11546_v33 = vpop.eup %9843  ;;  %v4470_v19 = vpop.f32.mrb[85].mxu1  ;;  %9867 = vtanh.f32 %v8750_v3  ;;  %v8751_v45 = vadd.f32 %v4468_v53, %v11450_v47  ;;  %v8688_v12 = vadd.f32 %v4084_v14, %v11453_v41  ;;  %v5059_v25 = vadd.f32 %v5058_v23, %v4930_v22 }
 0x3f4   : > { %v11553_v18 = vpop.eup %9845  ;;  %v4086_v63 = vpop.f32.mrb[86].mxu0  ;;  %9869 = vtanh.f32 %v8687_v30  ;;  %v8752_v24 = vadd.f32 %v4470_v19, %v11456_v27  ;;  %v5063_v38 = vadd.f32 %v5062_v6, %v4933_v58  ;;  %v4714_v7 = vpack.c.bf16 %v11527_v20, %v11517_v29 }
 0x3f5   : > { %v11557_v51 = vpop.eup %9847  ;;  %v4472_v42 = vpop.f32.mrb[86].mxu1  ;;  %v8689_v8 = vadd.f32 %v4086_v63, %v11447_v44  ;;  %9871 = vtanh.f32 %v8751_v45  ;;  %5060 = vadd.xlane.f32.xlu0 %v5059_v25  ;;  %v4715_v15 = vpack.c.bf16 %v11523_v32, %v11515_v50  ;;  %v4716_v13 = vpack.c.bf16 %v11531_v48, %v11519_v2 }
 0x3f6   : > { %v11561_v56 = vpop.eup %9849  ;;  %v4088_v57 = vpop.f32.mrb[87].mxu0  ;;  %v8753_v55 = vadd.f32 %v4472_v42, %v11450_v47  ;;  %9873 = vtanh.f32 %v8688_v12  ;;  %v5064_v61 = vadd.f32 %v5063_v38, %v4934_v52  ;;  %v4785_v40 = vunpack.c.l.bf16 %v11551_v9 }
 0x3f7   : > { %v4474_v43 = vpop.f32.mrb[87].mxu1  ;;  %v11565_v36 = vpop.eup %9851  ;;  %v8690_v49 = vadd.f32 %v4088_v57, %v11453_v41  ;;  %9875 = vtanh.f32 %v8752_v24  ;;  %v4786_v22 = vunpack.c.l.bf16 %v4714_v7  ;;  %v4787_v26 = vunpack.c.l.bf16 %v4715_v15 }
 0x3f8   : > { %v11569_v60 = vpop.eup %9853  ;;  %v8754_v31 = vadd.f32 %v4474_v43, %v11456_v27  ;;  %9877 = vtanh.f32 %v8689_v8  ;;  %v4789_v34 = vunpack.c.h.bf16 %v11551_v9  ;;  %5065 = vadd.xlane.f32.xlu1 %v5064_v61  ;;  %v4788_v50 = vunpack.c.l.bf16 %v4716_v13  ;;  %v4092_v28 = vpop.f32.mrb[88].mxu0 }
 0x3f9   : > { %v11576_v3 = vpop.eup %9855  ;;  %9879 = vtanh.f32 %v8753_v55  ;;  %v4935_v32 = vmul.f32 %v11478_v10, %v4785_v40  ;;  %v4790_v20 = vunpack.c.h.bf16 %v4714_v7  ;;  %v4478_v17 = vpop.f32.mrb[88].mxu1  ;;  %v4936_v48 = vmul.f32 %v11481_v4, %v4786_v22 }
 0x3fa   : > { %v11581_v0 = vpop.eup %9857  ;;  %9881 = vtanh.f32 %v8690_v49  ;;  %v4937_v5 = vmul.f32 %v11484_v35, %v4787_v26  ;;  %v4791_v59 = vunpack.c.h.bf16 %v4715_v15  ;;  %v4094_v58 = vpop.f32.mrb[89].mxu0  ;;  %v4938_v9 = vmul.f32 %v11489_v62, %v4788_v50 }
 0x3fb   : > { %v11584_v29 = vpop.eup %9859  ;;  %v4480_v16 = vpop.f32.mrb[89].mxu1  ;;  %9883 = vtanh.f32 %v8754_v31  ;;  %v4792_v23 = vunpack.c.h.bf16 %v4716_v13  ;;  %v4939_v52 = vmul.f32 %v11478_v10, %v4789_v34  ;;  %v5067_v6 = vadd.f32 %v4936_v48, %v4935_v32 }
 0x3fc   : > { %v11587_v2 = vpop.eup %9861  ;;  %v4096_v30 = vpop.f32.mrb[90].mxu0  ;;  %v4940_v45 = vmul.f32 %v11481_v4, %v4790_v20  ;;  %v4941_v12 = vmul.f32 %v11484_v35, %v4791_v59  ;;  %v8691_v63 = vadd.f32 %v4092_v28, %v11447_v44  ;;  %v8755_v57 = vadd.f32 %v4478_v17, %v11450_v47 }
 0x3fd   : > { %v11591_v53 = vpop.eup %9863  ;;  %v4482_v14 = vpop.f32.mrb[90].mxu1  ;;  %v4942_v8 = vmul.f32 %v11489_v62, %v4792_v23  ;;  %v8692_v43 = vadd.f32 %v4094_v58, %v11453_v41  ;;  %v8756_v38 = vadd.f32 %v4480_v16, %v11456_v27  ;;  %v5068_v49 = vadd.f32 %v5067_v6, %v4937_v5 }
 0x3fe   : > { %v11595_v19 = vpop.eup %9865  ;;  %v4098_v42 = vpop.f32.mrb[91].mxu0  ;;  %v5072_v31 = vadd.f32 %v4940_v45, %v4939_v52  ;;  %9885 = vtanh.f32 %v8691_v63  ;;  %v8693_v7 = vadd.f32 %v4096_v30, %v11447_v44  ;;  %v8757_v61 = vadd.f32 %v4482_v14, %v11450_v47 }
 0x3ff   : > { %v4484_v25 = vpop.f32.mrb[91].mxu1  ;;  %v11600_v24 = vpop.eup %9867  ;;  %9887 = vtanh.f32 %v8755_v57  ;;  %v8694_v13 = vadd.f32 %v4098_v42, %v11453_v41  ;;  %v5069_v26 = vadd.f32 %v5068_v49, %v4938_v9  ;;  %v4717_v50 = vpack.c.bf16 %v11553_v18, %v11535_v1 }
 0x400   : > { %v11606_v55 = vpop.eup %9869  ;;  %v8758_v40 = vadd.f32 %v4484_v25, %v11456_v27  ;;  %v5073_v34 = vadd.f32 %v5072_v31, %v4941_v12  ;;  %9889 = vtanh.f32 %v8692_v43  ;;  %v4718_v20 = vpack.c.bf16 %v11561_v56, %v11543_v37  ;;  %v4102_v48 = vpop.f32.mrb[92].mxu0 }
 0x401   : > { %v11609_v15 = vpop.eup %9871  ;;  %9891 = vtanh.f32 %v8756_v38  ;;  %v4719_v28 = vpack.c.bf16 %v11557_v51, %v11540_v21  ;;  %v4720_v17 = vpack.c.bf16 %v11565_v36, %v11546_v33  ;;  %v4488_v5 = vpop.f32.mrb[92].mxu1  ;;  %5070 = vadd.xlane.f32.xlu0 %v5069_v26  ;;  %v4793_v1 = vunpack.c.l.bf16 %v4717_v50 }
 0x402   : > { %v11614_v22 = vpop.eup %9873  ;;  %v5074_v58 = vadd.f32 %v5073_v34, %v4942_v8  ;;  %9893 = vtanh.f32 %v8693_v7  ;;  %v4797_v18 = vunpack.c.h.bf16 %v4717_v50  ;;  %v4104_v16 = vpop.f32.mrb[93].mxu0  ;;  %v4794_v37 = vunpack.c.l.bf16 %v4718_v20 }
 0x403   : > { %v11618_v32 = vpop.eup %9875  ;;  %v4490_v9 = vpop.f32.mrb[93].mxu1  ;;  %9895 = vtanh.f32 %v8757_v61  ;;  %v4795_v56 = vunpack.c.l.bf16 %v4719_v28  ;;  %v4796_v21 = vunpack.c.l.bf16 %v4720_v17  ;;  %v4943_v36 = vmul.f32 %v11478_v10, %v4793_v1 }
 0x404   : > { %v11626_v59 = vpop.eup %9877  ;;  %v4106_v51 = vpop.f32.mrb[94].mxu0  ;;  %5075 = vadd.xlane.f32.xlu1 %v5074_v58  ;;  %9897 = vtanh.f32 %v8694_v13  ;;  %v4798_v30 = vunpack.c.h.bf16 %v4718_v20  ;;  %v4799_v14 = vunpack.c.h.bf16 %v4719_v28  ;;  %v4944_v63 = vmul.f32 %v11481_v4, %v4794_v37 }
 0x405   : > { %v11628_v23 = vpop.eup %9879  ;;  %v4492_v52 = vpop.f32.mrb[94].mxu1  ;;  %9899 = vtanh.f32 %v8758_v40  ;;  %v4945_v42 = vmul.f32 %v11484_v35, %v4795_v56  ;;  %v4946_v25 = vmul.f32 %v11489_v62, %v4796_v21  ;;  %v4800_v8 = vunpack.c.h.bf16 %v4720_v17 }
 0x406   : > { %v11630_v33 = vpop.eup %9881  ;;  %v4108_v6 = vpop.f32.mrb[95].mxu0  ;;  %v4947_v57 = vmul.f32 %v11478_v10, %v4797_v18  ;;  %v4948_v43 = vmul.f32 %v11481_v4, %v4798_v30  ;;  %v4949_v38 = vmul.f32 %v11484_v35, %v4799_v14  ;;  %v5077_v49 = vadd.f32 %v4944_v63, %v4943_v36 }
 0x407   : > { %v4494_v45 = vpop.f32.mrb[95].mxu1  ;;  %v11633_v12 = vpop.eup %9883  ;;  %v8695_v31 = vadd.f32 %v4102_v48, %v11447_v44  ;;  %v8759_v7 = vadd.f32 %v4488_v5, %v11450_v47  ;;  %v8696_v61 = vadd.f32 %v4104_v16, %v11453_v41  ;;  %v4950_v40 = vmul.f32 %v11489_v62, %v4800_v8 }
 0x408   : > { %v11644_v13 = vpop.eup %9885  ;;  %v5082_v26 = vadd.f32 %v4948_v43, %v4947_v57  ;;  %v8760_v34 = vadd.f32 %v4490_v9, %v11456_v27  ;;  %v8697_v50 = vadd.f32 %v4106_v51, %v11447_v44  ;;  %v5078_v28 = vadd.f32 %v5077_v49, %v4945_v42  ;;  %v4112_v5 = vpop.f32.mrb[96].mxu0 }
 0x409   : > { %v11649_v20 = vpop.eup %9887  ;;  %9901 = vtanh.f32 %v8695_v31  ;;  %v8761_v17 = vadd.f32 %v4492_v52, %v11450_v47  ;;  %v8698_v48 = vadd.f32 %v4108_v6, %v11453_v41  ;;  %v4498_v58 = vpop.f32.mrb[96].mxu1  ;;  %v8762_v16 = vadd.f32 %v4494_v45, %v11456_v27 }
 0x40a   : > { %v11653_v1 = vpop.eup %9889  ;;  %v5083_v18 = vadd.f32 %v5082_v26, %v4949_v38  ;;  %9903 = vtanh.f32 %v8759_v7  ;;  %v4721_v9 = vpack.c.bf16 %v11587_v2, %v11569_v60  ;;  %v4114_v37 = vpop.f32.mrb[97].mxu0  ;;  %v5079_v51 = vadd.f32 %v5078_v28, %v4946_v25 }
 0x40b   : > { %v4500_v56 = vpop.f32.mrb[97].mxu1  ;;  %v11658_v21 = vpop.eup %9891  ;;  %9905 = vtanh.f32 %v8696_v61  ;;  %v4722_v52 = vpack.c.bf16 %v11595_v19, %v11581_v0  ;;  %v4723_v36 = vpack.c.bf16 %v11591_v53, %v11576_v3  ;;  %v4724_v60 = vpack.c.bf16 %v11600_v24, %v11584_v29 }
 0x40c   : > { %v4116_v30 = vpop.f32.mrb[98].mxu0  ;;  %v4502_v14 = vpop.f32.mrb[98].mxu1  ;;  %v5084_v45 = vadd.f32 %v5083_v18, %v4950_v40  ;;  %9907 = vtanh.f32 %v8760_v34  ;;  %v4801_v2 = vunpack.c.l.bf16 %v4721_v9  ;;  %5080 = vadd.xlane.f32.xlu0 %v5079_v51  ;;  %v4805_v8 = vunpack.c.h.bf16 %v4721_v9 }
 0x40d   : > { %v11664_v6 = vpop.eup %9893  ;;  %v4118_v63 = vpop.f32.mrb[99].mxu0  ;;  %9909 = vtanh.f32 %v8697_v50  ;;  %v4802_v0 = vunpack.c.l.bf16 %v4722_v52  ;;  %v4803_v19 = vunpack.c.l.bf16 %v4723_v36  ;;  %v4804_v53 = vunpack.c.l.bf16 %v4724_v60 }
 0x40e   : > { %v4504_v42 = vpop.f32.mrb[99].mxu1  ;;  %v11668_v25 = vpop.eup %9895  ;;  %5085 = vadd.xlane.f32.xlu1 %v5084_v45  ;;  %9911 = vtanh.f32 %v8761_v17  ;;  %v4951_v57 = vmul.f32 %v11478_v10, %v4801_v2  ;;  %v4806_v43 = vunpack.c.h.bf16 %v4722_v52  ;;  %v4807_v49 = vunpack.c.h.bf16 %v4723_v36 }
 0x40f   : > { %v11670_v3 = vpop.eup %9897  ;;  %9913 = vtanh.f32 %v8698_v48  ;;  %v4952_v29 = vmul.f32 %v11481_v4, %v4802_v0  ;;  %v4953_v24 = vmul.f32 %v11484_v35, %v4803_v19  ;;  %v4954_v31 = vmul.f32 %v11489_v62, %v4804_v53 }
 0x410   : > { %v11673_v38 = vpop.eup %9899  ;;  %9915 = vtanh.f32 %v8762_v16  ;;  %v4808_v7 = vunpack.c.h.bf16 %v4724_v60  ;;  %v4955_v61 = vmul.f32 %v11478_v10, %v4805_v8  ;;  %v4956_v26 = vmul.f32 %v11481_v4, %v4806_v43  ;;  %v11682_v28 = vpop.f32.mrb[100].mxu0 }
 0x411   : > { %v5087_v40 = vadd.f32 %v4952_v29, %v4951_v57  ;;  %v4957_v34 = vmul.f32 %v11484_v35, %v4807_v49  ;;  %v8699_v50 = vadd.f32 %v4112_v5, %v11447_v44  ;;  %v11684_v17 = vpop.f32.mrb[100].mxu1  ;;  %v8763_v18 = vadd.f32 %v4498_v58, %v11450_v47  ;;  %v4124_v51 = vpop.f32.mrb[101].mxu0 }
 0x412   : > { %v4958_v48 = vmul.f32 %v11489_v62, %v4808_v7  ;;  %v8700_v16 = vadd.f32 %v4114_v37, %v11453_v41  ;;  %v8764_v9 = vadd.f32 %v4500_v56, %v11456_v27  ;;  %v11690_v52 = vpop.f32.mrb[101].mxu1  ;;  %v5092_v60 = vadd.f32 %v4956_v26, %v4955_v61  ;;  %v4126_v2 = vpop.f32.mrb[102].mxu0 }
 0x413   : > { %v11692_v36 = vpop.eup %9901  ;;  %v5088_v45 = vadd.f32 %v5087_v40, %v4953_v24  ;;  %9917 = vtanh.f32 %v8699_v50  ;;  %v8701_v5 = vadd.f32 %v4116_v30, %v11447_v44  ;;  %v11695_v0 = vpop.f32.mrb[102].mxu1  ;;  %v8765_v58 = vadd.f32 %v4502_v14, %v11450_v47 }
 0x414   : > { %v11697_v19 = vpop.eup %9903  ;;  %9919 = vtanh.f32 %v8763_v18  ;;  %v8702_v37 = vadd.f32 %v4118_v63, %v11453_v41  ;;  %v8766_v56 = vadd.f32 %v4504_v42, %v11456_v27  ;;  %v4128_v8 = vpop.f32.mrb[103].mxu0  ;;  %v5093_v29 = vadd.f32 %v5092_v60, %v4957_v34 }
 0x415   : > { %v4514_v53 = vpop.f32.mrb[103].mxu1  ;;  %v11702_v57 = vpop.eup %9905  ;;  %v5089_v43 = vadd.f32 %v5088_v45, %v4954_v31  ;;  %9921 = vtanh.f32 %v8700_v16  ;;  %v4725_v30 = vpack.c.bf16 %v11626_v59, %v11606_v55  ;;  %v4726_v14 = vpack.c.bf16 %v11630_v33, %v11614_v22 }
 0x416   : > { %v11706_v24 = vpop.eup %9907  ;;  %9923 = vtanh.f32 %v8764_v9  ;;  %v4727_v63 = vpack.c.bf16 %v11628_v23, %v11609_v15  ;;  %v4728_v42 = vpack.c.bf16 %v11633_v12, %v11618_v32  ;;  %v5094_v31 = vadd.f32 %v5093_v29, %v4958_v48 }
 0x417   : > { %v11714_v49 = vpop.eup %9909  ;;  %5090 = vadd.xlane.f32.xlu0 %v5089_v43  ;;  %9925 = vtanh.f32 %v8701_v5  ;;  %v4809_v7 = vunpack.c.l.bf16 %v4725_v30  ;;  %v4813_v61 = vunpack.c.h.bf16 %v4725_v30  ;;  %v4810_v59 = vunpack.c.l.bf16 %v4726_v14 }
 0x418   : > { %v11716_v55 = vpop.eup %9911  ;;  %9927 = vtanh.f32 %v8765_v58  ;;  %v4811_v40 = vunpack.c.l.bf16 %v4727_v63  ;;  %v4812_v26 = vunpack.c.l.bf16 %v4728_v42  ;;  %5095 = vadd.xlane.f32.xlu1 %v5094_v31  ;;  %v4814_v32 = vunpack.c.h.bf16 %v4726_v14  ;;  %v11721_v33 = vpop.f32.mrb[104].mxu0 }
 0x419   : > { %v11718_v22 = vpop.eup %9913  ;;  %9929 = vtanh.f32 %v8702_v37  ;;  %v4959_v15 = vmul.f32 %v11478_v10, %v4809_v7  ;;  %v4815_v23 = vunpack.c.h.bf16 %v4727_v63  ;;  %v11723_v12 = vpop.f32.mrb[104].mxu1  ;;  %v4960_v50 = vmul.f32 %v11481_v4, %v4810_v59 }
 0x41a   : > { %v11725_v34 = vpop.eup %9915  ;;  %9931 = vtanh.f32 %v8766_v56  ;;  %v4961_v48 = vmul.f32 %v11484_v35, %v4811_v40  ;;  %v4962_v18 = vmul.f32 %v11489_v62, %v4812_v26  ;;  %v11730_v16 = vpop.f32.mrb[105].mxu0  ;;  %v4816_v45 = vunpack.c.h.bf16 %v4728_v42 }
 0x41b   : > { %v11732_v9 = vpop.f32.mrb[105].mxu1  ;;  %v4963_v60 = vmul.f32 %v11478_v10, %v4813_v61  ;;  %v4964_v5 = vmul.f32 %v11481_v4, %v4814_v32  ;;  %v4965_v58 = vmul.f32 %v11484_v35, %v4815_v23  ;;  %v11737_v37 = vpop.f32.mrb[106].mxu0  ;;  %v5097_v43 = vadd.f32 %v4960_v50, %v4959_v15 }
 0x41c   : > { %v11739_v56 = vpop.f32.mrb[106].mxu1  ;;  %v8703_v29 = vadd.f32 %v11682_v28, %v11447_v44  ;;  %v8767_v30 = vadd.f32 %v11684_v17, %v11450_v47  ;;  %v8704_v14 = vadd.f32 %v4124_v51, %v11453_v41  ;;  %v11746_v63 = vpop.f32.mrb[107].mxu0  ;;  %v4966_v7 = vmul.f32 %v11489_v62, %v4816_v45 }
 0x41d   : > { %v11748_v42 = vpop.f32.mrb[107].mxu1  ;;  %v11750_v31 = vpop.eup %9917  ;;  %v5102_v61 = vadd.f32 %v4964_v5, %v4963_v60  ;;  %v8768_v59 = vadd.f32 %v11690_v52, %v11456_v27  ;;  %v8705_v40 = vadd.f32 %v4126_v2, %v11447_v44  ;;  %v5098_v26 = vadd.f32 %v5097_v43, %v4961_v48 }
 0x41e   : > { %v11756_v28 = vpop.eup %9919  ;;  %9933 = vtanh.f32 %v8703_v29  ;;  %v8769_v17 = vadd.f32 %v11695_v0, %v11450_v47  ;;  %v8706_v51 = vadd.f32 %v4128_v8, %v11453_v41  ;;  %v8770_v23 = vadd.f32 %v4514_v53, %v11456_v27 }
 0x41f   : > { %v11761_v15 = vpop.eup %9921  ;;  %v5103_v32 = vadd.f32 %v5102_v61, %v4965_v58  ;;  %9935 = vtanh.f32 %v8767_v30  ;;  %v4729_v52 = vpack.c.bf16 %v11664_v6, %v11644_v13  ;;  %v5099_v2 = vadd.f32 %v5098_v26, %v4962_v18 }
 0x420   : > { %v11766_v50 = vpop.eup %9923  ;;  %9937 = vtanh.f32 %v8704_v14  ;;  %v4730_v48 = vpack.c.bf16 %v11670_v3, %v11653_v1  ;;  %v4731_v0 = vpack.c.bf16 %v11668_v25, %v11649_v20  ;;  %v4732_v53 = vpack.c.bf16 %v11673_v38, %v11658_v21  ;;  %v11776_v5 = vpop.f32.mrb[108].mxu0 }
 0x421   : > { %v11772_v8 = vpop.eup %9925  ;;  %v5104_v45 = vadd.f32 %v5103_v32, %v4966_v7  ;;  %9939 = vtanh.f32 %v8768_v59  ;;  %v4817_v60 = vunpack.c.l.bf16 %v4729_v52  ;;  %v11778_v13 = vpop.f32.mrb[108].mxu1  ;;  %5100 = vadd.xlane.f32.xlu0 %v5099_v2  ;;  %v4821_v18 = vunpack.c.h.bf16 %v4729_v52 }
 0x422   : > { %v11780_v6 = vpop.eup %9927  ;;  %9941 = vtanh.f32 %v8705_v40  ;;  %v4818_v1 = vunpack.c.l.bf16 %v4730_v48  ;;  %v4819_v3 = vunpack.c.l.bf16 %v4731_v0  ;;  %v11782_v20 = vpop.f32.mrb[109].mxu0  ;;  %v4820_v21 = vunpack.c.l.bf16 %v4732_v53 }
 0x423   : > { %v11784_v25 = vpop.f32.mrb[109].mxu1  ;;  %v11786_v58 = vpop.eup %9929  ;;  %5105 = vadd.xlane.f32.xlu1 %v5104_v45  ;;  %9943 = vtanh.f32 %v8769_v17  ;;  %v4967_v38 = vmul.f32 %v11478_v10, %v4817_v60  ;;  %v4822_v43 = vunpack.c.h.bf16 %v4730_v48  ;;  %v4823_v59 = vunpack.c.h.bf16 %v4731_v0 }
 0x424   : > { %v11789_v29 = vpop.f32.mrb[110].mxu0  ;;  %v11791_v30 = vpop.f32.mrb[110].mxu1  ;;  %9945 = vtanh.f32 %v8706_v51  ;;  %v4968_v7 = vmul.f32 %v11481_v4, %v4818_v1  ;;  %v4969_v61 = vmul.f32 %v11484_v35, %v4819_v3  ;;  %v4970_v17 = vmul.f32 %v11489_v62, %v4820_v21 }
 0x425   : > { %v11793_v14 = vpop.eup %9931  ;;  %v11797_v40 = vpop.f32.mrb[111].mxu0  ;;  %9947 = vtanh.f32 %v8770_v23  ;;  %v4824_v32 = vunpack.c.h.bf16 %v4732_v53  ;;  %v4971_v52 = vmul.f32 %v11478_v10, %v4821_v18  ;;  %v4972_v48 = vmul.f32 %v11481_v4, %v4822_v43 }
 0x426   : > { %v11799_v26 = vpop.f32.mrb[111].mxu1  ;;  %v5107_v2 = vadd.f32 %v4968_v7, %v4967_v38  ;;  %v4973_v51 = vmul.f32 %v11484_v35, %v4823_v59  ;;  %v8707_v45 = vadd.f32 %v11721_v33, %v11447_v44  ;;  %v8771_v60 = vadd.f32 %v11723_v12, %v11450_v47 }
 0x427   : > { %v4974_v0 = vmul.f32 %v11489_v62, %v4824_v32  ;;  %v8708_v23 = vadd.f32 %v11730_v16, %v11453_v41  ;;  %v8772_v53 = vadd.f32 %v11732_v9, %v11456_v27  ;;  %v5112_v18 = vadd.f32 %v4972_v48, %v4971_v52 }
 0x428   : > { %v11814_v1 = vpop.eup %9933  ;;  %v5108_v3 = vadd.f32 %v5107_v2, %v4969_v61  ;;  %9949 = vtanh.f32 %v8707_v45  ;;  %v8709_v21 = vadd.f32 %v11737_v37, %v11447_v44  ;;  %v8773_v12 = vadd.f32 %v11739_v56, %v11450_v47  ;;  %v11826_v38 = vpop.f32.mrb[112].mxu0 }
 0x429   : > { %v11818_v33 = vpop.eup %9935  ;;  %9951 = vtanh.f32 %v8771_v60  ;;  %v8710_v16 = vadd.f32 %v11746_v63, %v11453_v41  ;;  %v8774_v9 = vadd.f32 %v11748_v42, %v11456_v27  ;;  %v11828_v43 = vpop.f32.mrb[112].mxu1  ;;  %v5113_v37 = vadd.f32 %v5112_v18, %v4973_v51 }
 0x42a   : > { %v11830_v7 = vpop.eup %9937  ;;  %v5109_v61 = vadd.f32 %v5108_v3, %v4970_v17  ;;  %9953 = vtanh.f32 %v8708_v23  ;;  %v4733_v59 = vpack.c.bf16 %v11714_v49, %v11692_v36  ;;  %v11834_v32 = vpop.f32.mrb[113].mxu0  ;;  %v4734_v42 = vpack.c.bf16 %v11718_v22, %v11702_v57 }
 0x42b   : > { %v11836_v56 = vpop.f32.mrb[113].mxu1  ;;  %v11838_v63 = vpop.eup %9939  ;;  %9955 = vtanh.f32 %v8772_v53  ;;  %v4735_v52 = vpack.c.bf16 %v11716_v55, %v11697_v19  ;;  %v4736_v17 = vpack.c.bf16 %v11725_v34, %v11706_v24  ;;  %v5114_v49 = vadd.f32 %v5113_v37, %v4974_v0 }
 0x42c   : > { %v11846_v2 = vpop.f32.mrb[114].mxu0  ;;  %v11848_v48 = vpop.f32.mrb[114].mxu1  ;;  %5110 = vadd.xlane.f32.xlu0 %v5109_v61  ;;  %9957 = vtanh.f32 %v8709_v21  ;;  %v4825_v51 = vunpack.c.l.bf16 %v4733_v59  ;;  %v4829_v45 = vunpack.c.h.bf16 %v4733_v59  ;;  %v4826_v19 = vunpack.c.l.bf16 %v4734_v42 }
 0x42d   : > { %v11850_v36 = vpop.eup %9941  ;;  %v11852_v60 = vpop.f32.mrb[115].mxu0  ;;  %9959 = vtanh.f32 %v8773_v12  ;;  %v4827_v24 = vunpack.c.l.bf16 %v4735_v52  ;;  %v4828_v55 = vunpack.c.l.bf16 %v4736_v17  ;;  %5115 = vadd.xlane.f32.xlu1 %v5114_v49  ;;  %v4830_v0 = vunpack.c.h.bf16 %v4734_v42 }
 0x42e   : > { %v11854_v57 = vpop.f32.mrb[115].mxu1  ;;  %v11856_v22 = vpop.eup %9943  ;;  %9961 = vtanh.f32 %v8710_v16  ;;  %v4975_v23 = vmul.f32 %v11478_v10, %v4825_v51  ;;  %v4831_v53 = vunpack.c.h.bf16 %v4735_v52  ;;  %v4976_v18 = vmul.f32 %v11481_v4, %v4826_v19 }
 0x42f   : > { %v11858_v34 = vpop.eup %9945  ;;  %9963 = vtanh.f32 %v8774_v9  ;;  %v4977_v21 = vmul.f32 %v11484_v35, %v4827_v24  ;;  %v4978_v12 = vmul.f32 %v11489_v62, %v4828_v55  ;;  %v4832_v61 = vunpack.c.h.bf16 %v4736_v17 }
 0x430   : > { %v11861_v3 = vpop.eup %9947  ;;  %v4979_v37 = vmul.f32 %v11478_v10, %v4829_v45  ;;  %v4980_v59 = vmul.f32 %v11481_v4, %v4830_v0  ;;  %v4981_v16 = vmul.f32 %v11484_v35, %v4831_v53  ;;  %v5117_v49 = vadd.f32 %v4976_v18, %v4975_v23  ;;  %v11875_v51 = vpop.f32.mrb[116].mxu0 }
 0x431   : > { %v8711_v42 = vadd.f32 %v11776_v5, %v11447_v44  ;;  %v8775_v9 = vadd.f32 %v11778_v13, %v11450_v47  ;;  %v8712_v52 = vadd.f32 %v11782_v20, %v11453_v41  ;;  %v11877_v19 = vpop.f32.mrb[116].mxu1  ;;  %v4982_v45 = vmul.f32 %v11489_v62, %v4832_v61  ;;  %v11886_v23 = vpop.f32.mrb[117].mxu0 }
 0x432   : > { %v11879_v17 = vpop.eup %9949  ;;  %v5122_v24 = vadd.f32 %v4980_v59, %v4979_v37  ;;  %v8776_v55 = vadd.f32 %v11784_v25, %v11456_v27  ;;  %v8713_v5 = vadd.f32 %v11789_v29, %v11447_v44  ;;  %v11888_v13 = vpop.f32.mrb[117].mxu1  ;;  %v5118_v0 = vadd.f32 %v5117_v49, %v4977_v21 }
 0x433   : > { %v11890_v20 = vpop.eup %9951  ;;  %9965 = vtanh.f32 %v8711_v42  ;;  %v8777_v53 = vadd.f32 %v11791_v30, %v11450_v47  ;;  %v8714_v18 = vadd.f32 %v11797_v40, %v11453_v41  ;;  %v11896_v61 = vpop.f32.mrb[118].mxu0  ;;  %v8778_v59 = vadd.f32 %v11799_v26, %v11456_v27 }
 0x434   : > { %v11898_v25 = vpop.f32.mrb[118].mxu1  ;;  %v11900_v37 = vpop.eup %9953  ;;  %v5123_v29 = vadd.f32 %v5122_v24, %v4981_v16  ;;  %9967 = vtanh.f32 %v8775_v9  ;;  %v4737_v21 = vpack.c.bf16 %v11772_v8, %v11750_v31  ;;  %v5119_v40 = vadd.f32 %v5118_v0, %v4978_v12 }
 0x435   : > { %v11906_v49 = vpop.f32.mrb[119].mxu0  ;;  %v11908_v30 = vpop.f32.mrb[119].mxu1  ;;  %9969 = vtanh.f32 %v8712_v52  ;;  %v4738_v39 = vpack.c.bf16 %v11786_v58, %v11761_v15  ;;  %v4739_v16 = vpack.c.bf16 %v11780_v6, %v11756_v28  ;;  %v4740_v31 = vpack.c.bf16 %v11793_v14, %v11766_v50 }
 0x436   : > { %v11910_v42 = vpop.eup %9955  ;;  %v5124_v26 = vadd.f32 %v5123_v29, %v4982_v45  ;;  %9971 = vtanh.f32 %v8776_v55  ;;  %v4833_v8 = vunpack.c.l.bf16 %v4737_v21  ;;  %5120 = vadd.xlane.f32.xlu0 %v5119_v40  ;;  %v4837_v0 = vunpack.c.h.bf16 %v4737_v21 }
 0x437   : > { %v11916_v9 = vpop.eup %9957  ;;  %9973 = vtanh.f32 %v8713_v5  ;;  %v4834_v12 = vunpack.c.l.bf16 %v4738_v39  ;;  %v4835_v52 = vunpack.c.l.bf16 %v4739_v16  ;;  %v4836_v28 = vunpack.c.l.bf16 %v4740_v31 }
 0x438   : > { %v11920_v24 = vpop.eup %9959  ;;  %5125 = vadd.xlane.f32.xlu1 %v5124_v26  ;;  %9975 = vtanh.f32 %v8777_v53  ;;  %v4983_v15 = vmul.f32 %v11478_v10, %v4833_v8  ;;  %v4838_v6 = vunpack.c.h.bf16 %v4738_v39  ;;  %v4839_v45 = vunpack.c.h.bf16 %v4739_v16  ;;  %v11929_v55 = vpop.f32.mrb[120].mxu0 }
 0x439   : > { %v11922_v54 = vpop.eup %9961  ;;  %9977 = vtanh.f32 %v8714_v18  ;;  %v4984_v50 = vmul.f32 %v11481_v4, %v4834_v12  ;;  %v4985_v14 = vmul.f32 %v11484_v35, %v4835_v52  ;;  %v11931_v5 = vpop.f32.mrb[120].mxu1  ;;  %v4986_v29 = vmul.f32 %v11489_v62, %v4836_v28 }
 0x43a   : > { %v11925_v58 = vpop.eup %9963  ;;  %9979 = vtanh.f32 %v8778_v59  ;;  %v4840_v53 = vunpack.c.h.bf16 %v4740_v31  ;;  %v4987_v21 = vmul.f32 %v11478_v10, %v4837_v0  ;;  %v11935_v40 = vpop.f32.mrb[121].mxu0  ;;  %v4988_v26 = vmul.f32 %v11481_v4, %v4838_v6 }
 0x43b   : > { %v11937_v39 = vpop.f32.mrb[121].mxu1  ;;  %v5127_v18 = vadd.f32 %v4984_v50, %v4983_v15  ;;  %v4989_v8 = vmul.f32 %v11484_v35, %v4839_v45  ;;  %v8715_v16 = vadd.f32 %v11826_v38, %v11447_v44  ;;  %v11943_v12 = vpop.f32.mrb[122].mxu0  ;;  %v8779_v52 = vadd.f32 %v11828_v43, %v11450_v47 }
 0x43c   : > { %v11945_v59 = vpop.f32.mrb[122].mxu1  ;;  %v4990_v31 = vmul.f32 %v11489_v62, %v4840_v53  ;;  %v8716_v0 = vadd.f32 %v11834_v32, %v11453_v41  ;;  %v8780_v28 = vadd.f32 %v11836_v56, %v11456_v27  ;;  %v11954_v15 = vpop.f32.mrb[123].mxu0  ;;  %v5132_v45 = vadd.f32 %v4988_v26, %v4987_v21 }
 0x43d   : > { %v11956_v6 = vpop.f32.mrb[123].mxu1  ;;  %v11958_v38 = vpop.eup %9965  ;;  %v5128_v50 = vadd.f32 %v5127_v18, %v4985_v14  ;;  %9981 = vtanh.f32 %v8715_v16  ;;  %v8717_v53 = vadd.f32 %v11846_v2, %v11447_v44  ;;  %v8781_v43 = vadd.f32 %v11848_v48, %v11450_v47 }
 0x43e   : > { %v11962_v46 = vpop.eup %9967  ;;  %9983 = vtanh.f32 %v8779_v52  ;;  %v8718_v32 = vadd.f32 %v11852_v60, %v11453_v41  ;;  %v8782_v56 = vadd.f32 %v11854_v57, %v11456_v27  ;;  %v5133_v21 = vadd.f32 %v5132_v45, %v4989_v8 }
 0x43f   : > { %v11970_v11 = vpop.eup %9969  ;;  %v5129_v14 = vadd.f32 %v5128_v50, %v4986_v29  ;;  %9985 = vtanh.f32 %v8716_v0  ;;  %v4741_v2 = vpack.c.bf16 %v11850_v36, %v11814_v1  ;;  %v4742_v48 = vpack.c.bf16 %v11858_v34, %v11830_v7 }
 0x440   : > { %v11974_v18 = vpop.eup %9971  ;;  %9987 = vtanh.f32 %v8780_v28  ;;  %v4743_v60 = vpack.c.bf16 %v11856_v22, %v11818_v33  ;;  %v4744_v57 = vpack.c.bf16 %v11861_v3, %v11838_v63  ;;  %v5134_v29 = vadd.f32 %v5133_v21, %v4990_v31  ;;  %v11984_v1 = vpop.f32.mrb[124].mxu0 }
 0x441   : > { %v11982_v26 = vpop.eup %9973  ;;  %5130 = vadd.xlane.f32.xlu0 %v5129_v14  ;;  %9989 = vtanh.f32 %v8717_v53  ;;  %v4841_v8 = vunpack.c.l.bf16 %v4741_v2  ;;  %v4845_v16 = vunpack.c.h.bf16 %v4741_v2  ;;  %v11986_v36 = vpop.f32.mrb[124].mxu1  ;;  %v4842_v7 = vunpack.c.l.bf16 %v4742_v48 }
 0x442   : > { %v11988_v52 = vpop.eup %9975  ;;  %9991 = vtanh.f32 %v8781_v43  ;;  %v4843_v34 = vunpack.c.l.bf16 %v4743_v60  ;;  %v4844_v33 = vunpack.c.l.bf16 %v4744_v57  ;;  %v11990_v22 = vpop.f32.mrb[125].mxu0  ;;  %5135 = vadd.xlane.f32.xlu1 %v5134_v29  ;;  %v4846_v0 = vunpack.c.h.bf16 %v4742_v48 }
 0x443   : > { %v11992_v63 = vpop.f32.mrb[125].mxu1  ;;  %v11994_v3 = vpop.eup %9977  ;;  %9993 = vtanh.f32 %v8718_v32  ;;  %v4991_v31 = vmul.f32 %v11478_v10, %v4841_v8  ;;  %v4847_v28 = vunpack.c.h.bf16 %v4743_v60  ;;  %v4992_v43 = vmul.f32 %v11481_v4, %v4842_v7 }
 0x444   : > { %v11997_v50 = vpop.f32.mrb[126].mxu0  ;;  %v11999_v45 = vpop.f32.mrb[126].mxu1  ;;  %9995 = vtanh.f32 %v8782_v56  ;;  %v4993_v14 = vmul.f32 %v11484_v35, %v4843_v34  ;;  %v4994_v21 = vmul.f32 %v11489_v62, %v4844_v33  ;;  %v4848_v29 = vunpack.c.h.bf16 %v4744_v57 }
 0x445   : > { %13158 = vst [vmem:[#allocation14_spill] sm:$0xff] %v11999_v45  ;;  %v12001_v53 = vpop.eup %9979  ;;  %v12006_v2 = vpop.f32.mrb[127].mxu0  ;;  %v4995_v48 = vmul.f32 %v11478_v10, %v4845_v16  ;;  %v4996_v60 = vmul.f32 %v11481_v4, %v4846_v0  ;;  %v4997_v8 = vmul.f32 %v11484_v35, %v4847_v28  ;;  %v5137_v45 = vadd.f32 %v4992_v43, %v4991_v31 }
 0x446   : > { %v12008_v32 = vpop.f32.mrb[127].mxu1  ;;  %v8719_v56 = vadd.f32 %v11875_v51, %v11447_v44  ;;  %v8783_v7 = vadd.f32 %v11877_v19, %v11450_v47  ;;  %v8720_v34 = vadd.f32 %v11886_v23, %v11453_v41  ;;  %v4998_v57 = vmul.f32 %v11489_v62, %v4848_v29 }
 0x447   : > { %13159 = vst [vmem:[#allocation13_spill] sm:$0xff] %v12008_v32  ;;  %v12019_v33 = vpop.eup %9981  ;;  %v5142_v32 = vadd.f32 %v4996_v60, %v4995_v48  ;;  %v8784_v16 = vadd.f32 %v11888_v13, %v11456_v27  ;;  %v8721_v31 = vadd.f32 %v11896_v61, %v11447_v44  ;;  %v5138_v51 = vadd.f32 %v5137_v45, %v4993_v14 }
 0x448   : > { %v12026_v0 = vpop.eup %9983  ;;  %9997 = vtanh.f32 %v8719_v56  ;;  %v8785_v19 = vadd.f32 %v11898_v25, %v11450_v47  ;;  %v8722_v23 = vadd.f32 %v11906_v49, %v11453_v41  ;;  %v8786_v13 = vadd.f32 %v11908_v30, %v11456_v27 }
 0x449   : > { %v12032_v28 = vpop.eup %9985  ;;  %v5143_v43 = vadd.f32 %v5142_v32, %v4997_v8  ;;  %9999 = vtanh.f32 %v8783_v7  ;;  %v4745_v61 = vpack.c.bf16 %v11916_v9, %v11879_v17  ;;  %v5139_v45 = vadd.f32 %v5138_v51, %v4994_v21 }
 0x44a   : > { %v12038_v29 = vpop.eup %9987  ;;  %10001 = vtanh.f32 %v8720_v34  ;;  %v4746_v25 = vpack.c.bf16 %v11922_v54, %v11900_v37  ;;  %v4747_v49 = vpack.c.bf16 %v11920_v24, %v11890_v20  ;;  %v4748_v30 = vpack.c.bf16 %v11925_v58, %v11910_v42 }
 0x44b   : > { %v12044_v14 = vpop.eup %9989  ;;  %v5144_v32 = vadd.f32 %v5143_v43, %v4998_v57  ;;  %10003 = vtanh.f32 %v8784_v16  ;;  %v4849_v48 = vunpack.c.l.bf16 %v4745_v61  ;;  %5140 = vadd.xlane.f32.xlu0 %v5139_v45  ;;  %v4853_v21 = vunpack.c.h.bf16 %v4745_v61 }
 0x44c   : > { %v12048_v60 = vpop.eup %9991  ;;  %10005 = vtanh.f32 %v8721_v31  ;;  %v4850_v17 = vunpack.c.l.bf16 %v4746_v25  ;;  %v4851_v9 = vunpack.c.l.bf16 %v4747_v49  ;;  %v4852_v54 = vunpack.c.l.bf16 %v4748_v30 }
 0x44d   : > { %v12050_v8 = vpop.eup %9993  ;;  %5145 = vadd.xlane.f32.xlu1 %v5144_v32  ;;  %10007 = vtanh.f32 %v8785_v19  ;;  %v4999_v20 = vmul.f32 %v11478_v10, %v4849_v48  ;;  %v4854_v37 = vunpack.c.h.bf16 %v4746_v25  ;;  %v4855_v56 = vunpack.c.h.bf16 %v4747_v49 }
 0x44e   : > { %v12053_v24 = vpop.eup %9995  ;;  %10009 = vtanh.f32 %v8722_v23  ;;  %v5000_v42 = vmul.f32 %v11481_v4, %v4850_v17  ;;  %v5001_v58 = vmul.f32 %v11484_v35, %v4851_v9  ;;  %v5002_v7 = vmul.f32 %v11489_v62, %v4852_v54 }
 0x44f   : > { %10011 = vtanh.f32 %v8786_v13  ;;  %v4856_v34 = vunpack.c.h.bf16 %v4748_v30  ;;  %v5003_v57 = vmul.f32 %v11478_v10, %v4853_v21  ;;  %v5004_v31 = vmul.f32 %v11481_v4, %v4854_v37 }
 0x450   : > { %v5147_v16 = vadd.f32 %v5000_v42, %v4999_v20  ;;  %v5005_v51 = vmul.f32 %v11484_v35, %v4855_v56  ;;  %v8723_v19 = vadd.f32 %v11929_v55, %v11447_v44  ;;  %v8787_v43 = vadd.f32 %v11931_v5, %v11450_v47 }
 0x451   : > { %v5006_v23 = vmul.f32 %v11489_v62, %v4856_v34  ;;  %v8724_v13 = vadd.f32 %v11935_v40, %v11453_v41  ;;  %v8788_v61 = vadd.f32 %v11937_v39, %v11456_v27  ;;  %v5152_v49 = vadd.f32 %v5004_v31, %v5003_v57 }
 0x452   : > { %v12070_v45 = vpop.eup %9997  ;;  %v5148_v25 = vadd.f32 %v5147_v16, %v5001_v58  ;;  %10013 = vtanh.f32 %v8723_v19  ;;  %v8725_v32 = vadd.f32 %v11943_v12, %v11447_v44  ;;  %v8789_v5 = vadd.f32 %v11945_v59, %v11450_v47 }
 0x453   : > { %v12074_v55 = vpop.eup %9999  ;;  %10015 = vtanh.f32 %v8787_v43  ;;  %v8726_v40 = vadd.f32 %v11954_v15, %v11453_v41  ;;  %v8790_v39 = vadd.f32 %v11956_v6, %v11456_v27  ;;  %v5153_v17 = vadd.f32 %v5152_v49, %v5005_v51 }
 0x454   : > { %v12082_v30 = vpop.eup %10001  ;;  %v5149_v48 = vadd.f32 %v5148_v25, %v5002_v7  ;;  %10017 = vtanh.f32 %v8724_v13  ;;  %v4749_v12 = vpack.c.bf16 %v11982_v26, %v11958_v38  ;;  %v4750_v59 = vpack.c.bf16 %v11994_v3, %v11970_v11 }
 0x455   : > { %v12086_v9 = vpop.eup %10003  ;;  %10019 = vtanh.f32 %v8788_v61  ;;  %v4751_v15 = vpack.c.bf16 %v11988_v52, %v11962_v46  ;;  %v4752_v6 = vpack.c.bf16 %v12001_v53, %v11974_v18  ;;  %v5154_v54 = vadd.f32 %v5153_v17, %v5006_v23 }
 0x456   : > { %v12094_v21 = vpop.eup %10005  ;;  %5150 = vadd.xlane.f32.xlu0 %v5149_v48  ;;  %10021 = vtanh.f32 %v8725_v32  ;;  %v4857_v20 = vunpack.c.l.bf16 %v4749_v12  ;;  %v8727_v38 = vadd.f32 %v11984_v1, %v11447_v44  ;;  %v4858_v37 = vunpack.c.l.bf16 %v4750_v59  ;;  %v13160_v32 = vld [vmem:[#allocation14_spill] sm:$0xff] }
 0x457   : > { %v12098_v26 = vpop.eup %10007  ;;  %10023 = vtanh.f32 %v8789_v5  ;;  %v4859_v11 = vunpack.c.l.bf16 %v4751_v15  ;;  %v4860_v3 = vunpack.c.l.bf16 %v4752_v6  ;;  %5155 = vadd.xlane.f32.xlu1 %v5154_v54  ;;  %v8791_v18 = vadd.f32 %v11986_v36, %v11450_v47 }
 0x458   : > { %v12100_v42 = vpop.eup %10009  ;;  %10025 = vtanh.f32 %v8726_v40  ;;  %v5007_v46 = vmul.f32 %v11478_v10, %v4857_v20  ;;  %v8728_v52 = vadd.f32 %v11990_v22, %v11453_v41  ;;  %v5008_v1 = vmul.f32 %v11481_v4, %v4858_v37 }
 0x459   : > { %v12107_v53 = vpop.eup %10011  ;;  %10027 = vtanh.f32 %v8790_v39  ;;  %v5009_v58 = vmul.f32 %v11484_v35, %v4859_v11  ;;  %v5010_v56 = vmul.f32 %v11489_v62, %v4860_v3  ;;  %v8792_v7 = vadd.f32 %v11992_v63, %v11456_v27 }
 0x45a   : > { %10029 = vtanh.f32 %v8727_v38  ;;  %v4861_v34 = vunpack.c.h.bf16 %v4749_v12  ;;  %v4862_v57 = vunpack.c.h.bf16 %v4750_v59  ;;  %v5157_v16 = vadd.f32 %v5008_v1, %v5007_v46 }
 0x45b   : > { %10031 = vtanh.f32 %v8791_v18  ;;  %v4863_v36 = vunpack.c.h.bf16 %v4751_v15  ;;  %v4864_v31 = vunpack.c.h.bf16 %v4752_v6  ;;  %v8729_v23 = vadd.f32 %v11997_v50, %v11447_v44  ;;  %v13161_v50 = vld [vmem:[#allocation13_spill] sm:$0xff] }
 0x45c   : > { %v12114_v22 = vpop.eup %10013  ;;  %10033 = vtanh.f32 %v8728_v52  ;;  %v5011_v51 = vmul.f32 %v11478_v10, %v4861_v34  ;;  %v5012_v19 = vmul.f32 %v11481_v4, %v4862_v57  ;;  %v5158_v13 = vadd.f32 %v5157_v16, %v5009_v58 }
 0x45d   : > { %v12120_v43 = vpop.eup %10015  ;;  %10035 = vtanh.f32 %v8792_v7  ;;  %v5013_v63 = vmul.f32 %v11484_v35, %v4863_v36  ;;  %v5014_v61 = vmul.f32 %v11489_v62, %v4864_v31  ;;  %v8793_v5 = vadd.f32 %v13160_v32, %v11450_v47 }
 0x45e   : > { %v12124_v25 = vpop.eup %10017  ;;  %v5162_v49 = vadd.f32 %v5012_v19, %v5011_v51  ;;  %10037 = vtanh.f32 %v8729_v23  ;;  %v8730_v40 = vadd.f32 %v12006_v2, %v11453_v41  ;;  %v5159_v44 = vadd.f32 %v5158_v13, %v5010_v56 }
 0x45f   : > { %v12130_v39 = vpop.eup %10019  ;;  %v8794_v48 = vadd.f32 %v13161_v50, %v11456_v27  ;;  %v4753_v17 = vpack.c.bf16 %v12044_v14, %v12019_v33  ;;  %v4754_v12 = vpack.c.bf16 %v12050_v8, %v12032_v28  ;;  %10039 = vtanh.f32 %v8793_v5 }
 0x460   : > { %v12138_v59 = vpop.eup %10021  ;;  %v5163_v15 = vadd.f32 %v5162_v49, %v5013_v63  ;;  %v4755_v47 = vpack.c.bf16 %v12048_v60, %v12026_v0  ;;  %v4756_v41 = vpack.c.bf16 %v12053_v24, %v12038_v29  ;;  %5160 = vadd.xlane.f32.xlu0 %v5159_v44  ;;  %10041 = vtanh.f32 %v8730_v40 }
 0x461   : > { %v12144_v2 = vpop.eup %10023  ;;  %v4865_v27 = vunpack.c.l.bf16 %v4753_v17  ;;  %v4866_v6 = vunpack.c.l.bf16 %v4754_v12  ;;  %v4869_v33 = vunpack.c.h.bf16 %v4753_v17  ;;  %10043 = vtanh.f32 %v8794_v48 }
 0x462   : > { %v10026_v14 = vpop.eup %10025  ;;  %v5164_v54 = vadd.f32 %v5163_v15, %v5014_v61  ;;  %v4867_v28 = vunpack.c.l.bf16 %v4755_v47  ;;  %v4868_v8 = vunpack.c.l.bf16 %v4756_v41  ;;  %v4870_v60 = vunpack.c.h.bf16 %v4754_v12 }
 0x463   : > { %v10028_v20 = vpop.eup %10027  ;;  %v5015_v38 = vmul.f32 %v11478_v10, %v4865_v27  ;;  %v5016_v0 = vmul.f32 %v11481_v4, %v4866_v6  ;;  %v4871_v37 = vunpack.c.h.bf16 %v4755_v47  ;;  %v4872_v3 = vunpack.c.h.bf16 %v4756_v41 }
 0x464   : > { %v10030_v29 = vpop.eup %10029  ;;  %v5017_v24 = vmul.f32 %v11484_v35, %v4867_v28  ;;  %v5018_v11 = vmul.f32 %v11489_v62, %v4868_v8  ;;  %v5019_v46 = vmul.f32 %v11478_v10, %v4869_v33  ;;  %5165 = vadd.xlane.f32.xlu0 %v5164_v54  ;;  %v5020_v1 = vmul.f32 %v11481_v4, %v4870_v60 }
 0x465   : > { %v12151_v18 = vpop.eup %10031  ;;  %v5167_v52 = vadd.f32 %v5016_v0, %v5015_v38  ;;  %v5021_v58 = vmul.f32 %v11484_v35, %v4871_v37  ;;  %v4757_v56 = vpack.c.bf16 %v12094_v21, %v12070_v45  ;;  %v5022_v34 = vmul.f32 %v11489_v62, %v4872_v3 }
 0x466   : > { %v12157_v7 = vpop.eup %10033  ;;  %v4758_v57 = vpack.c.bf16 %v12100_v42, %v12082_v30  ;;  %v4759_v16 = vpack.c.bf16 %v12098_v26, %v12074_v55  ;;  %v4760_v36 = vpack.c.bf16 %v12107_v53, %v12086_v9  ;;  %v5172_v19 = vadd.f32 %v5020_v1, %v5019_v46 }
 0x467   : > { %v12166_v31 = vpop.eup %10035  ;;  %v5168_v51 = vadd.f32 %v5167_v52, %v5017_v24  ;;  %v4873_v23 = vunpack.c.l.bf16 %v4757_v56  ;;  %v4877_v13 = vunpack.c.h.bf16 %v4757_v56  ;;  %v4761_v27 = vpack.c.bf16 %v12138_v59, %v12114_v22 }
 0x468   : > { %v10038_v45 = vpop.eup %10037  ;;  %v4874_v21 = vunpack.c.l.bf16 %v4758_v57  ;;  %v4875_v63 = vunpack.c.l.bf16 %v4759_v16  ;;  %v4876_v61 = vunpack.c.l.bf16 %v4760_v36  ;;  %v4878_v49 = vunpack.c.h.bf16 %v4758_v57 }
 0x469   : > { %v5169_v32 = vadd.f32 %v5168_v51, %v5018_v11  ;;  %v5173_v5 = vadd.f32 %v5172_v19, %v5021_v58  ;;  %v5023_v30 = vmul.f32 %v11478_v10, %v4873_v23  ;;  %v4879_v42 = vunpack.c.h.bf16 %v4759_v16  ;;  %v10040_v55 = vpop.eup %10039 }
 0x46a   : > { %v5024_v26 = vmul.f32 %v11481_v4, %v4874_v21  ;;  %v5025_v9 = vmul.f32 %v11484_v35, %v4875_v63  ;;  %v5026_v53 = vmul.f32 %v11489_v62, %v4876_v61  ;;  %v4880_v40 = vunpack.c.h.bf16 %v4760_v36  ;;  %v10042_v44 = vpop.eup %10041 }
 0x46b   : > { %5170 = vadd.xlane.f32.xlu0 %v5169_v32  ;;  %v5174_v50 = vadd.f32 %v5173_v5, %v5022_v34  ;;  %v5027_v48 = vmul.f32 %v11478_v10, %v4877_v13  ;;  %v5028_v17 = vmul.f32 %v11481_v4, %v4878_v49  ;;  %v5029_v12 = vmul.f32 %v11484_v35, %v4879_v42  ;;  %v10044_v15 = vpop.eup %10043 }
 0x46c   : > { %v5177_v47 = vadd.f32 %v5024_v26, %v5023_v30  ;;  %v5030_v41 = vmul.f32 %v11489_v62, %v4880_v40  ;;  %v4762_v6 = vpack.c.bf16 %v10026_v14, %v12124_v25  ;;  %v4763_v54 = vpack.c.bf16 %v12144_v2, %v12120_v43  ;;  %v5211_v30 = vpop.permute.xlu1 %5210 }
 0x46d   : > { %v5182_v33 = vadd.f32 %v5028_v17, %v5027_v48  ;;  %v4764_v28 = vpack.c.bf16 %v10028_v20, %v12130_v39  ;;  %v4765_v8 = vpack.c.bf16 %v10038_v45, %v10030_v29  ;;  %v4881_v0 = vunpack.c.l.bf16 %v4761_v27 }
 0x46e   : > { %v5178_v38 = vadd.f32 %v5177_v47, %v5025_v9  ;;  %v4882_v60 = vunpack.c.l.bf16 %v4762_v6  ;;  %v4885_v37 = vunpack.c.h.bf16 %v4761_v27  ;;  %v4883_v11 = vunpack.c.l.bf16 %v4763_v54 }
 0x46f   : > { %5175 = vadd.xlane.f32.xlu0 %v5174_v50  ;;  %v5183_v24 = vadd.f32 %v5182_v33, %v5029_v12  ;;  %v4884_v3 = vunpack.c.l.bf16 %v4764_v28  ;;  %v4886_v46 = vunpack.c.h.bf16 %v4762_v6  ;;  %v5031_v22 = vmul.f32 %v11478_v10, %v4881_v0  ;;  %v13162_v50 = vld [vmem:[#allocation10_spill] sm:$0xff]  ;;  %v13163_v12 = vld [vmem:[#allocation9_spill] sm:$0xff] }
 0x470   : > { %v5179_v52 = vadd.f32 %v5178_v38, %v5026_v53  ;;  %v5032_v25 = vmul.f32 %v11481_v4, %v4882_v60  ;;  %v4887_v59 = vunpack.c.h.bf16 %v4763_v54  ;;  %v5033_v43 = vmul.f32 %v11484_v35, %v4883_v11  ;;  %v13164_v60 = vld [vmem:[#allocation11_spill] sm:$0xff] }
 0x471   : > { %v5184_v14 = vadd.f32 %v5183_v24, %v5030_v41  ;;  %v5034_v39 = vmul.f32 %v11489_v62, %v4884_v3  ;;  %v4888_v2 = vunpack.c.h.bf16 %v4764_v28  ;;  %v5035_v29 = vmul.f32 %v11478_v10, %v4885_v37  ;;  %v13165_v24 = vld [vmem:[#allocation28_spill] sm:$0xff] }
 0x472   : > { %v5187_v20 = vadd.f32 %v5032_v25, %v5031_v22  ;;  %v5036_v1 = vmul.f32 %v11481_v4, %v4886_v46  ;;  %v5037_v58 = vmul.f32 %v11484_v35, %v4887_v59  ;;  %v4766_v34 = vpack.c.bf16 %v10042_v44, %v12157_v7  ;;  %v13166_v46 = vld [vmem:[#allocation29_spill] sm:$0xff] }
 0x473   : > { %5180 = vadd.xlane.f32.xlu0 %v5179_v52  ;;  %5185 = vadd.xlane.f32.xlu1 %v5184_v14  ;;  %v5038_v56 = vmul.f32 %v11489_v62, %v4888_v2  ;;  %v4767_v57 = vpack.c.bf16 %v10040_v55, %v12151_v18  ;;  %v4889_v16 = vunpack.c.l.bf16 %v4765_v8  ;;  %v4768_v19 = vpack.c.bf16 %v10044_v15, %v12166_v31 }
 0x474   : > { %v5188_v36 = vadd.f32 %v5187_v20, %v5033_v43  ;;  %v5192_v51 = vadd.f32 %v5036_v1, %v5035_v29  ;;  %v4893_v23 = vunpack.c.h.bf16 %v4765_v8  ;;  %v4890_v13 = vunpack.c.l.bf16 %v4766_v34 }
 0x475   : > { %v4891_v45 = vunpack.c.l.bf16 %v4767_v57  ;;  %v5039_v21 = vmul.f32 %v11478_v10, %v4889_v16  ;;  %v4894_v63 = vunpack.c.h.bf16 %v4766_v34  ;;  %v4892_v32 = vunpack.c.l.bf16 %v4768_v19 }
 0x476   : > { %v5189_v61 = vadd.f32 %v5188_v36, %v5034_v39  ;;  %v5193_v49 = vadd.f32 %v5192_v51, %v5037_v58  ;;  %v4895_v5 = vunpack.c.h.bf16 %v4767_v57  ;;  %v5040_v7 = vmul.f32 %v11481_v4, %v4890_v13  ;;  %v5056_v9 = vpop.xlane.xlu0 %5055 }
 0x477   : > { %v5043_v18 = vmul.f32 %v11478_v10, %v4893_v23  ;;  %v5041_v55 = vmul.f32 %v11484_v35, %v4891_v45  ;;  %v4896_v31 = vunpack.c.h.bf16 %v4768_v19  ;;  %v5044_v26 = vmul.f32 %v11481_v4, %v4894_v63 }
 0x478   : > { %5190 = vadd.xlane.f32.xlu0 %v5189_v61  ;;  %v5194_v42 = vadd.f32 %v5193_v49, %v5038_v56  ;;  %v5042_v53 = vmul.f32 %v11489_v62, %v4892_v32  ;;  %v5197_v40 = vadd.f32 %v5040_v7, %v5039_v21  ;;  %v5045_v44 = vmul.f32 %v11484_v35, %v4895_v5 }
 0x479   : > { %v12201_v48 = vrot.slane %v5211_v30, %v13162_v50  ;;  %v5202_v17 = vadd.f32 %v5044_v26, %v5043_v18  ;;  %v12204_v15 = vsub.s32 4, %v13163_v12  ;;  %v12207_v10 = vsub.s32 5, %v13163_v12 }
 0x47a   : > { %v12210_v47 = vsub.s32 6, %v13163_v12  ;;  %v5198_v4 = vadd.f32 %v5197_v40, %v5041_v55  ;;  %v5051_v27 = vpop.xlane.xlu1 %5050  ;;  %v12214_v6 = vsub.s32 7, %v13163_v12  ;;  %v5046_v35 = vmul.f32 %v11489_v62, %v4896_v31 }
 0x47b   : > { %v5218_v41 = vadd.f32 %v12201_v48, %v5056_v9  ;;  %v5203_v33 = vadd.f32 %v5202_v17, %v5045_v44  ;;  %v5217_v54 = vadd.f32 %v12201_v48, %v5051_v27  ;;  %v10146_v28 = vmov 1966171168  }
 0x47c   : > { %5195 = vadd.xlane.f32.xlu0 %v5194_v42  ;;  %v6310_v8 = vunpack.c.l.s4 %v10146_v28  ;;  %v5199_v38 = vadd.f32 %v5198_v4, %v5042_v53 }
 0x47d   : > { %v5316_v0 = vrot.slane %v5218_v41, %v13162_v50  ;;  %v5320_v37 = vrot.slane %v5218_v41, %v13164_v60  ;;  %v5324_v11 = vrot.slane %v5218_v41, %v13165_v24  ;;  %v5204_v3 = vadd.f32 %v5203_v33, %v5046_v35 }
 0x47e   : > { %v5328_v52 = vrot.slane %v5218_v41, %v13166_v46  ;;  %v5332_v22 = vrot.slane %v5218_v41, %v12204_v15  ;;  %v5336_v25 = vrot.slane %v5218_v41, %v12207_v10  ;;  %v5340_v62 = vrot.slane %v5218_v41, %v12210_v47 }
 0x47f   : > { %v5344_v59 = vrot.slane %v5218_v41, %v12214_v6  ;;  %v6311_v14 = vunpack.c.0.s8 %v6310_v8  ;;  %v6354_v43 = vcombine.low %v5316_v0, %v5320_v37  ;;  %v5284_v20 = vrot.slane %v5217_v54, %v13162_v50 }
 0x480   : > { %5200 = vadd.xlane.f32.xlu0 %v5199_v38  ;;  %v6355_v39 = vcombine.low %v5324_v11, %v5328_v52  ;;  %v6356_v2 = vcombine.low %v5332_v22, %v5336_v25  ;;  %v5288_v29 = vrot.slane %v5217_v54, %v13164_v60  ;;  %v5292_v56 = vrot.slane %v5217_v54, %v13165_v24 }
 0x481   : > { %v12229_v1 = vsub.s32 %v6311_v14, %v13163_v12  ;;  %v6357_v58 = vcombine.low %v5340_v62, %v5344_v59  ;;  %v5296_v34 = vrot.slane %v5217_v54, %v13166_v46  ;;  %v5300_v57 = vrot.slane %v5217_v54, %v12204_v15 }
 0x482   : > { %v5304_v16 = vrot.slane %v5217_v54, %v12207_v10  ;;  %v5308_v36 = vrot.slane %v5217_v54, %v12210_v47  ;;  %v5312_v51 = vrot.slane %v5217_v54, %v12214_v6  ;;  %v5061_v19 = vpop.xlane.xlu0 %5060  ;;  %v6305_v61 = vcombine.low %v5284_v20, %v5288_v29 }
 0x483   : > { %v6364_v23 = vrot.slane %v6354_v43, %v12229_v1  ;;  %v6371_v13 = vrot.slane %v6355_v39, %v12229_v1  ;;  %v6378_v45 = vrot.slane %v6356_v2, %v12229_v1  ;;  %v6385_v21 = vrot.slane %v6357_v58, %v12229_v1 }
 0x484   : > { %5205 = vadd.xlane.f32.xlu0 %v5204_v3  ;;  %v5219_v63 = vadd.f32 %v12201_v48, %v5061_v19  ;;  %v6306_v49 = vcombine.low %v5292_v56, %v5296_v34  ;;  %v6307_v32 = vcombine.low %v5300_v57, %v5304_v16  ;;  %v6308_v7 = vcombine.low %v5308_v36, %v5312_v51 }
 0x485   : > { %v6386_v5 = vcombine.low %v6364_v23, %v6371_v13  ;;  %v6387_v30 = vcombine.low %v6378_v45, %v6385_v21  ;;  %v5066_v18 = vpop.xlane.xlu1 %5065  ;;  %v6315_v42 = vrot.slane %v6305_v61, %v12229_v1 }
 0x486   : > { %v6322_v55 = vrot.slane %v6306_v49, %v12229_v1  ;;  %v6329_v31 = vrot.slane %v6307_v32, %v12229_v1  ;;  %v5348_v26 = vrot.slane %v5219_v63, %v13162_v50  ;;  %v5220_v9 = vadd.f32 %v12201_v48, %v5066_v18 }
 0x487   : > { %v6394_v53 = vrot.slane %v6386_v5, %v12229_v1  ;;  %v6401_v40 = vrot.slane %v6387_v30, %v12229_v1  ;;  %v6336_v44 = vrot.slane %v6308_v7, %v12229_v1  ;;  %v5352_v4 = vrot.slane %v5219_v63, %v13164_v60 }
 0x488   : > { %v6337_v17 = vcombine.low %v6315_v42, %v6322_v55  ;;  %v5356_v41 = vrot.slane %v5219_v63, %v13165_v24  ;;  %v5360_v27 = vrot.slane %v5219_v63, %v13166_v46  ;;  %v5364_v54 = vrot.slane %v5219_v63, %v12204_v15 }
 0x489   : > { %v6402_v35 = vcombine.low %v6394_v53, %v6401_v40  ;;  %v6338_v33 = vcombine.low %v6329_v31, %v6336_v44  ;;  %v5368_v28 = vrot.slane %v5219_v63, %v12207_v10  ;;  %v5372_v38 = vrot.slane %v5219_v63, %v12210_v47 }
 0x48a   : > { %v6345_v8 = vrot.slane %v6337_v17, %v12229_v1  ;;  %v5376_v0 = vrot.slane %v5219_v63, %v12214_v6  ;;  %v6403_v37 = vcombine.low %v5348_v26, %v5352_v4  ;;  %v6404_v3 = vcombine.low %v5356_v41, %v5360_v27 }
 0x48b   : > { %7877 = vperm.xlu1 %9147, %v6402_v35   ;;  %v6352_v11 = vrot.slane %v6338_v33, %v12229_v1  ;;  %v6405_v52 = vcombine.low %v5364_v54, %v5368_v28  ;;  %v5380_v22 = vrot.slane %v5220_v9, %v13162_v50  ;;  %v5384_v59 = vrot.slane %v5220_v9, %v13164_v60 }
 0x48c   : > { %v6406_v25 = vcombine.low %v5372_v38, %v5376_v0  ;;  %v6413_v62 = vrot.slane %v6403_v37, %v12229_v1  ;;  %v5388_v14 = vrot.slane %v5220_v9, %v13165_v24  ;;  %v6420_v43 = vrot.slane %v6404_v3, %v12229_v1 }
 0x48d   : > { %v6427_v39 = vrot.slane %v6405_v52, %v12229_v1  ;;  %v5392_v2 = vrot.slane %v5220_v9, %v13166_v46  ;;  %v5396_v29 = vrot.slane %v5220_v9, %v12204_v15  ;;  %v5400_v58 = vrot.slane %v5220_v9, %v12207_v10 }
 0x48e   : > { %v6434_v20 = vrot.slane %v6406_v25, %v12229_v1  ;;  %v5404_v56 = vrot.slane %v5220_v9, %v12210_v47  ;;  %v5071_v34 = vpop.xlane.xlu0 %5070  ;;  %v6435_v57 = vcombine.low %v6413_v62, %v6420_v43  ;;  %v5408_v16 = vrot.slane %v5220_v9, %v12214_v6 }
 0x48f   : > { %v6452_v36 = vcombine.low %v5380_v22, %v5384_v59  ;;  %v6453_v51 = vcombine.low %v5388_v14, %v5392_v2  ;;  %v6353_v19 = vcombine.low %v6345_v8, %v6352_v11  ;;  %v5221_v23 = vadd.f32 %v12201_v48, %v5071_v34 }
 0x490   : > { %v6436_v13 = vcombine.low %v6427_v39, %v6434_v20  ;;  %v6454_v45 = vcombine.low %v5396_v29, %v5400_v58  ;;  %v6443_v63 = vrot.slane %v6435_v57, %v12229_v1  ;;  %v6455_v61 = vcombine.low %v5404_v56, %v5408_v16 }
 0x491   : > { %v5076_v21 = vpop.xlane.xlu1 %5075  ;;  %v6462_v49 = vrot.slane %v6452_v36, %v12229_v1  ;;  %v6469_v32 = vrot.slane %v6453_v51, %v12229_v1  ;;  %v5412_v18 = vrot.slane %v5221_v23, %v13162_v50  ;;  %v5416_v31 = vrot.slane %v5221_v23, %v13164_v60 }
 0x492   : > { %v5222_v5 = vadd.f32 %v12201_v48, %v5076_v21  ;;  %v6450_v30 = vrot.slane %v6436_v13, %v12229_v1  ;;  %v6476_v7 = vrot.slane %v6454_v45, %v12229_v1  ;;  %v6483_v42 = vrot.slane %v6455_v61, %v12229_v1 }
 0x493   : > { %v6484_v55 = vcombine.low %v6462_v49, %v6469_v32  ;;  %v5420_v26 = vrot.slane %v5221_v23, %v13165_v24  ;;  %v5424_v53 = vrot.slane %v5221_v23, %v13166_v46  ;;  %v5428_v40 = vrot.slane %v5221_v23, %v12204_v15 }
 0x494   : > { %v6451_v9 = vcombine.low %v6443_v63, %v6450_v30  ;;  %v5432_v44 = vrot.slane %v5221_v23, %v12207_v10  ;;  %v6485_v17 = vcombine.low %v6476_v7, %v6483_v42  ;;  %v5436_v41 = vrot.slane %v5221_v23, %v12210_v47 }
 0x495   : > { %v6492_v4 = vrot.slane %v6484_v55, %v12229_v1  ;;  %v5440_v27 = vrot.slane %v5221_v23, %v12214_v6  ;;  %v6501_v35 = vcombine.low %v5412_v18, %v5416_v31  ;;  %v6502_v33 = vcombine.low %v5420_v26, %v5424_v53 }
 0x496   : > { %7880 = vperm.xlu1 %9147, %v6451_v9   ;;  %v6503_v54 = vcombine.low %v5428_v40, %v5432_v44  ;;  %v5444_v28 = vrot.slane %v5222_v5, %v13162_v50  ;;  %v6499_v8 = vrot.slane %v6485_v17, %v12229_v1  ;;  %v5448_v0 = vrot.slane %v5222_v5, %v13164_v60 }
 0x497   : > { %v6504_v38 = vcombine.low %v5436_v41, %v5440_v27  ;;  %v5452_v37 = vrot.slane %v5222_v5, %v13165_v24  ;;  %v6511_v11 = vrot.slane %v6501_v35, %v12229_v1  ;;  %v6518_v3 = vrot.slane %v6502_v33, %v12229_v1 }
 0x498   : > { %v6525_v52 = vrot.slane %v6503_v54, %v12229_v1  ;;  %v5456_v22 = vrot.slane %v5222_v5, %v13166_v46  ;;  %v6500_v25 = vcombine.low %v6492_v4, %v6499_v8  ;;  %v5460_v59 = vrot.slane %v5222_v5, %v12204_v15 }
 0x499   : > { %v6532_v62 = vrot.slane %v6504_v38, %v12229_v1  ;;  %v5464_v14 = vrot.slane %v5222_v5, %v12207_v10  ;;  %v5081_v43 = vpop.xlane.xlu0 %5080  ;;  %v6533_v39 = vcombine.low %v6511_v11, %v6518_v3  ;;  %v5468_v2 = vrot.slane %v5222_v5, %v12210_v47 }
 0x49a   : > { %7874 = vperm.xlu0 %9148, %v6353_v19   ;;  %v5472_v20 = vrot.slane %v5222_v5, %v12214_v6  ;;  %v6550_v29 = vcombine.low %v5444_v28, %v5448_v0  ;;  %v5223_v58 = vadd.f32 %v12201_v48, %v5081_v43  ;;  %7883 = vperm.xlu1 %9147, %v6500_v25  }
 0x49b   : > { %v5086_v56 = vpop.xlane.xlu1 %5085  ;;  %v6534_v34 = vcombine.low %v6525_v52, %v6532_v62  ;;  %v6551_v57 = vcombine.low %v5452_v37, %v5456_v22  ;;  %v6552_v16 = vcombine.low %v5460_v59, %v5464_v14  ;;  %v6541_v51 = vrot.slane %v6533_v39, %v12229_v1 }
 0x49c   : > { %v5224_v36 = vadd.f32 %v12201_v48, %v5086_v56  ;;  %v6553_v23 = vcombine.low %v5468_v2, %v5472_v20  ;;  %v6560_v19 = vrot.slane %v6550_v29, %v12229_v1  ;;  %v5476_v63 = vrot.slane %v5223_v58, %v13162_v50 }
 0x49d   : > { %v6548_v13 = vrot.slane %v6534_v34, %v12229_v1  ;;  %v6567_v45 = vrot.slane %v6551_v57, %v12229_v1  ;;  %v6574_v21 = vrot.slane %v6552_v16, %v12229_v1  ;;  %v5480_v49 = vrot.slane %v5223_v58, %v13164_v60 }
 0x49e   : > { %v6581_v61 = vrot.slane %v6553_v23, %v12229_v1  ;;  %v5484_v32 = vrot.slane %v5223_v58, %v13165_v24  ;;  %v5488_v5 = vrot.slane %v5223_v58, %v13166_v46  ;;  %v5492_v18 = vrot.slane %v5223_v58, %v12204_v15 }
 0x49f   : > { %v6549_v30 = vcombine.low %v6541_v51, %v6548_v13  ;;  %v6582_v7 = vcombine.low %v6560_v19, %v6567_v45  ;;  %v5496_v42 = vrot.slane %v5223_v58, %v12207_v10  ;;  %v5500_v31 = vrot.slane %v5223_v58, %v12210_v47 }
 0x4a0   : > { %v6583_v55 = vcombine.low %v6574_v21, %v6581_v61  ;;  %v5504_v26 = vrot.slane %v5223_v58, %v12214_v6  ;;  %v6599_v9 = vcombine.low %v5476_v63, %v5480_v49  ;;  %v6600_v40 = vcombine.low %v5484_v32, %v5488_v5 }
 0x4a1   : > { %7886 = vperm.xlu1 %9147, %v6549_v30   ;;  %v6590_v53 = vrot.slane %v6582_v7, %v12229_v1  ;;  %v6601_v44 = vcombine.low %v5492_v18, %v5496_v42  ;;  %v5508_v17 = vrot.slane %v5224_v36, %v13162_v50  ;;  %v5512_v35 = vrot.slane %v5224_v36, %v13164_v60 }
 0x4a2   : > { %v6597_v4 = vrot.slane %v6583_v55, %v12229_v1  ;;  %v6602_v41 = vcombine.low %v5500_v31, %v5504_v26  ;;  %v6609_v27 = vrot.slane %v6599_v9, %v12229_v1  ;;  %v6616_v33 = vrot.slane %v6600_v40, %v12229_v1 }
 0x4a3   : > { %v6623_v54 = vrot.slane %v6601_v44, %v12229_v1  ;;  %v5516_v28 = vrot.slane %v5224_v36, %v13165_v24  ;;  %v5520_v8 = vrot.slane %v5224_v36, %v13166_v46  ;;  %v5524_v11 = vrot.slane %v5224_v36, %v12204_v15 }
 0x4a4   : > { %v5091_v38 = vpop.xlane.xlu0 %5090  ;;  %v6598_v0 = vcombine.low %v6590_v53, %v6597_v4  ;;  %v6630_v37 = vrot.slane %v6602_v41, %v12229_v1  ;;  %v5528_v3 = vrot.slane %v5224_v36, %v12207_v10  ;;  %v6631_v22 = vcombine.low %v6609_v27, %v6616_v33 }
 0x4a5   : > { %v5225_v52 = vadd.f32 %v12201_v48, %v5091_v38  ;;  %v5532_v25 = vrot.slane %v5224_v36, %v12210_v47  ;;  %v5536_v62 = vrot.slane %v5224_v36, %v12214_v6  ;;  %v5096_v59 = vpop.xlane.xlu1 %5095  ;;  %v6648_v43 = vcombine.low %v5508_v17, %v5512_v35 }
 0x4a6   : > { %7889 = vperm.xlu1 %9147, %v6598_v0   ;;  %v6632_v14 = vcombine.low %v6623_v54, %v6630_v37  ;;  %v6649_v39 = vcombine.low %v5516_v28, %v5520_v8  ;;  %v6650_v2 = vcombine.low %v5524_v11, %v5528_v3  ;;  %v5226_v20 = vadd.f32 %v12201_v48, %v5096_v59 }
 0x4a7   : > { %v6639_v29 = vrot.slane %v6631_v22, %v12229_v1  ;;  %v6651_v58 = vcombine.low %v5532_v25, %v5536_v62  ;;  %v5540_v56 = vrot.slane %v5225_v52, %v13162_v50  ;;  %v6658_v57 = vrot.slane %v6648_v43, %v12229_v1 }
 0x4a8   : > { %v6646_v34 = vrot.slane %v6632_v14, %v12229_v1  ;;  %v6665_v16 = vrot.slane %v6649_v39, %v12229_v1  ;;  %v6672_v36 = vrot.slane %v6650_v2, %v12229_v1  ;;  %v5544_v23 = vrot.slane %v5225_v52, %v13164_v60 }
 0x4a9   : > { %v6679_v51 = vrot.slane %v6651_v58, %v12229_v1  ;;  %v5548_v19 = vrot.slane %v5225_v52, %v13165_v24  ;;  %v5552_v13 = vrot.slane %v5225_v52, %v13166_v46  ;;  %v5556_v63 = vrot.slane %v5225_v52, %v12204_v15 }
 0x4aa   : > { %v6647_v45 = vcombine.low %v6639_v29, %v6646_v34  ;;  %v6680_v21 = vcombine.low %v6658_v57, %v6665_v16  ;;  %v5560_v61 = vrot.slane %v5225_v52, %v12207_v10  ;;  %v5564_v32 = vrot.slane %v5225_v52, %v12210_v47 }
 0x4ab   : > { %v6681_v49 = vcombine.low %v6672_v36, %v6679_v51  ;;  %v5568_v5 = vrot.slane %v5225_v52, %v12214_v6  ;;  %v6697_v30 = vcombine.low %v5540_v56, %v5544_v23  ;;  %v6698_v18 = vcombine.low %v5548_v19, %v5552_v13 }
 0x4ac   : > { %7892 = vperm.xlu1 %9147, %v6647_v45   ;;  %v6688_v7 = vrot.slane %v6680_v21, %v12229_v1  ;;  %v6699_v42 = vcombine.low %v5556_v63, %v5560_v61  ;;  %v5572_v55 = vrot.slane %v5226_v20, %v13162_v50  ;;  %v5576_v53 = vrot.slane %v5226_v20, %v13164_v60 }
 0x4ad   : > { %v6695_v31 = vrot.slane %v6681_v49, %v12229_v1  ;;  %v6700_v26 = vcombine.low %v5564_v32, %v5568_v5  ;;  %v6707_v9 = vrot.slane %v6697_v30, %v12229_v1  ;;  %v6714_v40 = vrot.slane %v6698_v18, %v12229_v1 }
 0x4ae   : > { %v6721_v44 = vrot.slane %v6699_v42, %v12229_v1  ;;  %v5580_v17 = vrot.slane %v5226_v20, %v13165_v24  ;;  %v5584_v4 = vrot.slane %v5226_v20, %v13166_v46  ;;  %v5101_v41 = vpop.xlane.xlu0 %5100  ;;  %v5588_v33 = vrot.slane %v5226_v20, %v12204_v15 }
 0x4af   : > { %v6696_v27 = vcombine.low %v6688_v7, %v6695_v31  ;;  %v6728_v35 = vrot.slane %v6700_v26, %v12229_v1  ;;  %v5592_v54 = vrot.slane %v5226_v20, %v12207_v10  ;;  %v5227_v28 = vadd.f32 %v12201_v48, %v5101_v41 }
 0x4b0   : > { %v5106_v8 = vpop.xlane.xlu1 %5105  ;;  %v6729_v38 = vcombine.low %v6707_v9, %v6714_v40  ;;  %v5596_v0 = vrot.slane %v5226_v20, %v12210_v47  ;;  %v5600_v37 = vrot.slane %v5226_v20, %v12214_v6  ;;  %v6746_v52 = vcombine.low %v5572_v55, %v5576_v53 }
 0x4b1   : > { %v5228_v11 = vadd.f32 %v12201_v48, %v5106_v8  ;;  %7895 = vperm.xlu1 %9147, %v6696_v27   ;;  %v6730_v3 = vcombine.low %v6721_v44, %v6728_v35  ;;  %v6747_v22 = vcombine.low %v5580_v17, %v5584_v4  ;;  %v6748_v62 = vcombine.low %v5588_v33, %v5592_v54 }
 0x4b2   : > { %v6737_v25 = vrot.slane %v6729_v38, %v12229_v1  ;;  %v6749_v59 = vcombine.low %v5596_v0, %v5600_v37  ;;  %v5604_v14 = vrot.slane %v5227_v28, %v13162_v50  ;;  %v6756_v39 = vrot.slane %v6746_v52, %v12229_v1 }
 0x4b3   : > { %v6744_v43 = vrot.slane %v6730_v3, %v12229_v1  ;;  %v6763_v2 = vrot.slane %v6747_v22, %v12229_v1  ;;  %v5608_v20 = vrot.slane %v5227_v28, %v13164_v60  ;;  %v6770_v29 = vrot.slane %v6748_v62, %v12229_v1 }
 0x4b4   : > { %v6777_v58 = vrot.slane %v6749_v59, %v12229_v1  ;;  %v5612_v56 = vrot.slane %v5227_v28, %v13165_v24  ;;  %v5616_v34 = vrot.slane %v5227_v28, %v13166_v46  ;;  %v5620_v36 = vrot.slane %v5227_v28, %v12204_v15 }
 0x4b5   : > { %v6745_v57 = vcombine.low %v6737_v25, %v6744_v43  ;;  %v6778_v16 = vcombine.low %v6756_v39, %v6763_v2  ;;  %v5624_v51 = vrot.slane %v5227_v28, %v12207_v10  ;;  %v5628_v19 = vrot.slane %v5227_v28, %v12210_v47 }
 0x4b6   : > { %v6779_v23 = vcombine.low %v6770_v29, %v6777_v58  ;;  %v5632_v13 = vrot.slane %v5227_v28, %v12214_v6  ;;  %v6795_v45 = vcombine.low %v5604_v14, %v5608_v20  ;;  %v6796_v63 = vcombine.low %v5612_v56, %v5616_v34 }
 0x4b7   : > { %7898 = vperm.xlu1 %9147, %v6745_v57   ;;  %v6786_v21 = vrot.slane %v6778_v16, %v12229_v1  ;;  %v6797_v61 = vcombine.low %v5620_v36, %v5624_v51  ;;  %v5636_v49 = vrot.slane %v5228_v11, %v13162_v50  ;;  %v5640_v7 = vrot.slane %v5228_v11, %v13164_v60 }
 0x4b8   : > { %v6793_v32 = vrot.slane %v6779_v23, %v12229_v1  ;;  %v6798_v5 = vcombine.low %v5628_v19, %v5632_v13  ;;  %v6805_v30 = vrot.slane %v6795_v45, %v12229_v1  ;;  %v6812_v42 = vrot.slane %v6796_v63, %v12229_v1 }
 0x4b9   : > { %v5111_v18 = vpop.xlane.xlu0 %5110  ;;  %v6819_v55 = vrot.slane %v6797_v61, %v12229_v1  ;;  %v5644_v31 = vrot.slane %v5228_v11, %v13165_v24  ;;  %v5648_v26 = vrot.slane %v5228_v11, %v13166_v46  ;;  %v5652_v44 = vrot.slane %v5228_v11, %v12204_v15 }
 0x4ba   : > { %v5229_v9 = vadd.f32 %v12201_v48, %v5111_v18  ;;  %v6794_v53 = vcombine.low %v6786_v21, %v6793_v32  ;;  %v6826_v40 = vrot.slane %v6798_v5, %v12229_v1  ;;  %v5116_v17 = vpop.xlane.xlu1 %5115  ;;  %v6827_v4 = vcombine.low %v6805_v30, %v6812_v42 }
 0x4bb   : > { %v5656_v41 = vrot.slane %v5228_v11, %v12207_v10  ;;  %v5660_v27 = vrot.slane %v5228_v11, %v12210_v47  ;;  %v5664_v35 = vrot.slane %v5228_v11, %v12214_v6  ;;  %v5230_v33 = vadd.f32 %v12201_v48, %v5116_v17 }
 0x4bc   : > { %7901 = vperm.xlu1 %9147, %v6794_v53   ;;  %v6828_v54 = vcombine.low %v6819_v55, %v6826_v40  ;;  %v6844_v28 = vcombine.low %v5636_v49, %v5640_v7  ;;  %v6845_v8 = vcombine.low %v5644_v31, %v5648_v26  ;;  %v6835_v38 = vrot.slane %v6827_v4, %v12229_v1 }
 0x4bd   : > { %v6846_v0 = vcombine.low %v5652_v44, %v5656_v41  ;;  %v6847_v37 = vcombine.low %v5660_v27, %v5664_v35  ;;  %v5668_v3 = vrot.slane %v5229_v9, %v13162_v50  ;;  %v5672_v11 = vrot.slane %v5229_v9, %v13164_v60 }
 0x4be   : > { %v6842_v52 = vrot.slane %v6828_v54, %v12229_v1  ;;  %v6854_v22 = vrot.slane %v6844_v28, %v12229_v1  ;;  %v6861_v25 = vrot.slane %v6845_v8, %v12229_v1  ;;  %v5676_v14 = vrot.slane %v5229_v9, %v13165_v24 }
 0x4bf   : > { %v6868_v62 = vrot.slane %v6846_v0, %v12229_v1  ;;  %v6875_v59 = vrot.slane %v6847_v37, %v12229_v1  ;;  %v5680_v43 = vrot.slane %v5229_v9, %v13166_v46  ;;  %v5684_v20 = vrot.slane %v5229_v9, %v12204_v15 }
 0x4c0   : > { %v6843_v39 = vcombine.low %v6835_v38, %v6842_v52  ;;  %v6876_v2 = vcombine.low %v6854_v22, %v6861_v25  ;;  %v5688_v29 = vrot.slane %v5229_v9, %v12207_v10  ;;  %v5692_v56 = vrot.slane %v5229_v9, %v12210_v47 }
 0x4c1   : > { %v6877_v58 = vcombine.low %v6868_v62, %v6875_v59  ;;  %v5696_v34 = vrot.slane %v5229_v9, %v12214_v6  ;;  %v6893_v57 = vcombine.low %v5668_v3, %v5672_v11  ;;  %v6894_v36 = vcombine.low %v5676_v14, %v5680_v43 }
 0x4c2   : > { %7904 = vperm.xlu1 %9147, %v6843_v39   ;;  %v6884_v16 = vrot.slane %v6876_v2, %v12229_v1  ;;  %v6895_v51 = vcombine.low %v5684_v20, %v5688_v29  ;;  %v5700_v23 = vrot.slane %v5230_v33, %v13162_v50  ;;  %v5704_v21 = vrot.slane %v5230_v33, %v13164_v60 }
 0x4c3   : > { %v6891_v19 = vrot.slane %v6877_v58, %v12229_v1  ;;  %v6896_v13 = vcombine.low %v5692_v56, %v5696_v34  ;;  %v6903_v45 = vrot.slane %v6893_v57, %v12229_v1  ;;  %v5121_v63 = vpop.xlane.xlu0 %5120  ;;  %v6910_v61 = vrot.slane %v6894_v36, %v12229_v1 }
 0x4c4   : > { %v6917_v49 = vrot.slane %v6895_v51, %v12229_v1  ;;  %v5708_v32 = vrot.slane %v5230_v33, %v13165_v24  ;;  %v5712_v5 = vrot.slane %v5230_v33, %v13166_v46  ;;  %v5231_v30 = vadd.f32 %v12201_v48, %v5121_v63 }
 0x4c5   : > { %v5126_v7 = vpop.xlane.xlu1 %5125  ;;  %v6892_v18 = vcombine.low %v6884_v16, %v6891_v19  ;;  %v6924_v42 = vrot.slane %v6896_v13, %v12229_v1  ;;  %v5716_v55 = vrot.slane %v5230_v33, %v12204_v15  ;;  %v6925_v26 = vcombine.low %v6903_v45, %v6910_v61 }
 0x4c6   : > { %v12420_v31 = vadd.f32 %v12201_v48, %v5126_v7  ;;  %v5720_v9 = vrot.slane %v5230_v33, %v12207_v10  ;;  %v5724_v53 = vrot.slane %v5230_v33, %v12210_v47  ;;  %v5728_v44 = vrot.slane %v5230_v33, %v12214_v6 }
 0x4c7   : > { %7907 = vperm.xlu1 %9147, %v6892_v18   ;;  %v6926_v40 = vcombine.low %v6917_v49, %v6924_v42  ;;  %v6942_v17 = vcombine.low %v5700_v23, %v5704_v21  ;;  %v6943_v4 = vcombine.low %v5708_v32, %v5712_v5  ;;  %v6933_v41 = vrot.slane %v6925_v26, %v12229_v1 }
 0x4c8   : > { %v6944_v27 = vcombine.low %v5716_v55, %v5720_v9  ;;  %v5732_v35 = vrot.slane %v5231_v30, %v13162_v50  ;;  %v5736_v54 = vrot.slane %v5231_v30, %v13164_v60  ;;  %v6945_v8 = vcombine.low %v5724_v53, %v5728_v44 }
 0x4c9   : > { %v6940_v28 = vrot.slane %v6926_v40, %v12229_v1  ;;  %v6952_v38 = vrot.slane %v6942_v17, %v12229_v1  ;;  %v6959_v0 = vrot.slane %v6943_v4, %v12229_v1  ;;  %v5740_v33 = vrot.slane %v5231_v30, %v13165_v24 }
 0x4ca   : > { %v6966_v37 = vrot.slane %v6944_v27, %v12229_v1  ;;  %v5744_v3 = vrot.slane %v5231_v30, %v13166_v46  ;;  %v5748_v52 = vrot.slane %v5231_v30, %v12204_v15  ;;  %v6973_v25 = vrot.slane %v6945_v8, %v12229_v1 }
 0x4cb   : > { %v12435_v22 = vcombine.low %v6933_v41, %v6940_v28  ;;  %v6974_v11 = vcombine.low %v6952_v38, %v6959_v0  ;;  %v5752_v62 = vrot.slane %v5231_v30, %v12207_v10  ;;  %v5756_v59 = vrot.slane %v5231_v30, %v12210_v47 }
 0x4cc   : > { %v5760_v14 = vrot.slane %v5231_v30, %v12214_v6  ;;  %v6991_v43 = vcombine.low %v5732_v35, %v5736_v54  ;;  %v6992_v39 = vcombine.low %v5740_v33, %v5744_v3  ;;  %v6975_v2 = vcombine.low %v6966_v37, %v6973_v25 }
 0x4cd   : > { %v6982_v20 = vrot.slane %v6974_v11, %v12229_v1  ;;  %v6993_v29 = vcombine.low %v5748_v52, %v5752_v62  ;;  %v5764_v58 = vrot.slane %v12420_v31, %v13162_v50  ;;  %v5768_v36 = vrot.slane %v12420_v31, %v13164_v60 }
 0x4ce   : > { %v5131_v56 = vpop.xlane.xlu0 %5130  ;;  %v6994_v34 = vcombine.low %v5756_v59, %v5760_v14  ;;  %v7001_v57 = vrot.slane %v6991_v43, %v12229_v1  ;;  %v7008_v16 = vrot.slane %v6992_v39, %v12229_v1  ;;  %v6989_v23 = vrot.slane %v6975_v2, %v12229_v1 }
 0x4cf   : > { %v5233_v51 = vadd.f32 %v12201_v48, %v5131_v56  ;;  %v7015_v19 = vrot.slane %v6993_v29, %v12229_v1  ;;  %v5772_v13 = vrot.slane %v12420_v31, %v13165_v24  ;;  %v5136_v45 = vpop.xlane.xlu1 %5135  ;;  %v5776_v61 = vrot.slane %v12420_v31, %v13166_v46 }
 0x4d0   : > { %v7022_v21 = vrot.slane %v6994_v34, %v12229_v1  ;;  %v12454_v63 = vcombine.low %v7001_v57, %v7008_v16  ;;  %v5780_v49 = vrot.slane %v12420_v31, %v12204_v15  ;;  %v5234_v32 = vadd.f32 %v12201_v48, %v5136_v45 }
 0x4d1   : > { %v5796_v5 = vrot.slane %v5233_v51, %v13162_v50  ;;  %v5800_v30 = vrot.slane %v5233_v51, %v13164_v60  ;;  %v5804_v7 = vrot.slane %v5233_v51, %v13165_v24  ;;  %v5808_v18 = vrot.slane %v5233_v51, %v13166_v46 }
 0x4d2   : > { %v5812_v42 = vrot.slane %v5233_v51, %v12204_v15  ;;  %v5816_v55 = vrot.slane %v5233_v51, %v12207_v10  ;;  %v5820_v26 = vrot.slane %v5233_v51, %v12210_v47  ;;  %v5824_v9 = vrot.slane %v5233_v51, %v12214_v6 }
 0x4d3   : > { %v7089_v53 = vcombine.low %v5796_v5, %v5800_v30  ;;  %v5828_v40 = vrot.slane %v5234_v32, %v13162_v50  ;;  %v5832_v44 = vrot.slane %v5234_v32, %v13164_v60  ;;  %v7090_v17 = vcombine.low %v5804_v7, %v5808_v18 }
 0x4d4   : > { %v7091_v4 = vcombine.low %v5812_v42, %v5816_v55  ;;  %v5836_v41 = vrot.slane %v5234_v32, %v13165_v24  ;;  %v5840_v27 = vrot.slane %v5234_v32, %v13166_v46  ;;  %v7092_v35 = vcombine.low %v5820_v26, %v5824_v9 }
 0x4d5   : > { %v7099_v54 = vrot.slane %v7089_v53, %v12229_v1  ;;  %v5844_v28 = vrot.slane %v5234_v32, %v12204_v15  ;;  %v5848_v8 = vrot.slane %v5234_v32, %v12207_v10  ;;  %v7106_v38 = vrot.slane %v7090_v17, %v12229_v1 }
 0x4d6   : > { %v7113_v0 = vrot.slane %v7091_v4, %v12229_v1  ;;  %v5852_v37 = vrot.slane %v5234_v32, %v12210_v47  ;;  %v5856_v33 = vrot.slane %v5234_v32, %v12214_v6  ;;  %v7120_v3 = vrot.slane %v7092_v35, %v12229_v1 }
 0x4d7   : > { %v7138_v52 = vcombine.low %v5828_v40, %v5832_v44  ;;  %v7139_v25 = vcombine.low %v5836_v41, %v5840_v27  ;;  %v7140_v11 = vcombine.low %v5844_v28, %v5848_v8  ;;  %v7121_v62 = vcombine.low %v7099_v54, %v7106_v38 }
 0x4d8   : > { %v7141_v59 = vcombine.low %v5852_v37, %v5856_v33  ;;  %v12481_v14 = vcombine.low %v6982_v20, %v6989_v23  ;;  %v7024_v43 = vcombine.low %v7015_v19, %v7022_v21  ;;  %v5141_v39 = vpop.xlane.xlu0 %5140  ;;  %v7122_v2 = vcombine.low %v7113_v0, %v7120_v3 }
 0x4d9   : > { %v7148_v29 = vrot.slane %v7138_v52, %v12229_v1  ;;  %v7155_v56 = vrot.slane %v7139_v25, %v12229_v1  ;;  %v7162_v34 = vrot.slane %v7140_v11, %v12229_v1  ;;  %v5235_v57 = vadd.f32 %v12201_v48, %v5141_v39 }
 0x4da   : > { %v5146_v16 = vpop.xlane.xlu1 %5145  ;;  %v7129_v51 = vrot.slane %v7121_v62, %v12229_v1  ;;  %v7169_v45 = vrot.slane %v7141_v59, %v12229_v1  ;;  %v7031_v20 = vrot.slane %v12454_v63, %v12229_v1  ;;  %v7136_v19 = vrot.slane %v7122_v2, %v12229_v1 }
 0x4db   : > { %v5236_v23 = vadd.f32 %v12201_v48, %v5146_v16  ;;  %v7170_v21 = vcombine.low %v7148_v29, %v7155_v56  ;;  %v7038_v32 = vrot.slane %v7024_v43, %v12229_v1  ;;  %v5860_v30 = vrot.slane %v5235_v57, %v13162_v50 }
 0x4dc   : > { %v7171_v5 = vcombine.low %v7162_v34, %v7169_v45  ;;  %v5864_v7 = vrot.slane %v5235_v57, %v13164_v60  ;;  %v5868_v18 = vrot.slane %v5235_v57, %v13165_v24  ;;  %v7137_v42 = vcombine.low %v7129_v51, %v7136_v19 }
 0x4dd   : > { %v7178_v55 = vrot.slane %v7170_v21, %v12229_v1  ;;  %v5872_v26 = vrot.slane %v5235_v57, %v13166_v46  ;;  %v5876_v63 = vrot.slane %v5235_v57, %v12204_v15  ;;  %v5880_v53 = vrot.slane %v5235_v57, %v12207_v10 }
 0x4de   : > { %v7185_v9 = vrot.slane %v7171_v5, %v12229_v1  ;;  %v5884_v40 = vrot.slane %v5235_v57, %v12210_v47  ;;  %v5888_v44 = vrot.slane %v5235_v57, %v12214_v6  ;;  %7922 = vperm.xlu1 %9147, %v7137_v42   ;;  %v7187_v17 = vcombine.low %v5860_v30, %v5864_v7 }
 0x4df   : > { %v7188_v4 = vcombine.low %v5868_v18, %v5872_v26  ;;  %v5892_v41 = vrot.slane %v5236_v23, %v13162_v50  ;;  %v5896_v27 = vrot.slane %v5236_v23, %v13164_v60  ;;  %v7189_v54 = vcombine.low %v5876_v63, %v5880_v53 }
 0x4e0   : > { %v7186_v35 = vcombine.low %v7178_v55, %v7185_v9  ;;  %v7190_v28 = vcombine.low %v5884_v40, %v5888_v44  ;;  %v5900_v8 = vrot.slane %v5236_v23, %v13165_v24  ;;  %v7197_v38 = vrot.slane %v7187_v17, %v12229_v1 }
 0x4e1   : > { %v7204_v0 = vrot.slane %v7188_v4, %v12229_v1  ;;  %v5904_v37 = vrot.slane %v5236_v23, %v13166_v46  ;;  %v5908_v33 = vrot.slane %v5236_v23, %v12204_v15  ;;  %v7211_v3 = vrot.slane %v7189_v54, %v12229_v1 }
 0x4e2   : > { %v7218_v52 = vrot.slane %v7190_v28, %v12229_v1  ;;  %v5912_v25 = vrot.slane %v5236_v23, %v12207_v10  ;;  %v5916_v11 = vrot.slane %v5236_v23, %v12210_v47  ;;  %7925 = vperm.xlu1 %9147, %v7186_v35   ;;  %v5920_v43 = vrot.slane %v5236_v23, %v12214_v6 }
 0x4e3   : > { %v5151_v62 = vpop.xlane.xlu0 %5150  ;;  %v7219_v59 = vcombine.low %v7197_v38, %v7204_v0  ;;  %v7236_v39 = vcombine.low %v5892_v41, %v5896_v27  ;;  %v7237_v2 = vcombine.low %v5900_v8, %v5904_v37  ;;  %v7039_v57 = vcombine.low %v7031_v20, %v7038_v32 }
 0x4e4   : > { %v5237_v29 = vadd.f32 %v12201_v48, %v5151_v62  ;;  %v7220_v56 = vcombine.low %v7211_v3, %v7218_v52  ;;  %v7238_v34 = vcombine.low %v5908_v33, %v5912_v25  ;;  %v5156_v16 = vpop.xlane.xlu1 %5155  ;;  %v7239_v45 = vcombine.low %v5916_v11, %v5920_v43 }
 0x4e5   : > { %v7227_v51 = vrot.slane %v7219_v59, %v12229_v1  ;;  %v7246_v19 = vrot.slane %v7236_v39, %v12229_v1  ;;  %v7253_v21 = vrot.slane %v7237_v2, %v12229_v1  ;;  %v12521_v5 = vadd.f32 %v12201_v48, %v5156_v16 }
 0x4e6   : > { %v7234_v23 = vrot.slane %v7220_v56, %v12229_v1  ;;  %v7260_v30 = vrot.slane %v7238_v34, %v12229_v1  ;;  %v5924_v7 = vrot.slane %v5237_v29, %v13162_v50  ;;  %7910 = vperm.xlu1 %9147, %v12435_v22   ;;  %v7267_v20 = vrot.slane %v7239_v45, %v12229_v1 }
 0x4e7   : > { %v7268_v32 = vcombine.low %v7246_v19, %v7253_v21  ;;  %v5928_v18 = vrot.slane %v5237_v29, %v13164_v60  ;;  %v5932_v42 = vrot.slane %v5237_v29, %v13165_v24  ;;  %v5936_v26 = vrot.slane %v5237_v29, %v13166_v46 }
 0x4e8   : > { %v7235_v55 = vcombine.low %v7227_v51, %v7234_v23  ;;  %v5940_v63 = vrot.slane %v5237_v29, %v12204_v15  ;;  %v5944_v9 = vrot.slane %v5237_v29, %v12207_v10  ;;  %v7269_v53 = vcombine.low %v7260_v30, %v7267_v20 }
 0x4e9   : > { %v7276_v40 = vrot.slane %v7268_v32, %v12229_v1  ;;  %v5948_v44 = vrot.slane %v5237_v29, %v12210_v47  ;;  %v5952_v22 = vrot.slane %v5237_v29, %v12214_v6  ;;  %v7285_v17 = vcombine.low %v5924_v7, %v5928_v18 }
 0x4ea   : > { %7928 = vperm.xlu0 %9148, %v7235_v55   ;;  %v7286_v4 = vcombine.low %v5932_v42, %v5936_v26  ;;  %v7287_v41 = vcombine.low %v5940_v63, %v5944_v9  ;;  %v5784_v27 = vrot.slane %v12420_v31, %v12207_v10  ;;  %7913 = vperm.xlu1 %9147, %v12481_v14  }
 0x4eb   : > { %v7283_v35 = vrot.slane %v7269_v53, %v12229_v1  ;;  %v7288_v54 = vcombine.low %v5948_v44, %v5952_v22  ;;  %v5788_v28 = vrot.slane %v12420_v31, %v12210_v47  ;;  %v5792_v8 = vrot.slane %v12420_v31, %v12214_v6 }
 0x4ec   : > { %v7295_v38 = vrot.slane %v7285_v17, %v12229_v1  ;;  %v7302_v0 = vrot.slane %v7286_v4, %v12229_v1  ;;  %v7309_v37 = vrot.slane %v7287_v41, %v12229_v1  ;;  %v7040_v14 = vcombine.low %v5764_v58, %v5768_v36 }
 0x4ed   : > { %v7284_v33 = vcombine.low %v7276_v40, %v7283_v35  ;;  %v7316_v3 = vrot.slane %v7288_v54, %v12229_v1  ;;  %v7041_v52 = vcombine.low %v5772_v13, %v5776_v61  ;;  %v7042_v25 = vcombine.low %v5780_v49, %v5784_v27  ;;  %v5161_v11 = vpop.xlane.xlu0 %5160 }
 0x4ee   : > { %v7317_v62 = vcombine.low %v7295_v38, %v7302_v0  ;;  %v7043_v59 = vcombine.low %v5788_v28, %v5792_v8  ;;  %v7050_v43 = vrot.slane %v7040_v14, %v12229_v1  ;;  %v5956_v58 = vrot.slane %v12521_v5, %v13162_v50  ;;  %7916 = vperm.xlu1 %9147, %v7039_v57  }
 0x4ef   : > { %v5239_v36 = vadd.f32 %v12201_v48, %v5161_v11  ;;  %7931 = vperm.xlu0 %9148, %v7284_v33   ;;  %v7318_v39 = vcombine.low %v7309_v37, %v7316_v3  ;;  %v7057_v2 = vrot.slane %v7041_v52, %v12229_v1  ;;  %v7064_v31 = vrot.slane %v7042_v25, %v12229_v1 }
 0x4f0   : > { %v7325_v13 = vrot.slane %v7317_v62, %v12229_v1  ;;  %v7071_v61 = vrot.slane %v7043_v59, %v12229_v1  ;;  %v5960_v49 = vrot.slane %v12521_v5, %v13164_v60  ;;  %v5964_v34 = vrot.slane %v12521_v5, %v13165_v24 }
 0x4f1   : > { %v7332_v29 = vrot.slane %v7318_v39, %v12229_v1  ;;  %v7072_v56 = vcombine.low %v7050_v43, %v7057_v2  ;;  %v5968_v57 = vrot.slane %v12521_v5, %v13166_v46  ;;  %v5166_v16 = vpop.xlane.xlu0 %5165  ;;  %v5972_v45 = vrot.slane %v12521_v5, %v12204_v15 }
 0x4f2   : > { %v7073_v51 = vcombine.low %v7064_v31, %v7071_v61  ;;  %v5976_v19 = vrot.slane %v12521_v5, %v12207_v10  ;;  %v5980_v21 = vrot.slane %v12521_v5, %v12210_v47  ;;  %v5240_v23 = vadd.f32 %v12201_v48, %v5166_v16 }
 0x4f3   : > { %v7333_v30 = vcombine.low %v7325_v13, %v7332_v29  ;;  %v7080_v7 = vrot.slane %v7072_v56, %v12229_v1  ;;  %v5984_v20 = vrot.slane %v12521_v5, %v12214_v6  ;;  %v7334_v18 = vcombine.low %v5956_v58, %v5960_v49 }
 0x4f4   : > { %v7087_v32 = vrot.slane %v7073_v51, %v12229_v1  ;;  %v7335_v42 = vcombine.low %v5964_v34, %v5968_v57  ;;  %v7336_v55 = vcombine.low %v5972_v45, %v5976_v19  ;;  %v5988_v63 = vrot.slane %v5239_v36, %v13162_v50 }
 0x4f5   : > { %7934 = vperm.xlu0 %9148, %v7333_v30   ;;  %v7337_v26 = vcombine.low %v5980_v21, %v5984_v20  ;;  %v5992_v9 = vrot.slane %v5239_v36, %v13164_v60  ;;  %v5996_v53 = vrot.slane %v5239_v36, %v13165_v24  ;;  %v7344_v44 = vrot.slane %v7334_v18, %v12229_v1 }
 0x4f6   : > { %v7088_v40 = vcombine.low %v7080_v7, %v7087_v32  ;;  %v7351_v22 = vrot.slane %v7335_v42, %v12229_v1  ;;  %v7358_v5 = vrot.slane %v7336_v55, %v12229_v1  ;;  %v6000_v4 = vrot.slane %v5239_v36, %v13166_v46 }
 0x4f7   : > { %v7365_v17 = vrot.slane %v7337_v26, %v12229_v1  ;;  %v6004_v41 = vrot.slane %v5239_v36, %v12204_v15  ;;  %v6008_v27 = vrot.slane %v5239_v36, %v12207_v10  ;;  %v6012_v28 = vrot.slane %v5239_v36, %v12210_v47 }
 0x4f8   : > { %v5171_v35 = vpop.xlane.xlu0 %5170  ;;  %7919 = vperm.xlu1 %9147, %v7088_v40   ;;  %v7366_v54 = vcombine.low %v7344_v44, %v7351_v22  ;;  %v6016_v8 = vrot.slane %v5239_v36, %v12214_v6  ;;  %v7383_v38 = vcombine.low %v5988_v63, %v5992_v9  ;;  %v7384_v14 = vcombine.low %v5996_v53, %v6000_v4 }
 0x4f9   : > { %v5241_v0 = vadd.f32 %v12201_v48, %v5171_v35  ;;  %v7367_v37 = vcombine.low %v7358_v5, %v7365_v17  ;;  %v7385_v33 = vcombine.low %v6004_v41, %v6008_v27  ;;  %v6020_v11 = vrot.slane %v5240_v23, %v13162_v50 }
 0x4fa   : > { %v7374_v3 = vrot.slane %v7366_v54, %v12229_v1  ;;  %v7386_v52 = vcombine.low %v6012_v28, %v6016_v8  ;;  %v7393_v25 = vrot.slane %v7383_v38, %v12229_v1  ;;  %v7400_v59 = vrot.slane %v7384_v14, %v12229_v1 }
 0x4fb   : > { %v7381_v62 = vrot.slane %v7367_v37, %v12229_v1  ;;  %v7407_v43 = vrot.slane %v7385_v33, %v12229_v1  ;;  %v6024_v58 = vrot.slane %v5240_v23, %v13164_v60  ;;  %v6028_v2 = vrot.slane %v5240_v23, %v13165_v24 }
 0x4fc   : > { %v5176_v36 = vpop.xlane.xlu0 %5175  ;;  %v7414_v39 = vrot.slane %v7386_v52, %v12229_v1  ;;  %v6032_v13 = vrot.slane %v5240_v23, %v13166_v46  ;;  %v6036_v31 = vrot.slane %v5240_v23, %v12204_v15  ;;  %v7415_v29 = vcombine.low %v7393_v25, %v7400_v59 }
 0x4fd   : > { %v7382_v61 = vcombine.low %v7374_v3, %v7381_v62  ;;  %v12614_v49 = vadd.f32 %v12201_v48, %v5176_v36  ;;  %v6040_v56 = vrot.slane %v5240_v23, %v12207_v10  ;;  %v6044_v57 = vrot.slane %v5240_v23, %v12210_v47 }
 0x4fe   : > { %v7416_v34 = vcombine.low %v7407_v43, %v7414_v39  ;;  %v6048_v16 = vrot.slane %v5240_v23, %v12214_v6  ;;  %v7432_v51 = vcombine.low %v6020_v11, %v6024_v58  ;;  %v7423_v45 = vrot.slane %v7415_v29, %v12229_v1 }
 0x4ff   : > { %7937 = vperm.xlu0 %9148, %v7382_v61   ;;  %v7433_v19 = vcombine.low %v6028_v2, %v6032_v13  ;;  %v7434_v21 = vcombine.low %v6036_v31, %v6040_v56  ;;  %v6052_v30 = vrot.slane %v5241_v0, %v13162_v50  ;;  %v6056_v55 = vrot.slane %v5241_v0, %v13164_v60 }
 0x500   : > { %v7430_v7 = vrot.slane %v7416_v34, %v12229_v1  ;;  %v5181_v20 = vpop.xlane.xlu0 %5180  ;;  %v5186_v32 = vpop.xlane.xlu1 %5185  ;;  %v7435_v18 = vcombine.low %v6044_v57, %v6048_v16  ;;  %v7442_v42 = vrot.slane %v7432_v51, %v12229_v1  ;;  %v6060_v44 = vrot.slane %v5241_v0, %v13165_v24 }
 0x501   : > { %v12625_v26 = vadd.f32 %v12201_v48, %v5181_v20  ;;  %v12628_v23 = vadd.f32 %v12201_v48, %v5186_v32  ;;  %v7449_v63 = vrot.slane %v7433_v19, %v12229_v1  ;;  %v7456_v9 = vrot.slane %v7434_v21, %v12229_v1 }
 0x502   : > { %v7431_v53 = vcombine.low %v7423_v45, %v7430_v7  ;;  %v7463_v40 = vrot.slane %v7435_v18, %v12229_v1  ;;  %v6064_v22 = vrot.slane %v5241_v0, %v13166_v46  ;;  %v6068_v17 = vrot.slane %v5241_v0, %v12204_v15 }
 0x503   : > { %v7464_v5 = vcombine.low %v7442_v42, %v7449_v63  ;;  %v6072_v4 = vrot.slane %v5241_v0, %v12207_v10  ;;  %v6076_v41 = vrot.slane %v5241_v0, %v12210_v47  ;;  %v6080_v35 = vrot.slane %v5241_v0, %v12214_v6 }
 0x504   : > { %7940 = vperm.xlu0 %9148, %v7431_v53   ;;  %v7465_v27 = vcombine.low %v7456_v9, %v7463_v40  ;;  %v7481_v54 = vcombine.low %v6052_v30, %v6056_v55  ;;  %v7482_v28 = vcombine.low %v6060_v44, %v6064_v22  ;;  %v6084_v14 = vrot.slane %v12614_v49, %v13162_v50 }
 0x505   : > { %v7472_v8 = vrot.slane %v7464_v5, %v12229_v1  ;;  %v7483_v38 = vcombine.low %v6068_v17, %v6072_v4  ;;  %v5191_v37 = vpop.xlane.xlu0 %5190  ;;  %v6088_v33 = vrot.slane %v12614_v49, %v13164_v60  ;;  %v7484_v52 = vcombine.low %v6076_v41, %v6080_v35 }
 0x506   : > { %v7479_v3 = vrot.slane %v7465_v27, %v12229_v1  ;;  %v7491_v25 = vrot.slane %v7481_v54, %v12229_v1  ;;  %v7498_v11 = vrot.slane %v7482_v28, %v12229_v1  ;;  %v12649_v62 = vadd.f32 %v12201_v48, %v5191_v37 }
 0x507   : > { %v7505_v0 = vrot.slane %v7483_v38, %v12229_v1  ;;  %v6092_v59 = vrot.slane %v12614_v49, %v13165_v24  ;;  %v6096_v43 = vrot.slane %v12614_v49, %v13166_v46  ;;  %v7512_v36 = vrot.slane %v7484_v52, %v12229_v1 }
 0x508   : > { %v7480_v58 = vcombine.low %v7472_v8, %v7479_v3  ;;  %v7513_v39 = vcombine.low %v7491_v25, %v7498_v11  ;;  %v6100_v2 = vrot.slane %v12614_v49, %v12204_v15  ;;  %v6104_v13 = vrot.slane %v12614_v49, %v12207_v10 }
 0x509   : > { %v6108_v31 = vrot.slane %v12614_v49, %v12210_v47  ;;  %v6112_v61 = vrot.slane %v12614_v49, %v12214_v6  ;;  %v7530_v29 = vcombine.low %v6084_v14, %v6088_v33  ;;  %v5196_v56 = vpop.xlane.xlu0 %5195  ;;  %v7514_v34 = vcombine.low %v7505_v0, %v7512_v36 }
 0x50a   : > { %7943 = vperm.xlu0 %9148, %v7480_v58   ;;  %v7521_v57 = vrot.slane %v7513_v39, %v12229_v1  ;;  %v7531_v16 = vcombine.low %v6092_v59, %v6096_v43  ;;  %v12666_v51 = vadd.f32 %v12201_v48, %v5196_v56  ;;  %v7532_v45 = vcombine.low %v6100_v2, %v6104_v13 }
 0x50b   : > { %v7533_v19 = vcombine.low %v6108_v31, %v6112_v61  ;;  %v7540_v21 = vrot.slane %v7530_v29, %v12229_v1  ;;  %v6116_v30 = vrot.slane %v12625_v26, %v13162_v50  ;;  %v7528_v7 = vrot.slane %v7514_v34, %v12229_v1 }
 0x50c   : > { %v7547_v49 = vrot.slane %v7531_v16, %v12229_v1  ;;  %v6120_v20 = vrot.slane %v12625_v26, %v13164_v60  ;;  %v6124_v32 = vrot.slane %v12625_v26, %v13165_v24  ;;  %v7554_v18 = vrot.slane %v7532_v45, %v12229_v1 }
 0x50d   : > { %v7561_v42 = vrot.slane %v7533_v19, %v12229_v1  ;;  %v6128_v55 = vrot.slane %v12625_v26, %v13166_v46  ;;  %v6132_v63 = vrot.slane %v12625_v26, %v12204_v15  ;;  %v5201_v9 = vpop.xlane.xlu0 %5200  ;;  %v7529_v53 = vcombine.low %v7521_v57, %v7528_v7 }
 0x50e   : > { %v7562_v40 = vcombine.low %v7540_v21, %v7547_v49  ;;  %v6136_v44 = vrot.slane %v12625_v26, %v12207_v10  ;;  %v6140_v22 = vrot.slane %v12625_v26, %v12210_v47  ;;  %v6144_v17 = vrot.slane %v12625_v26, %v12214_v6 }
 0x50f   : > { %v7563_v5 = vcombine.low %v7554_v18, %v7561_v42  ;;  %v7579_v4 = vcombine.low %v6116_v30, %v6120_v20  ;;  %v7580_v41 = vcombine.low %v6124_v32, %v6128_v55  ;;  %7946 = vperm.xlu0 %9148, %v7529_v53   ;;  %v12691_v54 = vadd.f32 %v12201_v48, %v5201_v9 }
 0x510   : > { %v7570_v27 = vrot.slane %v7562_v40, %v12229_v1  ;;  %v7581_v35 = vcombine.low %v6132_v63, %v6136_v44  ;;  %v6148_v28 = vrot.slane %v12628_v23, %v13162_v50  ;;  %v7582_v38 = vcombine.low %v6140_v22, %v6144_v17 }
 0x511   : > { %v7577_v8 = vrot.slane %v7563_v5, %v12229_v1  ;;  %v7589_v37 = vrot.slane %v7579_v4, %v12229_v1  ;;  %v7596_v14 = vrot.slane %v7580_v41, %v12229_v1  ;;  %v6152_v33 = vrot.slane %v12628_v23, %v13164_v60  ;;  %v5206_v25 = vpop.xlane.xlu0 %5205 }
 0x512   : > { %v7603_v26 = vrot.slane %v7581_v35, %v12229_v1  ;;  %v6156_v3 = vrot.slane %v12628_v23, %v13165_v24  ;;  %v6160_v52 = vrot.slane %v12628_v23, %v13166_v46  ;;  %v7610_v0 = vrot.slane %v7582_v38, %v12229_v1 }
 0x513   : > { %v7578_v11 = vcombine.low %v7570_v27, %v7577_v8  ;;  %v7611_v59 = vcombine.low %v7589_v37, %v7596_v14  ;;  %v6164_v43 = vrot.slane %v12628_v23, %v12204_v15  ;;  %v6168_v58 = vrot.slane %v12628_v23, %v12207_v10 }
 0x514   : > { %v6172_v36 = vrot.slane %v12628_v23, %v12210_v47  ;;  %v6176_v39 = vrot.slane %v12628_v23, %v12214_v6  ;;  %v7628_v2 = vcombine.low %v6148_v28, %v6152_v33  ;;  %v7612_v13 = vcombine.low %v7603_v26, %v7610_v0 }
 0x515   : > { %7949 = vperm.xlu0 %9148, %v7578_v11   ;;  %v7619_v31 = vrot.slane %v7611_v59, %v12229_v1  ;;  %v7629_v61 = vcombine.low %v6156_v3, %v6160_v52  ;;  %v12716_v29 = vadd.f32 %v12201_v48, %v5206_v25  ;;  %v7630_v56 = vcombine.low %v6164_v43, %v6168_v58 }
 0x516   : > { %v7631_v34 = vcombine.low %v6172_v36, %v6176_v39  ;;  %v7638_v57 = vrot.slane %v7628_v2, %v12229_v1  ;;  %v6180_v16 = vrot.slane %v12649_v62, %v13162_v50  ;;  %v7626_v45 = vrot.slane %v7612_v13, %v12229_v1 }
 0x517   : > { %v7645_v23 = vrot.slane %v7629_v61, %v12229_v1  ;;  %v6184_v19 = vrot.slane %v12649_v62, %v13164_v60  ;;  %v6188_v21 = vrot.slane %v12649_v62, %v13165_v24  ;;  %v7652_v48 = vrot.slane %v7630_v56, %v12229_v1 }
 0x518   : > { %v7659_v30 = vrot.slane %v7631_v34, %v12229_v1  ;;  %v6192_v7 = vrot.slane %v12649_v62, %v13166_v46  ;;  %v6196_v49 = vrot.slane %v12649_v62, %v12204_v15  ;;  %v7627_v20 = vcombine.low %v7619_v31, %v7626_v45 }
 0x519   : > { %v7660_v32 = vcombine.low %v7638_v57, %v7645_v23  ;;  %v6200_v18 = vrot.slane %v12649_v62, %v12207_v10  ;;  %v6204_v42 = vrot.slane %v12649_v62, %v12210_v47  ;;  %v6208_v63 = vrot.slane %v12649_v62, %v12214_v6 }
 0x51a   : > { %v7661_v55 = vcombine.low %v7652_v48, %v7659_v30  ;;  %v7677_v9 = vcombine.low %v6180_v16, %v6184_v19  ;;  %v7678_v53 = vcombine.low %v6188_v21, %v6192_v7  ;;  %7952 = vperm.xlu0 %9148, %v7627_v20   ;;  %v6212_v22 = vrot.slane %v12666_v51, %v13162_v50 }
 0x51b   : > { %v7668_v40 = vrot.slane %v7660_v32, %v12229_v1  ;;  %v7679_v44 = vcombine.low %v6196_v49, %v6200_v18  ;;  %v6216_v5 = vrot.slane %v12666_v51, %v13164_v60  ;;  %v7680_v4 = vcombine.low %v6204_v42, %v6208_v63 }
 0x51c   : > { %v7675_v17 = vrot.slane %v7661_v55, %v12229_v1  ;;  %v7687_v41 = vrot.slane %v7677_v9, %v12229_v1  ;;  %v7694_v27 = vrot.slane %v7678_v53, %v12229_v1  ;;  %v6220_v35 = vrot.slane %v12666_v51, %v13165_v24 }
 0x51d   : > { %v7701_v62 = vrot.slane %v7679_v44, %v12229_v1  ;;  %v6224_v28 = vrot.slane %v12666_v51, %v13166_v46  ;;  %v6228_v8 = vrot.slane %v12666_v51, %v12204_v15  ;;  %v7708_v37 = vrot.slane %v7680_v4, %v12229_v1 }
 0x51e   : > { %v7676_v38 = vcombine.low %v7668_v40, %v7675_v17  ;;  %v7709_v14 = vcombine.low %v7687_v41, %v7694_v27  ;;  %v6232_v26 = vrot.slane %v12666_v51, %v12207_v10  ;;  %v6236_v33 = vrot.slane %v12666_v51, %v12210_v47 }
 0x51f   : > { %v6240_v3 = vrot.slane %v12666_v51, %v12214_v6  ;;  %v7726_v52 = vcombine.low %v6212_v22, %v6216_v5  ;;  %v7727_v25 = vcombine.low %v6220_v35, %v6224_v28  ;;  %v7710_v11 = vcombine.low %v7701_v62, %v7708_v37 }
 0x520   : > { %7955 = vperm.xlu0 %9148, %v7676_v38   ;;  %v7717_v0 = vrot.slane %v7709_v14, %v12229_v1  ;;  %v7728_v59 = vcombine.low %v6228_v8, %v6232_v26  ;;  %v6244_v43 = vrot.slane %v12691_v54, %v13162_v50  ;;  %v6248_v2 = vrot.slane %v12691_v54, %v13164_v60  ;;  %v7878_v26 = vpop.permute.xlu1 %7877 }
 0x521   : > { %v7729_v58 = vcombine.low %v6236_v33, %v6240_v3  ;;  %v7736_v36 = vrot.slane %v7726_v52, %v12229_v1  ;;  %v7743_v39 = vrot.slane %v7727_v25, %v12229_v1  ;;  %v7724_v51 = vrot.slane %v7710_v11, %v12229_v1  ;;  %v7875_v25 = vpop.permute.xlu0 %7874 }
 0x522   : > { %v7750_v13 = vrot.slane %v7728_v59, %v12229_v1  ;;  %v6252_v31 = vrot.slane %v12691_v54, %v13165_v24  ;;  %v6256_v61 = vrot.slane %v12691_v54, %v13166_v46  ;;  %v6260_v57 = vrot.slane %v12691_v54, %v12204_v15 }
 0x523   : > { %v7757_v56 = vrot.slane %v7729_v58, %v12229_v1  ;;  %v7758_v34 = vcombine.low %v7736_v36, %v7743_v39  ;;  %v6264_v16 = vrot.slane %v12691_v54, %v12207_v10  ;;  %v7725_v45 = vcombine.low %v7717_v0, %v7724_v51 }
 0x524   : > { %v6268_v23 = vrot.slane %v12691_v54, %v12210_v47  ;;  %v6272_v19 = vrot.slane %v12691_v54, %v12214_v6  ;;  %v7775_v21 = vcombine.low %v6244_v43, %v6248_v2  ;;  %v7776_v7 = vcombine.low %v6252_v31, %v6256_v61  ;;  %v7881_v33 = vpop.permute.xlu1 %7880 }
 0x525   : > { %v7759_v48 = vcombine.low %v7750_v13, %v7757_v56  ;;  %v7766_v30 = vrot.slane %v7758_v34, %v12229_v1  ;;  %v7777_v49 = vcombine.low %v6260_v57, %v6264_v16  ;;  %7958 = vperm.xlu0 %9148, %v7725_v45   ;;  %v6276_v18 = vrot.slane %v12716_v29, %v13162_v50 }
 0x526   : > { %v7778_v20 = vcombine.low %v6268_v23, %v6272_v19  ;;  %v7785_v32 = vrot.slane %v7775_v21, %v12229_v1  ;;  %v6280_v42 = vrot.slane %v12716_v29, %v13164_v60  ;;  %v7792_v54 = vrot.slane %v7776_v7, %v12229_v1 }
 0x527   : > { %v7773_v55 = vrot.slane %v7759_v48, %v12229_v1  ;;  %v7799_v63 = vrot.slane %v7777_v49, %v12229_v1  ;;  %v6284_v9 = vrot.slane %v12716_v29, %v13165_v24  ;;  %v6288_v40 = vrot.slane %v12716_v29, %v13166_v46 }
 0x528   : > { %v7806_v53 = vrot.slane %v7778_v20, %v12229_v1  ;;  %v6292_v50 = vrot.slane %v12716_v29, %v12204_v15  ;;  %v6296_v60 = vrot.slane %v12716_v29, %v12207_v10  ;;  %v7807_v22 = vcombine.low %v7785_v32, %v7792_v54  ;;  %v7884_v3 = vpop.permute.xlu1 %7883 }
 0x529   : > { %v7774_v44 = vcombine.low %v7766_v30, %v7773_v55  ;;  %v6300_v5 = vrot.slane %v12716_v29, %v12210_v47  ;;  %v6304_v17 = vrot.slane %v12716_v29, %v12214_v6  ;;  %v7824_v4 = vcombine.low %v6276_v18, %v6280_v42 }
 0x52a   : > { %v7808_v24 = vcombine.low %v7799_v63, %v7806_v53  ;;  %v7825_v41 = vcombine.low %v6284_v9, %v6288_v40  ;;  %v7826_v27 = vcombine.low %v6292_v50, %v6296_v60  ;;  %v7815_v46 = vrot.slane %v7807_v22, %v12229_v1 }
 0x52b   : > { %7961 = vperm.xlu0 %9148, %v7774_v44   ;;  %v7827_v62 = vcombine.low %v6300_v5, %v6304_v17  ;;  %v7834_v10 = vrot.slane %v7824_v4, %v12229_v1  ;;  %v13167_v57 = vlaneseq }
 0x52c   : > { %v7822_v15 = vrot.slane %v7808_v24, %v12229_v1  ;;  %v7841_v35 = vrot.slane %v7825_v41, %v12229_v1  ;;  %v7848_v28 = vrot.slane %v7826_v27, %v12229_v1  ;;  %v7887_v52 = vpop.permute.xlu1 %7886 }
 0x52d   : > { %v7855_v47 = vrot.slane %v7827_v62, %v12229_v1  ;;  %v12840_v16 = vand.u32 127, %v13167_v57  ;;  %vm8177_vm15 = vcmp.lt.s32.totalorder %v13167_v57, 256 }
 0x52e   : > { %v7823_v8 = vcombine.low %v7815_v46, %v7822_v15  ;;  %v7856_v6 = vcombine.low %v7834_v10, %v7841_v35 }
 0x52f   : > { %v7857_v29 = vcombine.low %v7848_v28, %v7855_v47  ;;  %v7975_v19 = vadd.s32 4294967288, %v12840_v16  ;;  %v7982_v21 = vadd.s32 4294967280, %v12840_v16  ;;  %v7989_v48 = vadd.s32 4294967272, %v12840_v16 }
 0x530   : > { %7964 = vperm.xlu0 %9148, %v7823_v8   ;;  %v7864_v38 = vrot.slane %v7856_v6, %v12229_v1  ;;  %v7890_v11 = vpop.permute.xlu1 %7889  ;;  %v7996_v30 = vadd.s32 4294967264, %v12840_v16  ;;  %v7973_v49 = vsub.s32 %v12840_v16, %v13163_v12  ;;  %v8003_v32 = vadd.s32 4294967256, %v12840_v16 }
 0x531   : > { %v7871_v37 = vrot.slane %v7857_v29, %v12229_v1  ;;  %v7978_v20 = vsub.s32 %v7975_v19, %v13163_v12  ;;  %v7985_v18 = vsub.s32 %v7982_v21, %v13163_v12  ;;  %v8010_v42 = vadd.s32 4294967248, %v12840_v16 }
 0x532   : > { %v7992_v54 = vsub.s32 %v7989_v48, %v13163_v12  ;;  %v12860_v63 = vsub.s32 %v7996_v30, %v13163_v12  ;;  %v8017_v9 = vadd.s32 4294967240, %v12840_v16  ;;  %v7974_v53 = vrot.slane %v7875_v25, %v7973_v49 }
 0x533   : > { %v7872_v14 = vcombine.low %v7864_v38, %v7871_v37  ;;  %v7979_v40 = vrot.slane %v7878_v26, %v7978_v20  ;;  %v12864_v50 = vsub.s32 %v8003_v32, %v13163_v12  ;;  %v7986_v60 = vrot.slane %v7881_v33, %v7985_v18 }
 0x534   : > { %v12815_v59 = vpop.permute.xlu1 %7892  ;;  %v12867_v44 = vsub.s32 %v8010_v42, %v13163_v12  ;;  %v8024_v22 = vadd.s32 4294967232, %v12840_v16  ;;  %v7993_v17 = vrot.slane %v7884_v3, %v7992_v54  ;;  %v8000_v4 = vrot.slane %v7887_v52, %v12860_v63 }
 0x535   : > { %7967 = vperm.xlu0 %9148, %v7872_v14   ;;  %v12876_v41 = vsub.s32 %v8017_v9, %v13163_v12  ;;  %v7981_v27 = vsel %vm7980_vm0, %v7979_v40, %v7974_v53  ;;  %v8007_v46 = vrot.slane %v7890_v11, %v12864_v50  ;;  %v8031_v28 = vadd.s32 4294967224, %v12840_v16 }
 0x536   : > { %v7988_v62 = vsel %vm7987_vm1, %v7986_v60, %v7981_v27  ;;  %v8014_v15 = vrot.slane %v12815_v59, %v12867_v44  ;;  %v8027_v10 = vsub.s32 %v8024_v22, %v13163_v12  ;;  %v8038_v38 = vadd.s32 4294967216, %v12840_v16 }
 0x537   : > { %v7995_v35 = vsel %vm7994_vm2, %v7993_v17, %v7988_v62  ;;  %v8034_v52 = vsub.s32 %v8031_v28, %v13163_v12  ;;  %v8045_v25 = vadd.s32 4294967208, %v12840_v16  ;;  %v8052_v19 = vadd.s32 4294967200, %v12840_v16 }
 0x538   : > { %v12819_v58 = vpop.permute.xlu1 %7895  ;;  %v8002_v47 = vsel %vm8001_vm3, %v8000_v4, %v7995_v35  ;;  %v8041_v21 = vsub.s32 %v8038_v38, %v13163_v12  ;;  %v8059_v48 = vadd.s32 4294967192, %v12840_v16 }
 0x539   : > { %v8021_v8 = vrot.slane %v12819_v58, %v12876_v41  ;;  %v8009_v29 = vsel %vm8008_vm4, %v8007_v46, %v8002_v47 }
 0x53a   : > { %v8016_v26 = vsel %vm8015_vm5, %v8014_v15, %v8009_v29  ;;  %v8062_v53 = vsub.s32 %v8059_v48, %v13163_v12 }
 0x53b   : > { %v8023_v58 = vsel %vm8022_vm6, %v8021_v8, %v8016_v26 }
 0x53c   : > { %v12823_v39 = vpop.permute.xlu1 %7898 }
 0x53d   : > { %v8028_v33 = vrot.slane %v12823_v39, %v8027_v10 }
 0x540   : > { %v12827_v51 = vpop.permute.xlu1 %7901 }
 0x544   : > { %v12831_v31 = vpop.permute.xlu1 %7904 }
 0x548   : > { %v12835_v56 = vpop.permute.xlu1 %7907 }
 0x55d   : > { %v12842_v45 = vpop.permute.xlu1 %7922 }
 0x55e   : > { %v8083_v11 = vrot.slane %v12842_v45, %v7973_v49 }
 0x561   : > { %v7926_v7 = vpop.permute.xlu1 %7925 }
 0x562   : > { %v8087_v37 = vrot.slane %v7926_v7, %v7978_v20 }
 0x565   : > { %v12870_v5 = vpop.permute.xlu1 %7910 }
 0x569   : > { %v12813_v0 = vpop.permute.xlu0 %7928  ;;  %v12889_v6 = vpop.permute.xlu1 %7913 }
 0x56a   : > { %v8092_v3 = vrot.slane %v12813_v0, %v7985_v18  ;;  %v8088_v0 = vsel %vm7980_vm0, %v8087_v37, %v8083_v11  ;;  %v8073_v18 = vadd.s32 4294967176, %v12840_v16 }
 0x56c   : > { %v8093_v45 = vsel %vm7987_vm1, %v8092_v3, %v8088_v0 }
 0x56d   : > { %v7917_v7 = vpop.permute.xlu1 %7916 }
 0x56e   : > { %v12817_v43 = vpop.permute.xlu0 %7931 }
 0x56f   : > { %v8097_v59 = vrot.slane %v12817_v43, %v7992_v54  ;;  %v8066_v43 = vadd.s32 4294967184, %v12840_v16  ;;  %v8055_v54 = vsub.s32 %v8052_v19, %v13163_v12 }
 0x571   : > { %v8098_v32 = vsel %vm7994_vm2, %v8097_v59, %v8093_v45 }
 0x574   : > { %v12821_v36 = vpop.permute.xlu0 %7934 }
 0x575   : > { %v8102_v39 = vrot.slane %v12821_v36, %v12860_v63  ;;  %v8048_v36 = vsub.s32 %v8045_v25, %v13163_v12 }
 0x577   : > { %v8103_v63 = vsel %vm8001_vm3, %v8102_v39, %v8098_v32  ;;  %v8049_v22 = vrot.slane %v12835_v56, %v8048_v36  ;;  %v8063_v56 = vrot.slane %v12889_v6, %v8062_v53 }
 0x57e   : > { %v12825_v2 = vpop.permute.xlu0 %7937 }
 0x57f   : > { %v8107_v30 = vrot.slane %v12825_v2, %v12864_v50  ;;  %v8030_v2 = vsel %vm8029_vm7, %v8028_v33, %v8023_v58  ;;  %v8042_v50 = vrot.slane %v12831_v31, %v8041_v21 }
 0x581   : > { %v8108_v40 = vsel %vm8008_vm4, %v8107_v30, %v8103_v63 }
 0x583   : > { %v12829_v13 = vpop.permute.xlu0 %7940 }
 0x584   : > { %v8112_v49 = vrot.slane %v12829_v13, %v12867_v44  ;;  %v8035_v13 = vrot.slane %v12827_v51, %v8034_v52 }
 0x586   : > { %v8113_v60 = vsel %vm8015_vm5, %v8112_v49, %v8108_v40 }
 0x589   : > { %v12833_v61 = vpop.permute.xlu0 %7943 }
 0x58a   : > { %v8117_v42 = vrot.slane %v12833_v61, %v12876_v41  ;;  %v8069_v61 = vsub.s32 %v8066_v43, %v13163_v12  ;;  %v8056_v41 = vrot.slane %v12870_v5, %v8055_v54 }
 0x58c   : > { %v8118_v51 = vsel %vm8022_vm6, %v8117_v42, %v8113_v60  ;;  %v8070_v62 = vrot.slane %v7917_v7, %v8069_v61 }
 0x58e   : > { %v12837_v34 = vpop.permute.xlu0 %7946 }
 0x58f   : > { %v8122_v9 = vrot.slane %v12837_v34, %v8027_v10  ;;  %v8076_v34 = vsub.s32 %v8073_v18, %v13163_v12 }
 0x591   : > { %v8123_v31 = vsel %vm8029_vm7, %v8122_v9, %v8118_v51 }
 0x594   : > { %v12844_v23 = vpop.permute.xlu0 %7949 }
 0x595   : > { %v8127_v16 = vrot.slane %v12844_v23, %v8034_v52  ;;  %v7920_v23 = vpop.permute.xlu1 %7919 }
 0x596   : > { %v8077_v35 = vrot.slane %v7920_v23, %v8076_v34 }
 0x597   : > { %v8128_v12 = vsel %vm8036_vm8, %v8127_v16, %v8123_v31 }
 0x599   : > { %v12856_v55 = vpop.permute.xlu0 %7952 }
 0x59a   : > { %v8132_v44 = vrot.slane %v12856_v55, %v8041_v21  ;;  %v8037_v55 = vsel %vm8036_vm8, %v8035_v13, %v8030_v2 }
 0x59c   : > { %v8133_v5 = vsel %vm8043_vm9, %v8132_v44, %v8128_v12 }
 0x59f   : > { %v12872_v24 = vpop.permute.xlu0 %7955 }
 0x5a0   : > { %v8137_v17 = vrot.slane %v12872_v24, %v8048_v36  ;;  %v8044_v24 = vsel %vm8043_vm9, %v8042_v50, %v8037_v55 }
 0x5a1   : > { %v8051_v10 = vsel %vm8050_vm10, %v8049_v22, %v8044_v24 }
 0x5a2   : > { %v8138_v28 = vsel %vm8050_vm10, %v8137_v17, %v8133_v5  ;;  %v8058_v47 = vsel %vm8057_vm11, %v8056_v41, %v8051_v10 }
 0x5a3   : > { %v8065_v29 = vsel %vm8064_vm12, %v8063_v56, %v8058_v47 }
 0x5a4   : > { %v12893_v14 = vpop.permute.xlu0 %7958 }
 0x5a5   : > { %v8142_v27 = vrot.slane %v12893_v14, %v8055_v54  ;;  %v8072_v14 = vsel %vm8071_vm13, %v8070_v62, %v8065_v29 }
 0x5a6   : > { %v8079_v33 = vsel %vm8078_vm14, %v8077_v35, %v8072_v14 }
 0x5a7   : > { %v8143_v8 = vsel %vm8057_vm11, %v8142_v27, %v8138_v28 }
 0x5aa   : > { %v7962_v20 = vpop.permute.xlu0 %7961 }
 0x5ab   : > { %v8147_v46 = vrot.slane %v7962_v20, %v8062_v53 }
 0x5ad   : > { %v8148_v38 = vsel %vm8064_vm12, %v8147_v46, %v8143_v8 }
 0x5af   : > { %v7965_v4 = vpop.permute.xlu0 %7964 }
 0x5b0   : > { %v8152_v15 = vrot.slane %v7965_v4, %v8069_v61 }
 0x5b2   : > { %v8153_v26 = vsel %vm8071_vm13, %v8152_v15, %v8148_v38 }
 0x5b4   : > { %v7968_v6 = vpop.permute.xlu0 %7967 }
 0x5b5   : > { %v8157_v37 = vrot.slane %v7968_v6, %v8076_v34 }
 0x5b7   : > { %v8158_v3 = vsel %vm8078_vm14, %v8157_v37, %v8153_v26 }
 0x5b8   : > { %v8159_v52 = vcombine.low %v8079_v33, %v8158_v3 }
 0x5ba   : > { %v8166_v25 = vrot.slane %v8159_v52, %v12229_v1 }
 0x5bc   : > { %v8173_v11 = vrot.slane %v8166_v25, %v12229_v1 }
 0x5be   : > { %8179 = vst.msk [vmem:[%s289_s20] sm:$0x3] %vm8177_vm15, %v8173_v11 }
 0x5bf   : > { %10086 = shalt.err (!%p10083_p7)
}
 0x5c0   : > { %s10087_s18 = scalar_lea.hbm %s12960_s23, 32  ;;  %s10091_s16 = scalar_lea.hbm %s13011_s7, 64 }
 0x5c1   : > { %p10088_p8 = scmp.ne.s32.totalorder %s12960_s23, %s10087_s18  ;;  %p10092_p1 = scmp.lt.u32.totalorder %s12960_s23, %s13011_s7 }
 0x5c2   : > { %p10093_p0 = scmp.lt.u32.totalorder %s10091_s16, %s10087_s18  ;;  %p10095_p6 = scmp.lt.u32.totalorder %s10087_s18, %s12960_s23 }
 0x5c3   : > { %p10089_p11 = pnand %p10088_p8, %p13168_p9 }
 0x5c4   : > { %p10094_p5 = por %p10093_p0, %p10092_p1 }
 0x5c5   : > { %p10090_p13 = pneg %p10089_p11 }
 0x5c6   : > { %p10096_p10 = por %p10095_p6, %p10094_p5 }
 0x5c8   : > { %p10097_p12 = pnand %p10096_p10, %p10090_p13 }
 0x5ca   : > { %10100 = shalt.err (!%p10097_p12)
}
 0x5cb   : > { %9055 = dma.vmem_to_hbm [thread:$0]  (%p13168_p9), %s12962_s6, 32, %s12960_s23, %s8181_s24  }
 0x5cc PF: > { %p9067_p2 = scmp.ge.s32.totalorder %s10139_s29, 2  ;;  %s8207_s20 = sand.u32 1, %s10127_s26  }
 0x5cd   : > { %p13169_p3 = scmp.ne.s32.totalorder %s13084_s13, 0  ;;  %s8208_s21 = scalar_lea.sflag [#allocation5], %s8207_s20 }
 0x5cf   : > { %p9062_p4 = pnand %p9067_p2, %p13169_p3 }
 0x5d1   : > { %10122 = dma.done.wait (!%p9062_p4), %s8208_s21, 32  }
 0x5d2   : > { %10124 = vsyncadd (!%p9062_p4), %s8208_s21, 4294967264  ;;  %p20_p7 = scmp.ge.s32.totalorder %s10216_s8, 4   ;;  %s13170_s26 = smov %s10131_s27 }
 0x5d3   : > { %s13171_s27 = smov %s10135_s28  ;;  %s13172_s28 = smov %s10227_s11 }
 0x5d4   : > { %s13173_s29 = smov %s10216_s8  ;;  %22 = sbr.rel (!%p20_p7) target bundleno = 7 (0x7), region = 91 }
 0x5db   :  { %8213 = vsyncpa [#allocation4], 1 }
 0x5dc   :  { %8215 = vsyncpa [#allocation4 + $0x1], 1 }
 0x5dd   :  { %8216 = vsyncpa [#allocation5], 1 }
 0x5de   :  { %8218 = vsyncpa [#allocation5 + $0x1], 1 }

</bundles_post_ra>
